<compile_context>
chip_gen: v7x
topology: tpu7x:2x2x1
jax: 0.10.0
libtpu: 0.0.40
codegen_flags: <defaults>
</compile_context>

<pallas_src>
import functools

import jax
import jax.numpy as jnp
from jax import lax
from jax.experimental import pallas as pl
from jax.experimental.pallas import tpu as pltpu


def _round_up(x, m):
    return ((x + m - 1) // m) * m


def _pick_row_tile(m, cap=256):
    """Row tile: multiple of 16 (bf16 sublane packing), divisor-aware padding."""
    mr = _round_up(m, 16)
    if mr <= cap:
        return mr
    best_t, best_pad = cap, _round_up(m, cap) - m
    for cand in (256, 224, 192, 160, 128):
        pad = _round_up(m, cand) - m
        if pad < best_pad:
            best_t, best_pad = cand, pad
    return best_t


# ----------------------------------------------------------------------------
# Tiled GEMM kernel with fused bias + activation (bf16 MXU, f32 accumulate)
# ----------------------------------------------------------------------------
def _mm_kernel(a_ref, b_ref, *rest, act, has_bias):
    if has_bias:
        bias_ref, o_ref, acc_ref = rest
    else:
        o_ref, acc_ref = rest
        bias_ref = None

    @pl.when(pl.program_id(2) == 0)
    def _init():
        acc_ref[...] = jnp.zeros_like(acc_ref)

    acc_ref[...] += jnp.dot(a_ref[...], b_ref[...],
                            preferred_element_type=jnp.float32)

    @pl.when(pl.program_id(2) == pl.num_programs(2) - 1)
    def _finalize():
        y = acc_ref[...]
        if bias_ref is not None:
            y = y + bias_ref[...]
        if act == "swish":
            y = y * jax.nn.sigmoid(y)
        elif act == "relu":
            y = jnp.maximum(y, 0.0)
        o_ref[...] = y.astype(o_ref.dtype)


def pallas_matmul(a, b, bias=None, act="none", out_dtype=jnp.float32,
                  tn=256, tk=512):
    """(M,K) @ (K,N) + bias, fused activation."""
    M, K = a.shape
    K2, N = b.shape
    assert K == K2
    tm = _pick_row_tile(M)
    # keep >=2 row blocks on the parallel axis when there is enough work (v7x: 2 TCs)
    if M >= 32 and _round_up(M, tm) // tm < 2:
        tm = _round_up((M + 1) // 2, 16)
    tn = min(tn, _round_up(N, 128))
    tk = min(tk, _round_up(K, 128))
    Mp, Kp, Np = _round_up(M, tm), _round_up(K, tk), _round_up(N, tn)

    a_p = jnp.pad(a.astype(jnp.bfloat16), ((0, Mp - M), (0, Kp - K)))
    b_p = jnp.pad(b.astype(jnp.bfloat16), ((0, Kp - K), (0, Np - N)))

    in_specs = [pl.BlockSpec((tm, tk), lambda i, j, k: (i, k)),
                pl.BlockSpec((tk, tn), lambda i, j, k: (k, j))]
    args = [a_p, b_p]
    has_bias = bias is not None
    if has_bias:
        bias_p = jnp.pad(bias.reshape(1, N).astype(jnp.float32),
                         ((0, 0), (0, Np - N)))
        in_specs.append(pl.BlockSpec((1, tn), lambda i, j, k: (0, j)))
        args.append(bias_p)

    grid = (Mp // tm, Np // tn, Kp // tk)
    itemsize_out = jnp.dtype(out_dtype).itemsize
    cost = pl.CostEstimate(
        flops=2 * Mp * Np * Kp,
        transcendentals=(Mp * Np if act == "swish" else 0),
        bytes_accessed=2 * (a_p.size + b_p.size) + Mp * Np * itemsize_out,
    )

    y = pl.pallas_call(
        functools.partial(_mm_kernel, act=act, has_bias=has_bias),
        out_shape=jax.ShapeDtypeStruct((Mp, Np), out_dtype),
        grid=grid,
        in_specs=in_specs,
        out_specs=pl.BlockSpec((tm, tn), lambda i, j, k: (i, j)),
        scratch_shapes=[pltpu.VMEM((tm, tn), jnp.float32)],
        compiler_params=pltpu.CompilerParams(
            dimension_semantics=("parallel", "parallel", "arbitrary")),
        cost_estimate=cost,
    )(*args)

    if (Mp, Np) != (M, N):
        y = y[:M, :N]
    return y


# ----------------------------------------------------------------------------
# Fused 3x3 conv (stride 1, pad 1, no bias) + InstanceNorm2d + ReLU
# on a zero-padded flattened NHWC "canvas" — no im2col, no HBM patch matrix.
#
# Canvas layout: (B, (H+3)*(W+2), C) = zero pad of 1 top / 2 bottom rows and
# 1 left / 1 right column, flattened row-major over (H+3, W+2).  Valid data at
# canvas[1+h, 1+w].  The kernel reads 9 shifted flat windows (one per tap),
# accumulates 9 tap GEMMs in f32, applies masked InstanceNorm+ReLU over the
# valid positions only, and writes the result back in the SAME canvas layout
# with zeroed borders so it can be fed straight into the next 3x3 conv.
# ----------------------------------------------------------------------------
def _conv3x3_in_relu_kernel(*refs, n_in, H, W, Cout, eps):
    Wp = W + 2
    Hc = H * Wp                       # compute rows: valid h, all padded-width cols
    rows = (H + 3) * Wp               # canvas rows
    x_refs = refs[:n_in]
    w_refs = refs[n_in:2 * n_in]
    o_ref = refs[2 * n_in]

    acc = jnp.zeros((Hc, Cout), jnp.float32)
    for t in range(9):                # static tap loop: 9 shifted-window GEMMs
        di, dj = t // 3, t % 3
        off = di * Wp + dj            # flat row shift of this tap
        for x_ref, w_ref in zip(x_refs, w_refs):
            xs = x_ref[0, pl.ds(off, Hc), :]
            acc = acc + jnp.dot(xs, w_ref[t],
                                preferred_element_type=jnp.float32)

    # InstanceNorm2d(affine=False, biased var) + ReLU over valid positions only.
    col = lax.broadcasted_iota(jnp.int32, (Hc, 1), 0) % Wp
    valid = col < W
    inv_n = 1.0 / float(H * W)
    mean = jnp.sum(jnp.where(valid, acc, 0.0), axis=0, keepdims=True) * inv_n
    cent = acc - mean
    var = jnp.sum(jnp.where(valid, cent * cent, 0.0), axis=0, keepdims=True) * inv_n
    y = jnp.maximum(cent * lax.rsqrt(var + eps), 0.0)
    y = jnp.where(valid, y, 0.0)      # zero padded-width columns -> clean canvas

    # Valid output (h, w) lands at canvas flat index (h+1)*Wp + (w+1) = s + Wp + 1.
    o_ref[0, pl.ds(Wp + 1, Hc), :] = y.astype(o_ref.dtype)
    o_ref[0, pl.ds(0, Wp + 1), :] = jnp.zeros((Wp + 1, Cout), o_ref.dtype)
    tail = rows - (Wp + 1 + Hc)       # = 2*Wp - 1
    o_ref[0, pl.ds(Wp + 1 + Hc, tail), :] = jnp.zeros((tail, Cout), o_ref.dtype)


def to_canvas(x_nhwc):
    """Zero-pad (1 top, 2 bottom, 1 left, 1 right) and flatten spatial dims."""
    B, H, W, C = x_nhwc.shape
    xp = jnp.pad(x_nhwc.astype(jnp.bfloat16), ((0, 0), (1, 2), (1, 1), (0, 0)))
    return xp.reshape(B, (H + 3) * (W + 2), C)


def pallas_conv3x3_in_relu(canvases, weight_pt, H, W, eps=1e-5,
                           out_dtype=jnp.bfloat16):
    """canvases: list of (B, (H+3)*(W+2), Ci) bf16 channel-split input canvases.
       weight_pt: PyTorch-layout (Cout, sum(Ci), 3, 3), no bias.
       Returns the output canvas (B, (H+3)*(W+2), Cout) with zeroed borders."""
    B = canvases[0].shape[0]
    rows = (H + 3) * (W + 2)
    Cout = weight_pt.shape[0]
    cs = [c.shape[-1] for c in canvases]
    assert sum(cs) == weight_pt.shape[1]

    # (Cout, Ctot, 3, 3) -> per-tap (9, Ctot, Cout), split along Cin per canvas.
    w_all = weight_pt.transpose(2, 3, 1, 0).reshape(9, sum(cs), Cout)
    w_all = w_all.astype(jnp.bfloat16)
    w_splits, off = [], 0
    for ci in cs:
        w_splits.append(w_all[:, off:off + ci, :])
        off += ci

    in_specs = ([pl.BlockSpec((1, rows, ci), lambda b: (b, 0, 0)) for ci in cs]
                + [pl.BlockSpec((9, ci, Cout), lambda b: (0, 0, 0)) for ci in cs])

    return pl.pallas_call(
        functools.partial(_conv3x3_in_relu_kernel, n_in=len(canvases),
                          H=H, W=W, Cout=Cout, eps=eps),
        out_shape=jax.ShapeDtypeStruct((B, rows, Cout), out_dtype),
        grid=(B,),
        in_specs=in_specs,
        out_specs=pl.BlockSpec((1, rows, Cout), lambda b: (b, 0, 0)),
        compiler_params=pltpu.CompilerParams(dimension_semantics=("parallel",)),
    )(*canvases, *w_splits)


# ----------------------------------------------------------------------------
# Fused depth head: 1x1 conv + softmax over D + CxD outer product.
# The one-hot expansion is folded into the weights at trace time; a single
# merged (Kin, 128) matmul yields [logits | expanded-feat]; output is one
# lane-dense (tm, 128) store packing [depth | feat*depth | 0-pad].
# ----------------------------------------------------------------------------
def _depth_head_kernel(x_ref, w_ref, b_ref, o_ref, *, D, C):
    x = x_ref[...]                                              # (tm, Kin) bf16
    y = jnp.dot(x, w_ref[...], preferred_element_type=jnp.float32) + b_ref[...]
    logits = y[:, :D]
    feat_exp = y[:, D:D + C * D]                                # col c*D+d = feat[c]
    m = jnp.max(logits, axis=-1, keepdims=True)
    e = jnp.exp(logits - m)
    depth = e / jnp.sum(e, axis=-1, keepdims=True)              # exact softmax
    prod = feat_exp * jnp.tile(depth, (1, C))                   # col c*D+d = feat[c]*depth[d]
    npad = o_ref.shape[-1] - (D + C * D)
    pieces = [depth, prod]
    if npad:
        pieces.append(jnp.zeros((x.shape[0], npad), jnp.float32))
    o_ref[...] = jnp.concatenate(pieces, axis=-1)


def pallas_depth_head(rows, w_pt, b_pt, D, C):
    """rows: (N, Kin); w_pt: (C+D, Kin) flattened 1x1-conv weight; b_pt: (C+D,).
       Returns depth (N, D) and outer-product features (N, C*D), both f32."""
    N, Kin = rows.shape
    CD = C * D
    Npad = _round_up(D + CD, 128)

    wd = w_pt[:D].T.astype(jnp.float32)                         # (Kin, D)
    wf = w_pt[D:D + C].T.astype(jnp.float32)                    # (Kin, C)
    wf_exp = jnp.repeat(wf, D, axis=1)                          # (Kin, C*D)
    w_head = jnp.concatenate([wd, wf_exp], axis=1)
    w_head = jnp.pad(w_head, ((0, 0), (0, Npad - D - CD))).astype(jnp.bfloat16)
    b_head = jnp.concatenate([b_pt[:D].astype(jnp.float32),
                              jnp.repeat(b_pt[D:D + C].astype(jnp.float32), D)])
    b_head = jnp.pad(b_head, (0, Npad - D - CD)).reshape(1, Npad)

    tm = _pick_row_tile(N)
    if N >= 32 and _round_up(N, tm) // tm < 2:                  # >=2 blocks for megacore
        tm = _round_up((N + 1) // 2, 16)
    Np_ = _round_up(N, tm)
    rows_p = jnp.pad(rows.astype(jnp.bfloat16), ((0, Np_ - N), (0, 0)))

    out = pl.pallas_call(
        functools.partial(_depth_head_kernel, D=D, C=C),
        out_shape=jax.ShapeDtypeStruct((Np_, Npad), jnp.float32),
        grid=(Np_ // tm,),
        in_specs=[pl.BlockSpec((tm, Kin), lambda i: (i, 0)),
                  pl.BlockSpec((Kin, Npad), lambda i: (0, 0)),
                  pl.BlockSpec((1, Npad), lambda i: (0, 0))],
        out_specs=pl.BlockSpec((tm, Npad), lambda i: (i, 0)),
        compiler_params=pltpu.CompilerParams(dimension_semantics=("parallel",)),
    )(rows_p, w_head, b_head)
    return out[:N, :D], out[:N, D:D + CD]


# ----------------------------------------------------------------------------
# Non-overlapping conv (kernel_size == stride): pure reshape/transpose patchify
# (no replication) + Pallas GEMM with fused bias + activation.
# ----------------------------------------------------------------------------
def conv_patchify_gemm(x, w, bias, act):
    B, H, W, Cin = x.shape
    Cout, Cin2, kh, kw = w.shape
    assert Cin == Cin2 and H % kh == 0 and W % kw == 0
    Ho, Wo = H // kh, W // kw
    p = x.reshape(B, Ho, kh, Wo, kw, Cin).transpose(0, 1, 3, 2, 4, 5)
    p = p.reshape(B * Ho * Wo, kh * kw * Cin)
    w2 = w.transpose(2, 3, 1, 0).reshape(kh * kw * Cin, Cout)
    y = pallas_matmul(p, w2, bias=bias, act=act, out_dtype=jnp.bfloat16)
    return y.reshape(B, Ho, Wo, Cout)


def upsample2x_bilinear_nhwc(x):
    """2x nn.Upsample(mode='bilinear', align_corners=False): fixed 0.25/0.75
    weights -> shifted weighted adds + interleave (left to XLA VPU fusion)."""
    B, H, W, C = x.shape
    xp = jnp.concatenate([x[:, :1], x[:, :-1]], axis=1)
    xn = jnp.concatenate([x[:, 1:], x[:, -1:]], axis=1)
    r_even = 0.75 * x + 0.25 * xp
    r_odd = 0.75 * x + 0.25 * xn
    y = jnp.stack([r_even, r_odd], axis=2).reshape(B, 2 * H, W, C)
    yp = jnp.concatenate([y[:, :, :1], y[:, :, :-1]], axis=2)
    yn = jnp.concatenate([y[:, :, 1:], y[:, :, -1:]], axis=2)
    c_even = 0.75 * y + 0.25 * yp
    c_odd = 0.75 * y + 0.25 * yn
    return jnp.stack([c_even, c_odd], axis=3).reshape(B, 2 * H, 2 * W, C)


# ----------------------------------------------------------------------------
# Encoder
# ----------------------------------------------------------------------------
def init_params(key, C, D):
    ks = jax.random.split(key, 8)
    nrm = lambda k, shape, s: s * jax.random.normal(k, shape, jnp.float32)
    p = {}
    # stand-in backbone producing (56ch, /8) and (160ch, /16) features
    p["stem_w"] = nrm(ks[0], (56, 3, 8, 8), 0.05)
    p["stem_b"] = nrm(ks[1], (56,), 0.05)
    p["down_w"] = nrm(ks[2], (160, 56, 2, 2), 0.05)
    p["down_b"] = nrm(ks[3], (160,), 0.05)
    # UpsamplingConcat: Conv2d(216,128,3,pad=1,bias=False) x2 (+ InstanceNorm + ReLU)
    p["up_conv1_w"] = nrm(ks[4], (128, 160 + 56, 3, 3), 0.02)
    p["up_conv2_w"] = nrm(ks[5], (128, 128, 3, 3), 0.02)
    # depth_layer: Conv2d(128, C + D, kernel_size=1, bias=True)
    p["depth_w"] = nrm(ks[6], (C + D, 128, 1, 1), 0.05)
    p["depth_b"] = nrm(ks[7], (C + D,), 0.05)
    return p


def encoder_forward(params, x_nchw, *, C, D):
    # NCHW -> NHWC, cast to bf16 BEFORE any patch extraction / padding.
    x = x_nchw.transpose(0, 2, 3, 1).astype(jnp.bfloat16)

    # --- get_features (backbone stand-in, see TODO(synk)) ---
    f8 = conv_patchify_gemm(x, params["stem_w"], params["stem_b"], act="swish")
    f16 = conv_patchify_gemm(f8, params["down_w"], params["down_b"], act="swish")

    # --- UpsamplingConcat(input_1=f16, input_2=f8): the concat is never
    #     materialized; conv1 consumes the two channel-split canvases directly. ---
    up = upsample2x_bilinear_nhwc(f16)
    B, H, W, _ = f8.shape
    c1 = pallas_conv3x3_in_relu([to_canvas(f8), to_canvas(up)],
                                params["up_conv1_w"], H, W)
    c2 = pallas_conv3x3_in_relu([c1], params["up_conv2_w"], H, W)

    # --- fused depth head on the canvas rows (1x1 conv + softmax + outer product) ---
    rows = c2.reshape(B * (H + 3) * (W + 2), -1)
    w_head = params["depth_w"].reshape(C + D, -1)
    depth_rows, prod_rows = pallas_depth_head(rows, w_head, params["depth_b"], D, C)

    depth_c = depth_rows.reshape(B, H + 3, W + 2, D)[:, 1:1 + H, 1:1 + W, :]
    prod_c = prod_rows.reshape(B, H + 3, W + 2, C, D)[:, 1:1 + H, 1:1 + W]
    depth = depth_c.transpose(0, 3, 1, 2)                      # (B, D, H, W)
    out = prod_c.transpose(0, 3, 4, 1, 2)                      # (B, C, D, H, W)
    return out, depth


# ----------------------------------------------------------------------------
# Pure-JAX reference (mirrors the bf16 cast points of the Pallas path)
# ----------------------------------------------------------------------------
def reference_forward(params, x_nchw, *, C, D):
    f32, bf16 = jnp.float32, jnp.bfloat16

    def conv(x, w_pt, b=None, stride=1, pad=0):
        w = w_pt.astype(bf16).astype(f32).transpose(2, 3, 1, 0)   # HWIO
        y = lax.conv_general_dilated(
            x.astype(bf16).astype(f32), w, (stride, stride),
            [(pad, pad), (pad, pad)],
            dimension_numbers=("NHWC", "HWIO", "NHWC"))
        return y if b is None else y + b

    def inorm_relu(x, eps=1e-5):
        mean = x.mean(axis=(1, 2), keepdims=True)
        var = ((x - mean) ** 2).mean(axis=(1, 2), keepdims=True)
        return jnp.maximum((x - mean) * lax.rsqrt(var + eps), 0.0)

    x = x_nchw.transpose(0, 2, 3, 1)
    f8 = conv(x, params["stem_w"], params["stem_b"], stride=8)
    f8 = f8 * jax.nn.sigmoid(f8)
    f16 = conv(f8, params["down_w"], params["down_b"], stride=2)
    f16 = f16 * jax.nn.sigmoid(f16)
    up = upsample2x_bilinear_nhwc(f16.astype(bf16)).astype(f32)
    cat = jnp.concatenate([f8, up], axis=-1)
    y = inorm_relu(conv(cat, params["up_conv1_w"], stride=1, pad=1))
    y = inorm_relu(conv(y, params["up_conv2_w"], stride=1, pad=1))
    w_head = params["depth_w"].reshape(C + D, -1).astype(bf16).astype(f32)
    head = jnp.einsum("bhwk,ok->bhwo", y.astype(bf16).astype(f32), w_head)
    head = head + params["depth_b"]
    depth = jax.nn.softmax(head[..., :D], axis=-1)
    feat = head[..., D:D + C]
    out = (depth[..., None, :] * feat[..., :, None]).transpose(0, 3, 4, 1, 2)
    return out, depth.transpose(0, 3, 1, 2)


if __name__ == "__main__":
    C, D = 8, 12
    key = jax.random.PRNGKey(0)
    kx, kp = jax.random.split(key)
    x = jax.random.normal(kx, (2, 3, 32, 32), jnp.float32)   # NCHW input, like PyTorch
    params = init_params(kp, C, D)

    fwd = jax.jit(functools.partial(encoder_forward, C=C, D=D))
    out, depth = fwd(params, x)
    jax.block_until_ready((out, depth))

    assert out.shape == (2, C, D, 4, 4), out.shape
    assert depth.shape == (2, D, 4, 4), depth.shape
    # sanity: softmax over depth channels sums to 1, outputs are finite
    assert jnp.allclose(depth.sum(axis=1), 1.0, atol=1e-4)
    assert bool(jnp.all(jnp.isfinite(out)))

    # correctness vs. pure-JAX reference (bf16-matched; loose tolerance)
    out_ref, depth_ref = jax.jit(functools.partial(reference_forward, C=C, D=D))(params, x)
    assert jnp.allclose(depth, depth_ref, atol=5e-2, rtol=5e-2), \
        float(jnp.max(jnp.abs(depth - depth_ref)))
    assert jnp.allclose(out, out_ref, atol=5e-2, rtol=5e-2), \
        float(jnp.max(jnp.abs(out - out_ref)))
    print("KERNEL_OK")
</pallas_src>

<mosaic_0001>
module attributes {stable_mosaic.version = 11 : i64} {
  func.func @_mm_kernel(%arg0: i32, %arg1: i32, %arg2: i32, %arg3: memref<16x256xbf16, #tpu.memory_space<vmem>>, %arg4: memref<256x128xbf16, #tpu.memory_space<vmem>>, %arg5: memref<1x128xf32, #tpu.memory_space<vmem>>, %arg6: memref<16x128xbf16, #tpu.memory_space<vmem>>, %arg7: memref<16x128xf32, #tpu.memory_space<vmem>>) attributes {dimension_semantics = [#tpu.dimension_semantics<parallel>, #tpu.dimension_semantics<parallel>, #tpu.dimension_semantics<arbitrary>], iteration_bounds = array<i64: 2, 1, 1>, scalar_prefetch = 0 : i64, scratch_operands = 1 : i64, tpu.core_type = #tpu.core_type<tc>, window_params = [{transform_indices = @transform_0, window_bounds = array<i64: 16, 256>}, {transform_indices = @transform_1, window_bounds = array<i64: 256, 128>}, {transform_indices = @transform_2, window_bounds = array<i64: 1, 128>}, {transform_indices = @transform_3, window_bounds = array<i64: 16, 128>}]} {
    %c0_i32 = arith.constant 0 : i32
    %0 = arith.cmpi eq, %arg2, %c0_i32 : i32
    %1 = arith.extui %0 : i1 to i32
    %c0_i32_0 = arith.constant 0 : i32
    %2 = arith.cmpi ne, %1, %c0_i32_0 : i32
    scf.if %2 {
      %cst_10 = arith.constant 0.000000e+00 : f32
      %12 = vector.broadcast %cst_10 : f32 to vector<16x128xf32>
      %c0_11 = arith.constant 0 : index
      %c0_12 = arith.constant 0 : index
      %13 = vector.load %arg7[%c0_11, %c0_12] : memref<16x128xf32, #tpu.memory_space<vmem>>, vector<16x128xf32>
      tpu.vector_store %arg7[%c0_11, %c0_12], %12 {strides = array<i32>} : memref<16x128xf32, #tpu.memory_space<vmem>>, vector<16x128xf32>,
    } else {
    }
    %c0 = arith.constant 0 : index
    %c0_1 = arith.constant 0 : index
    %3 = vector.load %arg7[%c0, %c0_1] : memref<16x128xf32, #tpu.memory_space<vmem>>, vector<16x128xf32>
    %c0_2 = arith.constant 0 : index
    %c0_3 = arith.constant 0 : index
    %4 = vector.load %arg3[%c0_2, %c0_3] : memref<16x256xbf16, #tpu.memory_space<vmem>>, vector<16x256xbf16>
    %c0_4 = arith.constant 0 : index
    %c0_5 = arith.constant 0 : index
    %5 = vector.load %arg4[%c0_4, %c0_5] : memref<256x128xbf16, #tpu.memory_space<vmem>>, vector<256x128xbf16>
    %cst = arith.constant dense<0.000000e+00> : vector<16x128xf32>
    %6 = tpu.matmul %4, %5, %cst {dimension_numbers = #tpu.dot_dimension_numbers<[1], [0], [0], [1], [0, 0, 1, 1], [], []>} : vector<16x256xbf16>, vector<256x128xbf16>, vector<16x128xf32> -> vector<16x128xf32>
    %7 = arith.addf %3, %6 : vector<16x128xf32>
    %c0_6 = arith.constant 0 : index
    %c0_7 = arith.constant 0 : index
    %8 = vector.load %arg7[%c0_6, %c0_7] : memref<16x128xf32, #tpu.memory_space<vmem>>, vector<16x128xf32>
    tpu.vector_store %arg7[%c0_6, %c0_7], %7 {strides = array<i32>} : memref<16x128xf32, #tpu.memory_space<vmem>>, vector<16x128xf32>,
    %c0_i32_8 = arith.constant 0 : i32
    %9 = arith.cmpi eq, %arg2, %c0_i32_8 : i32
    %10 = arith.extui %9 : i1 to i32
    %c0_i32_9 = arith.constant 0 : i32
    %11 = arith.cmpi ne, %10, %c0_i32_9 : i32
    scf.if %11 {
      %c0_10 = arith.constant 0 : index
      %c0_11 = arith.constant 0 : index
      %12 = vector.load %arg7[%c0_10, %c0_11] : memref<16x128xf32, #tpu.memory_space<vmem>>, vector<16x128xf32>
      %c0_12 = arith.constant 0 : index
      %c0_13 = arith.constant 0 : index
      %13 = vector.load %arg5[%c0_12, %c0_13] : memref<1x128xf32, #tpu.memory_space<vmem>>, vector<1x128xf32>
      %14 = vector.broadcast %13 : vector<1x128xf32> to vector<16x128xf32>
      %15 = arith.addf %12, %14 : vector<16x128xf32>
      %16 = arith.negf %15 : vector<16x128xf32>
      %17 = math.exp %16 : vector<16x128xf32>
      %cst_14 = arith.constant 1.000000e+00 : f32
      %18 = vector.broadcast %cst_14 : f32 to vector<16x128xf32>
      %19 = arith.addf %18, %17 : vector<16x128xf32>
      %20 = arith.divf %18, %19 : vector<16x128xf32>
      %21 = arith.mulf %15, %20 : vector<16x128xf32>
      %22 = arith.truncf %21 : vector<16x128xf32> to vector<16x128xbf16>
      %c0_15 = arith.constant 0 : index
      %c0_16 = arith.constant 0 : index
      %23 = vector.load %arg6[%c0_15, %c0_16] : memref<16x128xbf16, #tpu.memory_space<vmem>>, vector<16x128xbf16>
      tpu.vector_store %arg6[%c0_15, %c0_16], %22 {strides = array<i32>} : memref<16x128xbf16, #tpu.memory_space<vmem>>, vector<16x128xbf16>,
    } else {
    }
    return
  }
  func.func @transform_0(%arg0: i32, %arg1: i32, %arg2: i32) -> (i32, i32) {
    %c0_i32 = arith.constant 0 : i32
    return %arg0, %arg2 : i32, i32
  }
  func.func @transform_1(%arg0: i32, %arg1: i32, %arg2: i32) -> (i32, i32) {
    %c0_i32 = arith.constant 0 : i32
    return %arg2, %arg1 : i32, i32
  }
  func.func @transform_2(%arg0: i32, %arg1: i32, %arg2: i32) -> (i32, i32) {
    %c0_i32 = arith.constant 0 : i32
    %c0_i32_0 = arith.constant 0 : i32
    return %c0_i32, %arg1 : i32, i32
  }
  func.func @transform_3(%arg0: i32, %arg1: i32, %arg2: i32) -> (i32, i32) {
    %c0_i32 = arith.constant 0 : i32
    return %arg0, %arg1 : i32, i32
  }
}

module attributes {stable_mosaic.version = 11 : i64} {
  func.func @_mm_kernel(%arg0: i32, %arg1: i32, %arg2: i32, %arg3: memref<16x256xbf16, #tpu.memory_space<vmem>>, %arg4: memref<256x256xbf16, #tpu.memory_space<vmem>>, %arg5: memref<1x256xf32, #tpu.memory_space<vmem>>, %arg6: memref<16x256xbf16, #tpu.memory_space<vmem>>, %arg7: memref<16x256xf32, #tpu.memory_space<vmem>>) attributes {dimension_semantics = [#tpu.dimension_semantics<parallel>, #tpu.dimension_semantics<parallel>, #tpu.dimension_semantics<arbitrary>], iteration_bounds = array<i64: 1, 1, 1>, scalar_prefetch = 0 : i64, scratch_operands = 1 : i64, tpu.core_type = #tpu.core_type<tc>, window_params = [{transform_indices = @transform_0, window_bounds = array<i64: 16, 256>}, {transform_indices = @transform_1, window_bounds = array<i64: 256, 256>}, {transform_indices = @transform_2, window_bounds = array<i64: 1, 256>}, {transform_indices = @transform_3, window_bounds = array<i64: 16, 256>}]} {
    %c0_i32 = arith.constant 0 : i32
    %0 = arith.cmpi eq, %arg2, %c0_i32 : i32
    %1 = arith.extui %0 : i1 to i32
    %c0_i32_0 = arith.constant 0 : i32
    %2 = arith.cmpi ne, %1, %c0_i32_0 : i32
    scf.if %2 {
      %cst_10 = arith.constant 0.000000e+00 : f32
      %12 = vector.broadcast %cst_10 : f32 to vector<16x256xf32>
      %c0_11 = arith.constant 0 : index
      %c0_12 = arith.constant 0 : index
      %13 = vector.load %arg7[%c0_11, %c0_12] : memref<16x256xf32, #tpu.memory_space<vmem>>, vector<16x256xf32>
      tpu.vector_store %arg7[%c0_11, %c0_12], %12 {strides = array<i32>} : memref<16x256xf32, #tpu.memory_space<vmem>>, vector<16x256xf32>,
    } else {
    }
    %c0 = arith.constant 0 : index
    %c0_1 = arith.constant 0 : index
    %3 = vector.load %arg7[%c0, %c0_1] : memref<16x256xf32, #tpu.memory_space<vmem>>, vector<16x256xf32>
    %c0_2 = arith.constant 0 : index
    %c0_3 = arith.constant 0 : index
    %4 = vector.load %arg3[%c0_2, %c0_3] : memref<16x256xbf16, #tpu.memory_space<vmem>>, vector<16x256xbf16>
    %c0_4 = arith.constant 0 : index
    %c0_5 = arith.constant 0 : index
    %5 = vector.load %arg4[%c0_4, %c0_5] : memref<256x256xbf16, #tpu.memory_space<vmem>>, vector<256x256xbf16>
    %cst = arith.constant dense<0.000000e+00> : vector<16x256xf32>
    %6 = tpu.matmul %4, %5, %cst {dimension_numbers = #tpu.dot_dimension_numbers<[1], [0], [0], [1], [0, 0, 1, 1], [], []>} : vector<16x256xbf16>, vector<256x256xbf16>, vector<16x256xf32> -> vector<16x256xf32>
    %7 = arith.addf %3, %6 : vector<16x256xf32>
    %c0_6 = arith.constant 0 : index
    %c0_7 = arith.constant 0 : index
    %8 = vector.load %arg7[%c0_6, %c0_7] : memref<16x256xf32, #tpu.memory_space<vmem>>, vector<16x256xf32>
    tpu.vector_store %arg7[%c0_6, %c0_7], %7 {strides = array<i32>} : memref<16x256xf32, #tpu.memory_space<vmem>>, vector<16x256xf32>,
    %c0_i32_8 = arith.constant 0 : i32
    %9 = arith.cmpi eq, %arg2, %c0_i32_8 : i32
    %10 = arith.extui %9 : i1 to i32
    %c0_i32_9 = arith.constant 0 : i32
    %11 = arith.cmpi ne, %10, %c0_i32_9 : i32
    scf.if %11 {
      %c0_10 = arith.constant 0 : index
      %c0_11 = arith.constant 0 : index
      %12 = vector.load %arg7[%c0_10, %c0_11] : memref<16x256xf32, #tpu.memory_space<vmem>>, vector<16x256xf32>
      %c0_12 = arith.constant 0 : index
      %c0_13 = arith.constant 0 : index
      %13 = vector.load %arg5[%c0_12, %c0_13] : memref<1x256xf32, #tpu.memory_space<vmem>>, vector<1x256xf32>
      %14 = vector.broadcast %13 : vector<1x256xf32> to vector<16x256xf32>
      %15 = arith.addf %12, %14 : vector<16x256xf32>
      %16 = arith.negf %15 : vector<16x256xf32>
      %17 = math.exp %16 : vector<16x256xf32>
      %cst_14 = arith.constant 1.000000e+00 : f32
      %18 = vector.broadcast %cst_14 : f32 to vector<16x256xf32>
      %19 = arith.addf %18, %17 : vector<16x256xf32>
      %20 = arith.divf %18, %19 : vector<16x256xf32>
      %21 = arith.mulf %15, %20 : vector<16x256xf32>
      %22 = arith.truncf %21 : vector<16x256xf32> to vector<16x256xbf16>
      %c0_15 = arith.constant 0 : index
      %c0_16 = arith.constant 0 : index
      %23 = vector.load %arg6[%c0_15, %c0_16] : memref<16x256xbf16, #tpu.memory_space<vmem>>, vector<16x256xbf16>
      tpu.vector_store %arg6[%c0_15, %c0_16], %22 {strides = array<i32>} : memref<16x256xbf16, #tpu.memory_space<vmem>>, vector<16x256xbf16>,
    } else {
    }
    return
  }
  func.func @transform_0(%arg0: i32, %arg1: i32, %arg2: i32) -> (i32, i32) {
    %c0_i32 = arith.constant 0 : i32
    return %arg0, %arg2 : i32, i32
  }
  func.func @transform_1(%arg0: i32, %arg1: i32, %arg2: i32) -> (i32, i32) {
    %c0_i32 = arith.constant 0 : i32
    return %arg2, %arg1 : i32, i32
  }
  func.func @transform_2(%arg0: i32, %arg1: i32, %arg2: i32) -> (i32, i32) {
    %c0_i32 = arith.constant 0 : i32
    %c0_i32_0 = arith.constant 0 : i32
    return %c0_i32, %arg1 : i32, i32
  }
  func.func @transform_3(%arg0: i32, %arg1: i32, %arg2: i32) -> (i32, i32) {
    %c0_i32 = arith.constant 0 : i32
    return %arg0, %arg1 : i32, i32
  }
}

module attributes {stable_mosaic.version = 11 : i64} {
  func.func @_conv3x3_in_relu_kernel(%arg0: i32, %arg1: memref<1x42x56xbf16, #tpu.memory_space<vmem>>, %arg2: memref<1x42x160xbf16, #tpu.memory_space<vmem>>, %arg3: memref<9x56x128xbf16, #tpu.memory_space<vmem>>, %arg4: memref<9x160x128xbf16, #tpu.memory_space<vmem>>, %arg5: memref<1x42x128xbf16, #tpu.memory_space<vmem>>) attributes {dimension_semantics = [#tpu.dimension_semantics<parallel>], iteration_bounds = array<i64: 2>, scalar_prefetch = 0 : i64, scratch_operands = 0 : i64, tpu.core_type = #tpu.core_type<tc>, window_params = [{transform_indices = @transform_0, window_bounds = array<i64: 1, 42, 56>}, {transform_indices = @transform_1, window_bounds = array<i64: 1, 42, 160>}, {pipeline_mode = #tpu.pipeline_mode<synchronous>, transform_indices = @transform_2, window_bounds = array<i64: 9, 56, 128>}, {pipeline_mode = #tpu.pipeline_mode<synchronous>, transform_indices = @transform_3, window_bounds = array<i64: 9, 160, 128>}, {transform_indices = @transform_4, window_bounds = array<i64: 1, 42, 128>}]} {
    %cst = arith.constant 0.000000e+00 : f32
    %0 = vector.broadcast %cst : f32 to vector<24x128xf32>
    %c0 = arith.constant 0 : index
    %c0_0 = arith.constant 0 : index
    %c0_1 = arith.constant 0 : index
    %1 = vector.load %arg1[%c0, %c0_0, %c0_1] : memref<1x42x56xbf16, #tpu.memory_space<vmem>>, vector<1x24x56xbf16>
    %2 = vector.shape_cast %1 : vector<1x24x56xbf16> to vector<24x56xbf16>
    %c0_2 = arith.constant 0 : index
    %c0_3 = arith.constant 0 : index
    %c0_4 = arith.constant 0 : index
    %3 = vector.load %arg3[%c0_2, %c0_3, %c0_4] : memref<9x56x128xbf16, #tpu.memory_space<vmem>>, vector<1x56x128xbf16>
    %4 = vector.shape_cast %3 : vector<1x56x128xbf16> to vector<56x128xbf16>
    %cst_5 = arith.constant dense<0.000000e+00> : vector<24x128xf32>
    %5 = tpu.matmul %2, %4, %cst_5 {dimension_numbers = #tpu.dot_dimension_numbers<[1], [0], [0], [1], [0, 0, 1, 1], [], []>} : vector<24x56xbf16>, vector<56x128xbf16>, vector<24x128xf32> -> vector<24x128xf32>
    %6 = arith.addf %0, %5 : vector<24x128xf32>
    %c0_6 = arith.constant 0 : index
    %c0_7 = arith.constant 0 : index
    %c0_8 = arith.constant 0 : index
    %7 = vector.load %arg2[%c0_6, %c0_7, %c0_8] : memref<1x42x160xbf16, #tpu.memory_space<vmem>>, vector<1x24x160xbf16>
    %8 = vector.shape_cast %7 : vector<1x24x160xbf16> to vector<24x160xbf16>
    %c0_9 = arith.constant 0 : index
    %c0_10 = arith.constant 0 : index
    %c0_11 = arith.constant 0 : index
    %9 = vector.load %arg4[%c0_9, %c0_10, %c0_11] : memref<9x160x128xbf16, #tpu.memory_space<vmem>>, vector<1x160x128xbf16>
    %10 = vector.shape_cast %9 : vector<1x160x128xbf16> to vector<160x128xbf16>
    %cst_12 = arith.constant dense<0.000000e+00> : vector<24x128xf32>
    %11 = tpu.matmul %8, %10, %cst_12 {dimension_numbers = #tpu.dot_dimension_numbers<[1], [0], [0], [1], [0, 0, 1, 1], [], []>} : vector<24x160xbf16>, vector<160x128xbf16>, vector<24x128xf32> -> vector<24x128xf32>
    %12 = arith.addf %6, %11 : vector<24x128xf32>
    %c0_13 = arith.constant 0 : index
    %c1 = arith.constant 1 : index
    %c0_14 = arith.constant 0 : index
    %13 = vector.load %arg1[%c0_13, %c1, %c0_14] : memref<1x42x56xbf16, #tpu.memory_space<vmem>>, vector<1x24x56xbf16>
    %14 = vector.shape_cast %13 : vector<1x24x56xbf16> to vector<24x56xbf16>
    %c1_15 = arith.constant 1 : index
    %c0_16 = arith.constant 0 : index
    %c0_17 = arith.constant 0 : index
    %15 = vector.load %arg3[%c1_15, %c0_16, %c0_17] : memref<9x56x128xbf16, #tpu.memory_space<vmem>>, vector<1x56x128xbf16>
    %16 = vector.shape_cast %15 : vector<1x56x128xbf16> to vector<56x128xbf16>
    %cst_18 = arith.constant dense<0.000000e+00> : vector<24x128xf32>
    %17 = tpu.matmul %14, %16, %cst_18 {dimension_numbers = #tpu.dot_dimension_numbers<[1], [0], [0], [1], [0, 0, 1, 1], [], []>} : vector<24x56xbf16>, vector<56x128xbf16>, vector<24x128xf32> -> vector<24x128xf32>
    %18 = arith.addf %12, %17 : vector<24x128xf32>
    %c0_19 = arith.constant 0 : index
    %c1_20 = arith.constant 1 : index
    %c0_21 = arith.constant 0 : index
    %19 = vector.load %arg2[%c0_19, %c1_20, %c0_21] : memref<1x42x160xbf16, #tpu.memory_space<vmem>>, vector<1x24x160xbf16>
    %20 = vector.shape_cast %19 : vector<1x24x160xbf16> to vector<24x160xbf16>
    %c1_22 = arith.constant 1 : index
    %c0_23 = arith.constant 0 : index
    %c0_24 = arith.constant 0 : index
    %21 = vector.load %arg4[%c1_22, %c0_23, %c0_24] : memref<9x160x128xbf16, #tpu.memory_space<vmem>>, vector<1x160x128xbf16>
    %22 = vector.shape_cast %21 : vector<1x160x128xbf16> to vector<160x128xbf16>
    %cst_25 = arith.constant dense<0.000000e+00> : vector<24x128xf32>
    %23 = tpu.matmul %20, %22, %cst_25 {dimension_numbers = #tpu.dot_dimension_numbers<[1], [0], [0], [1], [0, 0, 1, 1], [], []>} : vector<24x160xbf16>, vector<160x128xbf16>, vector<24x128xf32> -> vector<24x128xf32>
    %24 = arith.addf %18, %23 : vector<24x128xf32>
    %c0_26 = arith.constant 0 : index
    %c2 = arith.constant 2 : index
    %c0_27 = arith.constant 0 : index
    %25 = vector.load %arg1[%c0_26, %c2, %c0_27] : memref<1x42x56xbf16, #tpu.memory_space<vmem>>, vector<1x24x56xbf16>
    %26 = vector.shape_cast %25 : vector<1x24x56xbf16> to vector<24x56xbf16>
    %c2_28 = arith.constant 2 : index
    %c0_29 = arith.constant 0 : index
    %c0_30 = arith.constant 0 : index
    %27 = vector.load %arg3[%c2_28, %c0_29, %c0_30] : memref<9x56x128xbf16, #tpu.memory_space<vmem>>, vector<1x56x128xbf16>
    %28 = vector.shape_cast %27 : vector<1x56x128xbf16> to vector<56x128xbf16>
    %cst_31 = arith.constant dense<0.000000e+00> : vector<24x128xf32>
    %29 = tpu.matmul %26, %28, %cst_31 {dimension_numbers = #tpu.dot_dimension_numbers<[1], [0], [0], [1], [0, 0, 1, 1], [], []>} : vector<24x56xbf16>, vector<56x128xbf16>, vector<24x128xf32> -> vector<24x128xf32>
    %30 = arith.addf %24, %29 : vector<24x128xf32>
    %c0_32 = arith.constant 0 : index
    %c2_33 = arith.constant 2 : index
    %c0_34 = arith.constant 0 : index
    %31 = vector.load %arg2[%c0_32, %c2_33, %c0_34] : memref<1x42x160xbf16, #tpu.memory_space<vmem>>, vector<1x24x160xbf16>
    %32 = vector.shape_cast %31 : vector<1x24x160xbf16> to vector<24x160xbf16>
    %c2_35 = arith.constant 2 : index
    %c0_36 = arith.constant 0 : index
    %c0_37 = arith.constant 0 : index
    %33 = vector.load %arg4[%c2_35, %c0_36, %c0_37] : memref<9x160x128xbf16, #tpu.memory_space<vmem>>, vector<1x160x128xbf16>
    %34 = vector.shape_cast %33 : vector<1x160x128xbf16> to vector<160x128xbf16>
    %cst_38 = arith.constant dense<0.000000e+00> : vector<24x128xf32>
    %35 = tpu.matmul %32, %34, %cst_38 {dimension_numbers = #tpu.dot_dimension_numbers<[1], [0], [0], [1], [0, 0, 1, 1], [], []>} : vector<24x160xbf16>, vector<160x128xbf16>, vector<24x128xf32> -> vector<24x128xf32>
    %36 = arith.addf %30, %35 : vector<24x128xf32>
    %c0_39 = arith.constant 0 : index
    %c6 = arith.constant 6 : index
    %c0_40 = arith.constant 0 : index
    %37 = vector.load %arg1[%c0_39, %c6, %c0_40] : memref<1x42x56xbf16, #tpu.memory_space<vmem>>, vector<1x24x56xbf16>
    %38 = vector.shape_cast %37 : vector<1x24x56xbf16> to vector<24x56xbf16>
    %c3 = arith.constant 3 : index
    %c0_41 = arith.constant 0 : index
    %c0_42 = arith.constant 0 : index
    %39 = vector.load %arg3[%c3, %c0_41, %c0_42] : memref<9x56x128xbf16, #tpu.memory_space<vmem>>, vector<1x56x128xbf16>
    %40 = vector.shape_cast %39 : vector<1x56x128xbf16> to vector<56x128xbf16>
    %cst_43 = arith.constant dense<0.000000e+00> : vector<24x128xf32>
    %41 = tpu.matmul %38, %40, %cst_43 {dimension_numbers = #tpu.dot_dimension_numbers<[1], [0], [0], [1], [0, 0, 1, 1], [], []>} : vector<24x56xbf16>, vector<56x128xbf16>, vector<24x128xf32> -> vector<24x128xf32>
    %42 = arith.addf %36, %41 : vector<24x128xf32>
    %c0_44 = arith.constant 0 : index
    %c6_45 = arith.constant 6 : index
    %c0_46 = arith.constant 0 : index
    %43 = vector.load %arg2[%c0_44, %c6_45, %c0_46] : memref<1x42x160xbf16, #tpu.memory_space<vmem>>, vector<1x24x160xbf16>
    %44 = vector.shape_cast %43 : vector<1x24x160xbf16> to vector<24x160xbf16>
    %c3_47 = arith.constant 3 : index
    %c0_48 = arith.constant 0 : index
    %c0_49 = arith.constant 0 : index
    %45 = vector.load %arg4[%c3_47, %c0_48, %c0_49] : memref<9x160x128xbf16, #tpu.memory_space<vmem>>, vector<1x160x128xbf16>
    %46 = vector.shape_cast %45 : vector<1x160x128xbf16> to vector<160x128xbf16>
    %cst_50 = arith.constant dense<0.000000e+00> : vector<24x128xf32>
    %47 = tpu.matmul %44, %46, %cst_50 {dimension_numbers = #tpu.dot_dimension_numbers<[1], [0], [0], [1], [0, 0, 1, 1], [], []>} : vector<24x160xbf16>, vector<160x128xbf16>, vector<24x128xf32> -> vector<24x128xf32>
    %48 = arith.addf %42, %47 : vector<24x128xf32>
    %c0_51 = arith.constant 0 : index
    %c7 = arith.constant 7 : index
    %c0_52 = arith.constant 0 : index
    %49 = vector.load %arg1[%c0_51, %c7, %c0_52] : memref<1x42x56xbf16, #tpu.memory_space<vmem>>, vector<1x24x56xbf16>
    %50 = vector.shape_cast %49 : vector<1x24x56xbf16> to vector<24x56xbf16>
    %c4 = arith.constant 4 : index
    %c0_53 = arith.constant 0 : index
    %c0_54 = arith.constant 0 : index
    %51 = vector.load %arg3[%c4, %c0_53, %c0_54] : memref<9x56x128xbf16, #tpu.memory_space<vmem>>, vector<1x56x128xbf16>
    %52 = vector.shape_cast %51 : vector<1x56x128xbf16> to vector<56x128xbf16>
    %cst_55 = arith.constant dense<0.000000e+00> : vector<24x128xf32>
    %53 = tpu.matmul %50, %52, %cst_55 {dimension_numbers = #tpu.dot_dimension_numbers<[1], [0], [0], [1], [0, 0, 1, 1], [], []>} : vector<24x56xbf16>, vector<56x128xbf16>, vector<24x128xf32> -> vector<24x128xf32>
    %54 = arith.addf %48, %53 : vector<24x128xf32>
    %c0_56 = arith.constant 0 : index
    %c7_57 = arith.constant 7 : index
    %c0_58 = arith.constant 0 : index
    %55 = vector.load %arg2[%c0_56, %c7_57, %c0_58] : memref<1x42x160xbf16, #tpu.memory_space<vmem>>, vector<1x24x160xbf16>
    %56 = vector.shape_cast %55 : vector<1x24x160xbf16> to vector<24x160xbf16>
    %c4_59 = arith.constant 4 : index
    %c0_60 = arith.constant 0 : index
    %c0_61 = arith.constant 0 : index
    %57 = vector.load %arg4[%c4_59, %c0_60, %c0_61] : memref<9x160x128xbf16, #tpu.memory_space<vmem>>, vector<1x160x128xbf16>
    %58 = vector.shape_cast %57 : vector<1x160x128xbf16> to vector<160x128xbf16>
    %cst_62 = arith.constant dense<0.000000e+00> : vector<24x128xf32>
    %59 = tpu.matmul %56, %58, %cst_62 {dimension_numbers = #tpu.dot_dimension_numbers<[1], [0], [0], [1], [0, 0, 1, 1], [], []>} : vector<24x160xbf16>, vector<160x128xbf16>, vector<24x128xf32> -> vector<24x128xf32>
    %60 = arith.addf %54, %59 : vector<24x128xf32>
    %c0_63 = arith.constant 0 : index
    %c8 = arith.constant 8 : index
    %c0_64 = arith.constant 0 : index
    %61 = vector.load %arg1[%c0_63, %c8, %c0_64] : memref<1x42x56xbf16, #tpu.memory_space<vmem>>, vector<1x24x56xbf16>
    %62 = vector.shape_cast %61 : vector<1x24x56xbf16> to vector<24x56xbf16>
    %c5 = arith.constant 5 : index
    %c0_65 = arith.constant 0 : index
    %c0_66 = arith.constant 0 : index
    %63 = vector.load %arg3[%c5, %c0_65, %c0_66] : memref<9x56x128xbf16, #tpu.memory_space<vmem>>, vector<1x56x128xbf16>
    %64 = vector.shape_cast %63 : vector<1x56x128xbf16> to vector<56x128xbf16>
    %cst_67 = arith.constant dense<0.000000e+00> : vector<24x128xf32>
    %65 = tpu.matmul %62, %64, %cst_67 {dimension_numbers = #tpu.dot_dimension_numbers<[1], [0], [0], [1], [0, 0, 1, 1], [], []>} : vector<24x56xbf16>, vector<56x128xbf16>, vector<24x128xf32> -> vector<24x128xf32>
    %66 = arith.addf %60, %65 : vector<24x128xf32>
    %c0_68 = arith.constant 0 : index
    %c8_69 = arith.constant 8 : index
    %c0_70 = arith.constant 0 : index
    %67 = vector.load %arg2[%c0_68, %c8_69, %c0_70] : memref<1x42x160xbf16, #tpu.memory_space<vmem>>, vector<1x24x160xbf16>
    %68 = vector.shape_cast %67 : vector<1x24x160xbf16> to vector<24x160xbf16>
    %c5_71 = arith.constant 5 : index
    %c0_72 = arith.constant 0 : index
    %c0_73 = arith.constant 0 : index
    %69 = vector.load %arg4[%c5_71, %c0_72, %c0_73] : memref<9x160x128xbf16, #tpu.memory_space<vmem>>, vector<1x160x128xbf16>
    %70 = vector.shape_cast %69 : vector<1x160x128xbf16> to vector<160x128xbf16>
    %cst_74 = arith.constant dense<0.000000e+00> : vector<24x128xf32>
    %71 = tpu.matmul %68, %70, %cst_74 {dimension_numbers = #tpu.dot_dimension_numbers<[1], [0], [0], [1], [0, 0, 1, 1], [], []>} : vector<24x160xbf16>, vector<160x128xbf16>, vector<24x128xf32> -> vector<24x128xf32>
    %72 = arith.addf %66, %71 : vector<24x128xf32>
    %c0_75 = arith.constant 0 : index
    %c12 = arith.constant 12 : index
    %c0_76 = arith.constant 0 : index
    %73 = vector.load %arg1[%c0_75, %c12, %c0_76] : memref<1x42x56xbf16, #tpu.memory_space<vmem>>, vector<1x24x56xbf16>
    %74 = vector.shape_cast %73 : vector<1x24x56xbf16> to vector<24x56xbf16>
    %c6_77 = arith.constant 6 : index
    %c0_78 = arith.constant 0 : index
    %c0_79 = arith.constant 0 : index
    %75 = vector.load %arg3[%c6_77, %c0_78, %c0_79] : memref<9x56x128xbf16, #tpu.memory_space<vmem>>, vector<1x56x128xbf16>
    %76 = vector.shape_cast %75 : vector<1x56x128xbf16> to vector<56x128xbf16>
    %cst_80 = arith.constant dense<0.000000e+00> : vector<24x128xf32>
    %77 = tpu.matmul %74, %76, %cst_80 {dimension_numbers = #tpu.dot_dimension_numbers<[1], [0], [0], [1], [0, 0, 1, 1], [], []>} : vector<24x56xbf16>, vector<56x128xbf16>, vector<24x128xf32> -> vector<24x128xf32>
    %78 = arith.addf %72, %77 : vector<24x128xf32>
    %c0_81 = arith.constant 0 : index
    %c12_82 = arith.constant 12 : index
    %c0_83 = arith.constant 0 : index
    %79 = vector.load %arg2[%c0_81, %c12_82, %c0_83] : memref<1x42x160xbf16, #tpu.memory_space<vmem>>, vector<1x24x160xbf16>
    %80 = vector.shape_cast %79 : vector<1x24x160xbf16> to vector<24x160xbf16>
    %c6_84 = arith.constant 6 : index
    %c0_85 = arith.constant 0 : index
    %c0_86 = arith.constant 0 : index
    %81 = vector.load %arg4[%c6_84, %c0_85, %c0_86] : memref<9x160x128xbf16, #tpu.memory_space<vmem>>, vector<1x160x128xbf16>
    %82 = vector.shape_cast %81 : vector<1x160x128xbf16> to vector<160x128xbf16>
    %cst_87 = arith.constant dense<0.000000e+00> : vector<24x128xf32>
    %83 = tpu.matmul %80, %82, %cst_87 {dimension_numbers = #tpu.dot_dimension_numbers<[1], [0], [0], [1], [0, 0, 1, 1], [], []>} : vector<24x160xbf16>, vector<160x128xbf16>, vector<24x128xf32> -> vector<24x128xf32>
    %84 = arith.addf %78, %83 : vector<24x128xf32>
    %c0_88 = arith.constant 0 : index
    %c13 = arith.constant 13 : index
    %c0_89 = arith.constant 0 : index
    %85 = vector.load %arg1[%c0_88, %c13, %c0_89] : memref<1x42x56xbf16, #tpu.memory_space<vmem>>, vector<1x24x56xbf16>
    %86 = vector.shape_cast %85 : vector<1x24x56xbf16> to vector<24x56xbf16>
    %c7_90 = arith.constant 7 : index
    %c0_91 = arith.constant 0 : index
    %c0_92 = arith.constant 0 : index
    %87 = vector.load %arg3[%c7_90, %c0_91, %c0_92] : memref<9x56x128xbf16, #tpu.memory_space<vmem>>, vector<1x56x128xbf16>
    %88 = vector.shape_cast %87 : vector<1x56x128xbf16> to vector<56x128xbf16>
    %cst_93 = arith.constant dense<0.000000e+00> : vector<24x128xf32>
    %89 = tpu.matmul %86, %88, %cst_93 {dimension_numbers = #tpu.dot_dimension_numbers<[1], [0], [0], [1], [0, 0, 1, 1], [], []>} : vector<24x56xbf16>, vector<56x128xbf16>, vector<24x128xf32> -> vector<24x128xf32>
    %90 = arith.addf %84, %89 : vector<24x128xf32>
    %c0_94 = arith.constant 0 : index
    %c13_95 = arith.constant 13 : index
    %c0_96 = arith.constant 0 : index
    %91 = vector.load %arg2[%c0_94, %c13_95, %c0_96] : memref<1x42x160xbf16, #tpu.memory_space<vmem>>, vector<1x24x160xbf16>
    %92 = vector.shape_cast %91 : vector<1x24x160xbf16> to vector<24x160xbf16>
    %c7_97 = arith.constant 7 : index
    %c0_98 = arith.constant 0 : index
    %c0_99 = arith.constant 0 : index
    %93 = vector.load %arg4[%c7_97, %c0_98, %c0_99] : memref<9x160x128xbf16, #tpu.memory_space<vmem>>, vector<1x160x128xbf16>
    %94 = vector.shape_cast %93 : vector<1x160x128xbf16> to vector<160x128xbf16>
    %cst_100 = arith.constant dense<0.000000e+00> : vector<24x128xf32>
    %95 = tpu.matmul %92, %94, %cst_100 {dimension_numbers = #tpu.dot_dimension_numbers<[1], [0], [0], [1], [0, 0, 1, 1], [], []>} : vector<24x160xbf16>, vector<160x128xbf16>, vector<24x128xf32> -> vector<24x128xf32>
    %96 = arith.addf %90, %95 : vector<24x128xf32>
    %c0_101 = arith.constant 0 : index
    %c14 = arith.constant 14 : index
    %c0_102 = arith.constant 0 : index
    %97 = vector.load %arg1[%c0_101, %c14, %c0_102] : memref<1x42x56xbf16, #tpu.memory_space<vmem>>, vector<1x24x56xbf16>
    %98 = vector.shape_cast %97 : vector<1x24x56xbf16> to vector<24x56xbf16>
    %c8_103 = arith.constant 8 : index
    %c0_104 = arith.constant 0 : index
    %c0_105 = arith.constant 0 : index
    %99 = vector.load %arg3[%c8_103, %c0_104, %c0_105] : memref<9x56x128xbf16, #tpu.memory_space<vmem>>, vector<1x56x128xbf16>
    %100 = vector.shape_cast %99 : vector<1x56x128xbf16> to vector<56x128xbf16>
    %cst_106 = arith.constant dense<0.000000e+00> : vector<24x128xf32>
    %101 = tpu.matmul %98, %100, %cst_106 {dimension_numbers = #tpu.dot_dimension_numbers<[1], [0], [0], [1], [0, 0, 1, 1], [], []>} : vector<24x56xbf16>, vector<56x128xbf16>, vector<24x128xf32> -> vector<24x128xf32>
    %102 = arith.addf %96, %101 : vector<24x128xf32>
    %c0_107 = arith.constant 0 : index
    %c14_108 = arith.constant 14 : index
    %c0_109 = arith.constant 0 : index
    %103 = vector.load %arg2[%c0_107, %c14_108, %c0_109] : memref<1x42x160xbf16, #tpu.memory_space<vmem>>, vector<1x24x160xbf16>
    %104 = vector.shape_cast %103 : vector<1x24x160xbf16> to vector<24x160xbf16>
    %c8_110 = arith.constant 8 : index
    %c0_111 = arith.constant 0 : index
    %c0_112 = arith.constant 0 : index
    %105 = vector.load %arg4[%c8_110, %c0_111, %c0_112] : memref<9x160x128xbf16, #tpu.memory_space<vmem>>, vector<1x160x128xbf16>
    %106 = vector.shape_cast %105 : vector<1x160x128xbf16> to vector<160x128xbf16>
    %cst_113 = arith.constant dense<0.000000e+00> : vector<24x128xf32>
    %107 = tpu.matmul %104, %106, %cst_113 {dimension_numbers = #tpu.dot_dimension_numbers<[1], [0], [0], [1], [0, 0, 1, 1], [], []>} : vector<24x160xbf16>, vector<160x128xbf16>, vector<24x128xf32> -> vector<24x128xf32>
    %108 = arith.addf %102, %107 : vector<24x128xf32>
    %109 = tpu.iota {dimensions = array<i32: 0>} : vector<24x1xi32>
    %c6_i32 = arith.constant 6 : i32
    %c0_i32 = arith.constant 0 : i32
    %110 = arith.cmpi eq, %c6_i32, %c0_i32 : i32
    %c1_i32 = arith.constant 1 : i32
    %111 = arith.select %110, %c1_i32, %c6_i32 : i32
    %112 = vector.broadcast %111 : i32 to vector<24x1xi32>
    %113 = arith.remsi %109, %112 : vector<24x1xi32>
    %c0_i32_114 = arith.constant 0 : i32
    %114 = vector.broadcast %c0_i32_114 : i32 to vector<24x1xi32>
    %115 = arith.cmpi ne, %113, %114 : vector<24x1xi32>
    %c0_i32_115 = arith.constant 0 : i32
    %116 = vector.broadcast %c0_i32_115 : i32 to vector<24x1xi32>
    %117 = arith.cmpi slt, %113, %116 : vector<24x1xi32>
    %c0_i32_116 = arith.constant 0 : i32
    %118 = arith.cmpi slt, %111, %c0_i32_116 : i32
    %119 = vector.broadcast %118 : i1 to vector<24x1xi1>
    %120 = vector.broadcast %119 : vector<24x1xi1> to vector<24x1xi1>
    %121 = arith.xori %117, %120 : vector<24x1xi1>
    %122 = arith.andi %121, %115 : vector<24x1xi1>
    %123 = vector.broadcast %111 : i32 to vector<24x1xi32>
    %124 = arith.addi %113, %123 : vector<24x1xi32>
    %125 = arith.select %122, %124, %113 : vector<24x1xi1>, vector<24x1xi32>
    %c4_i32 = arith.constant 4 : i32
    %126 = vector.broadcast %c4_i32 : i32 to vector<24x1xi32>
    %127 = arith.cmpi slt, %125, %126 : vector<24x1xi32>
    %cst_117 = arith.constant 0.000000e+00 : f32
    %128 = vector.shape_cast %127 : vector<24x1xi1> to vector<24x1xi1>
    %129 = vector.broadcast %128 : vector<24x1xi1> to vector<24x128xi1>
    %130 = vector.broadcast %cst_117 : f32 to vector<24x128xf32>
    %131 = arith.select %129, %108, %130 : vector<24x128xi1>, vector<24x128xf32>
    %cst_118 = arith.constant dense<0.000000e+00> : vector<128xf32>
    %132 = vector.multi_reduction <add>, %131, %cst_118 [0] : vector<24x128xf32> to vector<128xf32>
    %133 = vector.shape_cast %132 : vector<128xf32> to vector<1x128xf32>
    %cst_119 = arith.constant 6.250000e-02 : f32
    %134 = vector.broadcast %cst_119 : f32 to vector<1x128xf32>
    %135 = arith.mulf %133, %134 : vector<1x128xf32>
    %136 = vector.broadcast %135 : vector<1x128xf32> to vector<24x128xf32>
    %137 = arith.subf %108, %136 : vector<24x128xf32>
    %138 = arith.mulf %137, %137 : vector<24x128xf32>
    %cst_120 = arith.constant 0.000000e+00 : f32
    %139 = vector.shape_cast %127 : vector<24x1xi1> to vector<24x1xi1>
    %140 = vector.broadcast %139 : vector<24x1xi1> to vector<24x128xi1>
    %141 = vector.broadcast %cst_120 : f32 to vector<24x128xf32>
    %142 = arith.select %140, %138, %141 : vector<24x128xi1>, vector<24x128xf32>
    %cst_121 = arith.constant dense<0.000000e+00> : vector<128xf32>
    %143 = vector.multi_reduction <add>, %142, %cst_121 [0] : vector<24x128xf32> to vector<128xf32>
    %144 = vector.shape_cast %143 : vector<128xf32> to vector<1x128xf32>
    %cst_122 = arith.constant 6.250000e-02 : f32
    %145 = vector.broadcast %cst_122 : f32 to vector<1x128xf32>
    %146 = arith.mulf %144, %145 : vector<1x128xf32>
    %cst_123 = arith.constant 9.99999974E-6 : f32
    %147 = vector.broadcast %cst_123 : f32 to vector<1x128xf32>
    %148 = arith.addf %146, %147 : vector<1x128xf32>
    %149 = math.rsqrt %148 : vector<1x128xf32>
    %150 = vector.broadcast %149 : vector<1x128xf32> to vector<24x128xf32>
    %151 = arith.mulf %137, %150 : vector<24x128xf32>
    %cst_124 = arith.constant 0.000000e+00 : f32
    %152 = vector.broadcast %cst_124 : f32 to vector<24x128xf32>
    %153 = arith.maximumf %151, %152 : vector<24x128xf32>
    %cst_125 = arith.constant 0.000000e+00 : f32
    %154 = vector.shape_cast %127 : vector<24x1xi1> to vector<24x1xi1>
    %155 = vector.broadcast %154 : vector<24x1xi1> to vector<24x128xi1>
    %156 = vector.broadcast %cst_125 : f32 to vector<24x128xf32>
    %157 = arith.select %155, %153, %156 : vector<24x128xi1>, vector<24x128xf32>
    %158 = arith.truncf %157 : vector<24x128xf32> to vector<24x128xbf16>
    %c0_126 = arith.constant 0 : index
    %c7_127 = arith.constant 7 : index
    %c0_128 = arith.constant 0 : index
    %159 = vector.load %arg5[%c0_126, %c7_127, %c0_128] : memref<1x42x128xbf16, #tpu.memory_space<vmem>>, vector<1x24x128xbf16>
    %160 = vector.shape_cast %159 : vector<1x24x128xbf16> to vector<24x128xbf16>
    %161 = vector.shape_cast %158 : vector<24x128xbf16> to vector<1x24x128xbf16>
    tpu.vector_store %arg5[%c0_126, %c7_127, %c0_128], %161 {strides = array<i32>} : memref<1x42x128xbf16, #tpu.memory_space<vmem>>, vector<1x24x128xbf16>,
    %cst_129 = arith.constant 0.000000e+00 : bf16
    %162 = vector.broadcast %cst_129 : bf16 to vector<7x128xbf16>
    %c0_130 = arith.constant 0 : index
    %c0_131 = arith.constant 0 : index
    %c0_132 = arith.constant 0 : index
    %163 = vector.load %arg5[%c0_130, %c0_131, %c0_132] : memref<1x42x128xbf16, #tpu.memory_space<vmem>>, vector<1x7x128xbf16>
    %164 = vector.shape_cast %163 : vector<1x7x128xbf16> to vector<7x128xbf16>
    %165 = vector.shape_cast %162 : vector<7x128xbf16> to vector<1x7x128xbf16>
    tpu.vector_store %arg5[%c0_130, %c0_131, %c0_132], %165 {strides = array<i32>} : memref<1x42x128xbf16, #tpu.memory_space<vmem>>, vector<1x7x128xbf16>,
    %cst_133 = arith.constant 0.000000e+00 : bf16
    %166 = vector.broadcast %cst_133 : bf16 to vector<11x128xbf16>
    %c0_134 = arith.constant 0 : index
    %c31 = arith.constant 31 : index
    %c0_135 = arith.constant 0 : index
    %167 = vector.load %arg5[%c0_134, %c31, %c0_135] : memref<1x42x128xbf16, #tpu.memory_space<vmem>>, vector<1x11x128xbf16>
    %168 = vector.shape_cast %167 : vector<1x11x128xbf16> to vector<11x128xbf16>
    %169 = vector.shape_cast %166 : vector<11x128xbf16> to vector<1x11x128xbf16>
    tpu.vector_store %arg5[%c0_134, %c31, %c0_135], %169 {strides = array<i32>} : memref<1x42x128xbf16, #tpu.memory_space<vmem>>, vector<1x11x128xbf16>,
    return
  }
  func.func @transform_0(%arg0: i32) -> (i32, i32, i32) {
    %c0_i32 = arith.constant 0 : i32
    %c0_i32_0 = arith.constant 0 : i32
    %c0_i32_1 = arith.constant 0 : i32
    return %arg0, %c0_i32, %c0_i32_0 : i32, i32, i32
  }
  func.func @transform_1(%arg0: i32) -> (i32, i32, i32) {
    %c0_i32 = arith.constant 0 : i32
    %c0_i32_0 = arith.constant 0 : i32
    %c0_i32_1 = arith.constant 0 : i32
    return %arg0, %c0_i32, %c0_i32_0 : i32, i32, i32
  }
  func.func @transform_2(%arg0: i32) -> (i32, i32, i32) {
    %c0_i32 = arith.constant 0 : i32
    %c0_i32_0 = arith.constant 0 : i32
    %c0_i32_1 = arith.constant 0 : i32
    %c0_i32_2 = arith.constant 0 : i32
    return %c0_i32, %c0_i32_0, %c0_i32_1 : i32, i32, i32
  }
  func.func @transform_3(%arg0: i32) -> (i32, i32, i32) {
    %c0_i32 = arith.constant 0 : i32
    %c0_i32_0 = arith.constant 0 : i32
    %c0_i32_1 = arith.constant 0 : i32
    %c0_i32_2 = arith.constant 0 : i32
    return %c0_i32, %c0_i32_0, %c0_i32_1 : i32, i32, i32
  }
  func.func @transform_4(%arg0: i32) -> (i32, i32, i32) {
    %c0_i32 = arith.constant 0 : i32
    %c0_i32_0 = arith.constant 0 : i32
    %c0_i32_1 = arith.constant 0 : i32
    return %arg0, %c0_i32, %c0_i32_0 : i32, i32, i32
  }
}

module attributes {stable_mosaic.version = 11 : i64} {
  func.func @_conv3x3_in_relu_kernel(%arg0: i32, %arg1: memref<1x42x128xbf16, #tpu.memory_space<vmem>>, %arg2: memref<9x128x128xbf16, #tpu.memory_space<vmem>>, %arg3: memref<1x42x128xbf16, #tpu.memory_space<vmem>>) attributes {dimension_semantics = [#tpu.dimension_semantics<parallel>], iteration_bounds = array<i64: 2>, scalar_prefetch = 0 : i64, scratch_operands = 0 : i64, tpu.core_type = #tpu.core_type<tc>, window_params = [{transform_indices = @transform_0, window_bounds = array<i64: 1, 42, 128>}, {pipeline_mode = #tpu.pipeline_mode<synchronous>, transform_indices = @transform_1, window_bounds = array<i64: 9, 128, 128>}, {transform_indices = @transform_2, window_bounds = array<i64: 1, 42, 128>}]} {
    %cst = arith.constant 0.000000e+00 : f32
    %0 = vector.broadcast %cst : f32 to vector<24x128xf32>
    %c0 = arith.constant 0 : index
    %c0_0 = arith.constant 0 : index
    %c0_1 = arith.constant 0 : index
    %1 = vector.load %arg1[%c0, %c0_0, %c0_1] : memref<1x42x128xbf16, #tpu.memory_space<vmem>>, vector<1x24x128xbf16>
    %2 = vector.shape_cast %1 : vector<1x24x128xbf16> to vector<24x128xbf16>
    %c0_2 = arith.constant 0 : index
    %c0_3 = arith.constant 0 : index
    %c0_4 = arith.constant 0 : index
    %3 = vector.load %arg2[%c0_2, %c0_3, %c0_4] : memref<9x128x128xbf16, #tpu.memory_space<vmem>>, vector<1x128x128xbf16>
    %4 = vector.shape_cast %3 : vector<1x128x128xbf16> to vector<128x128xbf16>
    %cst_5 = arith.constant dense<0.000000e+00> : vector<24x128xf32>
    %5 = tpu.matmul %2, %4, %cst_5 {dimension_numbers = #tpu.dot_dimension_numbers<[1], [0], [0], [1], [0, 0, 1, 1], [], []>} : vector<24x128xbf16>, vector<128x128xbf16>, vector<24x128xf32> -> vector<24x128xf32>
    %6 = arith.addf %0, %5 : vector<24x128xf32>
    %c0_6 = arith.constant 0 : index
    %c1 = arith.constant 1 : index
    %c0_7 = arith.constant 0 : index
    %7 = vector.load %arg1[%c0_6, %c1, %c0_7] : memref<1x42x128xbf16, #tpu.memory_space<vmem>>, vector<1x24x128xbf16>
    %8 = vector.shape_cast %7 : vector<1x24x128xbf16> to vector<24x128xbf16>
    %c1_8 = arith.constant 1 : index
    %c0_9 = arith.constant 0 : index
    %c0_10 = arith.constant 0 : index
    %9 = vector.load %arg2[%c1_8, %c0_9, %c0_10] : memref<9x128x128xbf16, #tpu.memory_space<vmem>>, vector<1x128x128xbf16>
    %10 = vector.shape_cast %9 : vector<1x128x128xbf16> to vector<128x128xbf16>
    %cst_11 = arith.constant dense<0.000000e+00> : vector<24x128xf32>
    %11 = tpu.matmul %8, %10, %cst_11 {dimension_numbers = #tpu.dot_dimension_numbers<[1], [0], [0], [1], [0, 0, 1, 1], [], []>} : vector<24x128xbf16>, vector<128x128xbf16>, vector<24x128xf32> -> vector<24x128xf32>
    %12 = arith.addf %6, %11 : vector<24x128xf32>
    %c0_12 = arith.constant 0 : index
    %c2 = arith.constant 2 : index
    %c0_13 = arith.constant 0 : index
    %13 = vector.load %arg1[%c0_12, %c2, %c0_13] : memref<1x42x128xbf16, #tpu.memory_space<vmem>>, vector<1x24x128xbf16>
    %14 = vector.shape_cast %13 : vector<1x24x128xbf16> to vector<24x128xbf16>
    %c2_14 = arith.constant 2 : index
    %c0_15 = arith.constant 0 : index
    %c0_16 = arith.constant 0 : index
    %15 = vector.load %arg2[%c2_14, %c0_15, %c0_16] : memref<9x128x128xbf16, #tpu.memory_space<vmem>>, vector<1x128x128xbf16>
    %16 = vector.shape_cast %15 : vector<1x128x128xbf16> to vector<128x128xbf16>
    %cst_17 = arith.constant dense<0.000000e+00> : vector<24x128xf32>
    %17 = tpu.matmul %14, %16, %cst_17 {dimension_numbers = #tpu.dot_dimension_numbers<[1], [0], [0], [1], [0, 0, 1, 1], [], []>} : vector<24x128xbf16>, vector<128x128xbf16>, vector<24x128xf32> -> vector<24x128xf32>
    %18 = arith.addf %12, %17 : vector<24x128xf32>
    %c0_18 = arith.constant 0 : index
    %c6 = arith.constant 6 : index
    %c0_19 = arith.constant 0 : index
    %19 = vector.load %arg1[%c0_18, %c6, %c0_19] : memref<1x42x128xbf16, #tpu.memory_space<vmem>>, vector<1x24x128xbf16>
    %20 = vector.shape_cast %19 : vector<1x24x128xbf16> to vector<24x128xbf16>
    %c3 = arith.constant 3 : index
    %c0_20 = arith.constant 0 : index
    %c0_21 = arith.constant 0 : index
    %21 = vector.load %arg2[%c3, %c0_20, %c0_21] : memref<9x128x128xbf16, #tpu.memory_space<vmem>>, vector<1x128x128xbf16>
    %22 = vector.shape_cast %21 : vector<1x128x128xbf16> to vector<128x128xbf16>
    %cst_22 = arith.constant dense<0.000000e+00> : vector<24x128xf32>
    %23 = tpu.matmul %20, %22, %cst_22 {dimension_numbers = #tpu.dot_dimension_numbers<[1], [0], [0], [1], [0, 0, 1, 1], [], []>} : vector<24x128xbf16>, vector<128x128xbf16>, vector<24x128xf32> -> vector<24x128xf32>
    %24 = arith.addf %18, %23 : vector<24x128xf32>
    %c0_23 = arith.constant 0 : index
    %c7 = arith.constant 7 : index
    %c0_24 = arith.constant 0 : index
    %25 = vector.load %arg1[%c0_23, %c7, %c0_24] : memref<1x42x128xbf16, #tpu.memory_space<vmem>>, vector<1x24x128xbf16>
    %26 = vector.shape_cast %25 : vector<1x24x128xbf16> to vector<24x128xbf16>
    %c4 = arith.constant 4 : index
    %c0_25 = arith.constant 0 : index
    %c0_26 = arith.constant 0 : index
    %27 = vector.load %arg2[%c4, %c0_25, %c0_26] : memref<9x128x128xbf16, #tpu.memory_space<vmem>>, vector<1x128x128xbf16>
    %28 = vector.shape_cast %27 : vector<1x128x128xbf16> to vector<128x128xbf16>
    %cst_27 = arith.constant dense<0.000000e+00> : vector<24x128xf32>
    %29 = tpu.matmul %26, %28, %cst_27 {dimension_numbers = #tpu.dot_dimension_numbers<[1], [0], [0], [1], [0, 0, 1, 1], [], []>} : vector<24x128xbf16>, vector<128x128xbf16>, vector<24x128xf32> -> vector<24x128xf32>
    %30 = arith.addf %24, %29 : vector<24x128xf32>
    %c0_28 = arith.constant 0 : index
    %c8 = arith.constant 8 : index
    %c0_29 = arith.constant 0 : index
    %31 = vector.load %arg1[%c0_28, %c8, %c0_29] : memref<1x42x128xbf16, #tpu.memory_space<vmem>>, vector<1x24x128xbf16>
    %32 = vector.shape_cast %31 : vector<1x24x128xbf16> to vector<24x128xbf16>
    %c5 = arith.constant 5 : index
    %c0_30 = arith.constant 0 : index
    %c0_31 = arith.constant 0 : index
    %33 = vector.load %arg2[%c5, %c0_30, %c0_31] : memref<9x128x128xbf16, #tpu.memory_space<vmem>>, vector<1x128x128xbf16>
    %34 = vector.shape_cast %33 : vector<1x128x128xbf16> to vector<128x128xbf16>
    %cst_32 = arith.constant dense<0.000000e+00> : vector<24x128xf32>
    %35 = tpu.matmul %32, %34, %cst_32 {dimension_numbers = #tpu.dot_dimension_numbers<[1], [0], [0], [1], [0, 0, 1, 1], [], []>} : vector<24x128xbf16>, vector<128x128xbf16>, vector<24x128xf32> -> vector<24x128xf32>
    %36 = arith.addf %30, %35 : vector<24x128xf32>
    %c0_33 = arith.constant 0 : index
    %c12 = arith.constant 12 : index
    %c0_34 = arith.constant 0 : index
    %37 = vector.load %arg1[%c0_33, %c12, %c0_34] : memref<1x42x128xbf16, #tpu.memory_space<vmem>>, vector<1x24x128xbf16>
    %38 = vector.shape_cast %37 : vector<1x24x128xbf16> to vector<24x128xbf16>
    %c6_35 = arith.constant 6 : index
    %c0_36 = arith.constant 0 : index
    %c0_37 = arith.constant 0 : index
    %39 = vector.load %arg2[%c6_35, %c0_36, %c0_37] : memref<9x128x128xbf16, #tpu.memory_space<vmem>>, vector<1x128x128xbf16>
    %40 = vector.shape_cast %39 : vector<1x128x128xbf16> to vector<128x128xbf16>
    %cst_38 = arith.constant dense<0.000000e+00> : vector<24x128xf32>
    %41 = tpu.matmul %38, %40, %cst_38 {dimension_numbers = #tpu.dot_dimension_numbers<[1], [0], [0], [1], [0, 0, 1, 1], [], []>} : vector<24x128xbf16>, vector<128x128xbf16>, vector<24x128xf32> -> vector<24x128xf32>
    %42 = arith.addf %36, %41 : vector<24x128xf32>
    %c0_39 = arith.constant 0 : index
    %c13 = arith.constant 13 : index
    %c0_40 = arith.constant 0 : index
    %43 = vector.load %arg1[%c0_39, %c13, %c0_40] : memref<1x42x128xbf16, #tpu.memory_space<vmem>>, vector<1x24x128xbf16>
    %44 = vector.shape_cast %43 : vector<1x24x128xbf16> to vector<24x128xbf16>
    %c7_41 = arith.constant 7 : index
    %c0_42 = arith.constant 0 : index
    %c0_43 = arith.constant 0 : index
    %45 = vector.load %arg2[%c7_41, %c0_42, %c0_43] : memref<9x128x128xbf16, #tpu.memory_space<vmem>>, vector<1x128x128xbf16>
    %46 = vector.shape_cast %45 : vector<1x128x128xbf16> to vector<128x128xbf16>
    %cst_44 = arith.constant dense<0.000000e+00> : vector<24x128xf32>
    %47 = tpu.matmul %44, %46, %cst_44 {dimension_numbers = #tpu.dot_dimension_numbers<[1], [0], [0], [1], [0, 0, 1, 1], [], []>} : vector<24x128xbf16>, vector<128x128xbf16>, vector<24x128xf32> -> vector<24x128xf32>
    %48 = arith.addf %42, %47 : vector<24x128xf32>
    %c0_45 = arith.constant 0 : index
    %c14 = arith.constant 14 : index
    %c0_46 = arith.constant 0 : index
    %49 = vector.load %arg1[%c0_45, %c14, %c0_46] : memref<1x42x128xbf16, #tpu.memory_space<vmem>>, vector<1x24x128xbf16>
    %50 = vector.shape_cast %49 : vector<1x24x128xbf16> to vector<24x128xbf16>
    %c8_47 = arith.constant 8 : index
    %c0_48 = arith.constant 0 : index
    %c0_49 = arith.constant 0 : index
    %51 = vector.load %arg2[%c8_47, %c0_48, %c0_49] : memref<9x128x128xbf16, #tpu.memory_space<vmem>>, vector<1x128x128xbf16>
    %52 = vector.shape_cast %51 : vector<1x128x128xbf16> to vector<128x128xbf16>
    %cst_50 = arith.constant dense<0.000000e+00> : vector<24x128xf32>
    %53 = tpu.matmul %50, %52, %cst_50 {dimension_numbers = #tpu.dot_dimension_numbers<[1], [0], [0], [1], [0, 0, 1, 1], [], []>} : vector<24x128xbf16>, vector<128x128xbf16>, vector<24x128xf32> -> vector<24x128xf32>
    %54 = arith.addf %48, %53 : vector<24x128xf32>
    %55 = tpu.iota {dimensions = array<i32: 0>} : vector<24x1xi32>
    %c6_i32 = arith.constant 6 : i32
    %c0_i32 = arith.constant 0 : i32
    %56 = arith.cmpi eq, %c6_i32, %c0_i32 : i32
    %c1_i32 = arith.constant 1 : i32
    %57 = arith.select %56, %c1_i32, %c6_i32 : i32
    %58 = vector.broadcast %57 : i32 to vector<24x1xi32>
    %59 = arith.remsi %55, %58 : vector<24x1xi32>
    %c0_i32_51 = arith.constant 0 : i32
    %60 = vector.broadcast %c0_i32_51 : i32 to vector<24x1xi32>
    %61 = arith.cmpi ne, %59, %60 : vector<24x1xi32>
    %c0_i32_52 = arith.constant 0 : i32
    %62 = vector.broadcast %c0_i32_52 : i32 to vector<24x1xi32>
    %63 = arith.cmpi slt, %59, %62 : vector<24x1xi32>
    %c0_i32_53 = arith.constant 0 : i32
    %64 = arith.cmpi slt, %57, %c0_i32_53 : i32
    %65 = vector.broadcast %64 : i1 to vector<24x1xi1>
    %66 = vector.broadcast %65 : vector<24x1xi1> to vector<24x1xi1>
    %67 = arith.xori %63, %66 : vector<24x1xi1>
    %68 = arith.andi %67, %61 : vector<24x1xi1>
    %69 = vector.broadcast %57 : i32 to vector<24x1xi32>
    %70 = arith.addi %59, %69 : vector<24x1xi32>
    %71 = arith.select %68, %70, %59 : vector<24x1xi1>, vector<24x1xi32>
    %c4_i32 = arith.constant 4 : i32
    %72 = vector.broadcast %c4_i32 : i32 to vector<24x1xi32>
    %73 = arith.cmpi slt, %71, %72 : vector<24x1xi32>
    %cst_54 = arith.constant 0.000000e+00 : f32
    %74 = vector.shape_cast %73 : vector<24x1xi1> to vector<24x1xi1>
    %75 = vector.broadcast %74 : vector<24x1xi1> to vector<24x128xi1>
    %76 = vector.broadcast %cst_54 : f32 to vector<24x128xf32>
    %77 = arith.select %75, %54, %76 : vector<24x128xi1>, vector<24x128xf32>
    %cst_55 = arith.constant dense<0.000000e+00> : vector<128xf32>
    %78 = vector.multi_reduction <add>, %77, %cst_55 [0] : vector<24x128xf32> to vector<128xf32>
    %79 = vector.shape_cast %78 : vector<128xf32> to vector<1x128xf32>
    %cst_56 = arith.constant 6.250000e-02 : f32
    %80 = vector.broadcast %cst_56 : f32 to vector<1x128xf32>
    %81 = arith.mulf %79, %80 : vector<1x128xf32>
    %82 = vector.broadcast %81 : vector<1x128xf32> to vector<24x128xf32>
    %83 = arith.subf %54, %82 : vector<24x128xf32>
    %84 = arith.mulf %83, %83 : vector<24x128xf32>
    %cst_57 = arith.constant 0.000000e+00 : f32
    %85 = vector.shape_cast %73 : vector<24x1xi1> to vector<24x1xi1>
    %86 = vector.broadcast %85 : vector<24x1xi1> to vector<24x128xi1>
    %87 = vector.broadcast %cst_57 : f32 to vector<24x128xf32>
    %88 = arith.select %86, %84, %87 : vector<24x128xi1>, vector<24x128xf32>
    %cst_58 = arith.constant dense<0.000000e+00> : vector<128xf32>
    %89 = vector.multi_reduction <add>, %88, %cst_58 [0] : vector<24x128xf32> to vector<128xf32>
    %90 = vector.shape_cast %89 : vector<128xf32> to vector<1x128xf32>
    %cst_59 = arith.constant 6.250000e-02 : f32
    %91 = vector.broadcast %cst_59 : f32 to vector<1x128xf32>
    %92 = arith.mulf %90, %91 : vector<1x128xf32>
    %cst_60 = arith.constant 9.99999974E-6 : f32
    %93 = vector.broadcast %cst_60 : f32 to vector<1x128xf32>
    %94 = arith.addf %92, %93 : vector<1x128xf32>
    %95 = math.rsqrt %94 : vector<1x128xf32>
    %96 = vector.broadcast %95 : vector<1x128xf32> to vector<24x128xf32>
    %97 = arith.mulf %83, %96 : vector<24x128xf32>
    %cst_61 = arith.constant 0.000000e+00 : f32
    %98 = vector.broadcast %cst_61 : f32 to vector<24x128xf32>
    %99 = arith.maximumf %97, %98 : vector<24x128xf32>
    %cst_62 = arith.constant 0.000000e+00 : f32
    %100 = vector.shape_cast %73 : vector<24x1xi1> to vector<24x1xi1>
    %101 = vector.broadcast %100 : vector<24x1xi1> to vector<24x128xi1>
    %102 = vector.broadcast %cst_62 : f32 to vector<24x128xf32>
    %103 = arith.select %101, %99, %102 : vector<24x128xi1>, vector<24x128xf32>
    %104 = arith.truncf %103 : vector<24x128xf32> to vector<24x128xbf16>
    %c0_63 = arith.constant 0 : index
    %c7_64 = arith.constant 7 : index
    %c0_65 = arith.constant 0 : index
    %105 = vector.load %arg3[%c0_63, %c7_64, %c0_65] : memref<1x42x128xbf16, #tpu.memory_space<vmem>>, vector<1x24x128xbf16>
    %106 = vector.shape_cast %105 : vector<1x24x128xbf16> to vector<24x128xbf16>
    %107 = vector.shape_cast %104 : vector<24x128xbf16> to vector<1x24x128xbf16>
    tpu.vector_store %arg3[%c0_63, %c7_64, %c0_65], %107 {strides = array<i32>} : memref<1x42x128xbf16, #tpu.memory_space<vmem>>, vector<1x24x128xbf16>,
    %cst_66 = arith.constant 0.000000e+00 : bf16
    %108 = vector.broadcast %cst_66 : bf16 to vector<7x128xbf16>
    %c0_67 = arith.constant 0 : index
    %c0_68 = arith.constant 0 : index
    %c0_69 = arith.constant 0 : index
    %109 = vector.load %arg3[%c0_67, %c0_68, %c0_69] : memref<1x42x128xbf16, #tpu.memory_space<vmem>>, vector<1x7x128xbf16>
    %110 = vector.shape_cast %109 : vector<1x7x128xbf16> to vector<7x128xbf16>
    %111 = vector.shape_cast %108 : vector<7x128xbf16> to vector<1x7x128xbf16>
    tpu.vector_store %arg3[%c0_67, %c0_68, %c0_69], %111 {strides = array<i32>} : memref<1x42x128xbf16, #tpu.memory_space<vmem>>, vector<1x7x128xbf16>,
    %cst_70 = arith.constant 0.000000e+00 : bf16
    %112 = vector.broadcast %cst_70 : bf16 to vector<11x128xbf16>
    %c0_71 = arith.constant 0 : index
    %c31 = arith.constant 31 : index
    %c0_72 = arith.constant 0 : index
    %113 = vector.load %arg3[%c0_71, %c31, %c0_72] : memref<1x42x128xbf16, #tpu.memory_space<vmem>>, vector<1x11x128xbf16>
    %114 = vector.shape_cast %113 : vector<1x11x128xbf16> to vector<11x128xbf16>
    %115 = vector.shape_cast %112 : vector<11x128xbf16> to vector<1x11x128xbf16>
    tpu.vector_store %arg3[%c0_71, %c31, %c0_72], %115 {strides = array<i32>} : memref<1x42x128xbf16, #tpu.memory_space<vmem>>, vector<1x11x128xbf16>,
    return
  }
  func.func @transform_0(%arg0: i32) -> (i32, i32, i32) {
    %c0_i32 = arith.constant 0 : i32
    %c0_i32_0 = arith.constant 0 : i32
    %c0_i32_1 = arith.constant 0 : i32
    return %arg0, %c0_i32, %c0_i32_0 : i32, i32, i32
  }
  func.func @transform_1(%arg0: i32) -> (i32, i32, i32) {
    %c0_i32 = arith.constant 0 : i32
    %c0_i32_0 = arith.constant 0 : i32
    %c0_i32_1 = arith.constant 0 : i32
    %c0_i32_2 = arith.constant 0 : i32
    return %c0_i32, %c0_i32_0, %c0_i32_1 : i32, i32, i32
  }
  func.func @transform_2(%arg0: i32) -> (i32, i32, i32) {
    %c0_i32 = arith.constant 0 : i32
    %c0_i32_0 = arith.constant 0 : i32
    %c0_i32_1 = arith.constant 0 : i32
    return %arg0, %c0_i32, %c0_i32_0 : i32, i32, i32
  }
}

module attributes {stable_mosaic.version = 11 : i64} {
  func.func @_depth_head_kernel(%arg0: i32, %arg1: memref<48x128xbf16, #tpu.memory_space<vmem>>, %arg2: memref<128x128xbf16, #tpu.memory_space<vmem>>, %arg3: memref<1x128xf32, #tpu.memory_space<vmem>>, %arg4: memref<48x128xf32, #tpu.memory_space<vmem>>) attributes {dimension_semantics = [#tpu.dimension_semantics<parallel>], iteration_bounds = array<i64: 2>, scalar_prefetch = 0 : i64, scratch_operands = 0 : i64, tpu.core_type = #tpu.core_type<tc>, window_params = [{transform_indices = @transform_0, window_bounds = array<i64: 48, 128>}, {pipeline_mode = #tpu.pipeline_mode<synchronous>, transform_indices = @transform_1, window_bounds = array<i64: 128, 128>}, {pipeline_mode = #tpu.pipeline_mode<synchronous>, transform_indices = @transform_2, window_bounds = array<i64: 1, 128>}, {transform_indices = @transform_3, window_bounds = array<i64: 48, 128>}]} {
    %c0 = arith.constant 0 : index
    %c0_0 = arith.constant 0 : index
    %0 = vector.load %arg1[%c0, %c0_0] : memref<48x128xbf16, #tpu.memory_space<vmem>>, vector<48x128xbf16>
    %c0_1 = arith.constant 0 : index
    %c0_2 = arith.constant 0 : index
    %1 = vector.load %arg2[%c0_1, %c0_2] : memref<128x128xbf16, #tpu.memory_space<vmem>>, vector<128x128xbf16>
    %cst = arith.constant dense<0.000000e+00> : vector<48x128xf32>
    %2 = tpu.matmul %0, %1, %cst {dimension_numbers = #tpu.dot_dimension_numbers<[1], [0], [0], [1], [0, 0, 1, 1], [], []>} : vector<48x128xbf16>, vector<128x128xbf16>, vector<48x128xf32> -> vector<48x128xf32>
    %c0_3 = arith.constant 0 : index
    %c0_4 = arith.constant 0 : index
    %3 = vector.load %arg3[%c0_3, %c0_4] : memref<1x128xf32, #tpu.memory_space<vmem>>, vector<1x128xf32>
    %4 = vector.broadcast %3 : vector<1x128xf32> to vector<48x128xf32>
    %5 = arith.addf %2, %4 : vector<48x128xf32>
    %6 = vector.extract_strided_slice %5 {offsets = [0, 0], sizes = [48, 12], strides = [1, 1]} : vector<48x128xf32> to vector<48x12xf32>
    %7 = vector.extract_strided_slice %5 {offsets = [0, 12], sizes = [48, 96], strides = [1, 1]} : vector<48x128xf32> to vector<48x96xf32>
    %cst_5 = arith.constant dense<0xFF800000> : vector<48xf32>
    %8 = vector.multi_reduction <maximumf>, %6, %cst_5 [1] : vector<48x12xf32> to vector<48xf32>
    %9 = vector.shape_cast %8 : vector<48xf32> to vector<48x1xf32>
    %10 = vector.broadcast %9 : vector<48x1xf32> to vector<48x12xf32>
    %11 = arith.subf %6, %10 : vector<48x12xf32>
    %12 = math.exp %11 : vector<48x12xf32>
    %cst_6 = arith.constant dense<0.000000e+00> : vector<48xf32>
    %13 = vector.multi_reduction <add>, %12, %cst_6 [1] : vector<48x12xf32> to vector<48xf32>
    %14 = vector.shape_cast %13 : vector<48xf32> to vector<48x1xf32>
    %15 = vector.broadcast %14 : vector<48x1xf32> to vector<48x12xf32>
    %16 = arith.divf %12, %15 : vector<48x12xf32>
    %17 = tpu.concatenate %16, %16, %16, %16, %16, %16, %16, %16 in 1 : vector<48x12xf32>, vector<48x12xf32>, vector<48x12xf32>, vector<48x12xf32>, vector<48x12xf32>, vector<48x12xf32>, vector<48x12xf32>, vector<48x12xf32> -> vector<48x96xf32>
    %18 = arith.mulf %7, %17 : vector<48x96xf32>
    %cst_7 = arith.constant 0.000000e+00 : f32
    %19 = vector.broadcast %cst_7 : f32 to vector<48x20xf32>
    %20 = tpu.concatenate %16, %18, %19 in 1 : vector<48x12xf32>, vector<48x96xf32>, vector<48x20xf32> -> vector<48x128xf32>
    %c0_8 = arith.constant 0 : index
    %c0_9 = arith.constant 0 : index
    %21 = vector.load %arg4[%c0_8, %c0_9] : memref<48x128xf32, #tpu.memory_space<vmem>>, vector<48x128xf32>
    tpu.vector_store %arg4[%c0_8, %c0_9], %20 {strides = array<i32>} : memref<48x128xf32, #tpu.memory_space<vmem>>, vector<48x128xf32>,
    return
  }
  func.func @transform_0(%arg0: i32) -> (i32, i32) {
    %c0_i32 = arith.constant 0 : i32
    %c0_i32_0 = arith.constant 0 : i32
    return %arg0, %c0_i32 : i32, i32
  }
  func.func @transform_1(%arg0: i32) -> (i32, i32) {
    %c0_i32 = arith.constant 0 : i32
    %c0_i32_0 = arith.constant 0 : i32
    %c0_i32_1 = arith.constant 0 : i32
    return %c0_i32, %c0_i32_0 : i32, i32
  }
  func.func @transform_2(%arg0: i32) -> (i32, i32) {
    %c0_i32 = arith.constant 0 : i32
    %c0_i32_0 = arith.constant 0 : i32
    %c0_i32_1 = arith.constant 0 : i32
    return %c0_i32, %c0_i32_0 : i32, i32
  }
  func.func @transform_3(%arg0: i32) -> (i32, i32) {
    %c0_i32 = arith.constant 0 : i32
    %c0_i32_0 = arith.constant 0 : i32
    return %arg0, %c0_i32 : i32, i32
  }
}

</mosaic_0001>

<bundles_post_ra>
// kernel: encoder_forward.5
= control target key start
LH: loop header
LB: loop body
LE: loop exit
PB: predicated region body
PF: predicated region fallthrough
CT: control target
= control target key end

     0   :  { %s775_s12 = smov 0   ;;  %s777_s13 = smov 0   ;;  %s863_s0 = inlined_call_operand.vmem [shape: bf16[32,256], index: 0, kind: input, shape index: {}]   ;;  %s864_s1 = inlined_call_operand.vmem [shape: bf16[256,128], index: 1, kind: input, shape index: {}]   ;;  %s865_s2 = inlined_call_operand.vmem [shape: f32[1,128], index: 2, kind: input, shape index: {}]   ;;  %s866_s3 = inlined_call_operand.vmem [shape: bf16[32,128], index: 3, kind: output, shape index: {}]  }
   0x1   :  { %s779_s14 = smov 0  }
   0x2 LB: > { %s32_s15 = sadd.s32 1, %s749_s13  ;;  %p619_p0 = scmp.ge.s32.totalorder %s753_s14, 1  ;;  %s753_s14 = sphi %s779_s14, %s13_s14   ;;  %s749_s13 = sphi %s777_s13, %s868_s13   ;;  %s745_s12 = sphi %s775_s12, %s867_s12  }
   0x3   : > { %p34_p1 = scmp.ge.s32.totalorder %s32_s15, 2  ;;  %p191_p2 = scmp.lt.s32.totalorder %s753_s14, 3 }
   0x5   : > { %s870_s15 = smov (%p34_p1, %s32_s15), 0  ;;  %p192_p3 = pnand %p619_p0, %p191_p2 }
   0x6   : > { %v704_v0 = vld [vmem:[%s864_s1 + $0x40] sm:$0xff] (!%p192_p3)   ;;  %s620_s18 = sshll.u32 (!%p192_p3), %s745_s12, 1  ;;  %v706_v2 = vld [vmem:[%s864_s1 + $0x48] sm:$0xff] (!%p192_p3)   ;;  %v708_v4 = vld [vmem:[%s864_s1 + $0x50] sm:$0xff] (!%p192_p3)  }
   0x7   : > { %195 = sbr.rel (%p192_p3) target bundleno = 289 (0x121), region = 32  ;;  %v705_v1 = vld [vmem:[%s864_s1] sm:$0xff] (!%p192_p3)   ;;  %658 = vmatprep.subr.bf16.mxu0 (!%p192_p3), %v704_v0  ;;  %v707_v3 = vld [vmem:[%s864_s1 + $0x8] sm:$0xff] (!%p192_p3)   ;;  %p236_p4 = scmp.lt.s32.totalorder (!%p192_p3), %s620_s18, 3  ;;  %v709_v5 = vld [vmem:[%s864_s1 + $0x10] sm:$0xff] (!%p192_p3)  }
   0x8   : > { %659 = vmatpush3.bf16.msra.mxu0 (!%p192_p3), %v705_v1  ;;  %v710_v6 = vld [vmem:[%s864_s1 + $0x58] sm:$0xff] (!%p192_p3)   ;;  %v712_v8 = vld [vmem:[%s864_s1 + $0x60] sm:$0xff] (!%p192_p3)   ;;  %v714_v10 = vld [vmem:[%s864_s1 + $0x68] sm:$0xff] (!%p192_p3)  }
   0x9   : > { %660 = vmatprep.subr.bf16.mxu0 (!%p192_p3), %v706_v2  ;;  %v711_v7 = vld [vmem:[%s864_s1 + $0x18] sm:$0xff] (!%p192_p3)   ;;  %v713_v9 = vld [vmem:[%s864_s1 + $0x20] sm:$0xff] (!%p192_p3)   ;;  %v715_v12 = vld [vmem:[%s864_s1 + $0x28] sm:$0xff] (!%p192_p3)  }
   0xa   : > { %v716_v13 = vld [vmem:[%s864_s1 + $0x70] sm:$0xff] (!%p192_p3)   ;;  %v718_v15 = vld [vmem:[%s864_s1 + $0x78] sm:$0xff] (!%p192_p3)   ;;  %v643_v20 = vld [vmem:[%s865_s2] ss:$0 sm:$0xff] (!%p192_p3) }
   0xb   : > { %v717_v14 = vld [vmem:[%s864_s1 + $0x30] sm:$0xff] (!%p192_p3)   ;;  %v719_v16 = vld [vmem:[%s864_s1 + $0x38] sm:$0xff] (!%p192_p3)  }
   0xc   : > { %661 = vmatpush3.bf16.msra.mxu0 (!%p192_p3), %v707_v3 }
   0xd   : > { %662 = vmatprep.subr.bf16.mxu0 (!%p192_p3), %v708_v4 }
   0xe   : > { %s872_s18 = smov (!%p236_p4, %s620_s18), 3 }
   0xf   : > { %s650_s6 = sshll.u32 %s872_s18, 3  ;;  %s624_s5 = sshll.u32 %s872_s18, 2 }
  0x10   : > { %663 = vmatpush3.bf16.msra.mxu0 %v709_v5  ;;  %s243_s11 = scalar_lea.vmem %s863_s0, %s650_s6  ;;  %s265_s8 = scalar_lea.vmem %s866_s3, %s624_s5 }
  0x11   : > { %664 = vmatprep.subr.bf16.mxu0 %v710_v6  ;;  %v722_v11 = vld [vmem:[%s243_s11 + $0x4] ss:$8 sps:$4 sm:$0xff]   ;;  %v720_v17 = vld [vmem:[%s243_s11] ss:$8 sps:$4 sm:$0xff]  }
  0x12   : > { %448 = vmatprep.mubr.bf16.mxu0 %v722_v11 }
  0x14   : > { %665 = vmatpush3.bf16.msra.mxu0 %v711_v7 }
  0x15   : > { %666 = vmatprep.subr.bf16.mxu0 %v712_v8 }
  0x18   : > { %667 = vmatpush3.bf16.msra.mxu0 %v713_v9 }
  0x19   : > { %668 = vmatprep.subr.bf16.mxu0 %v714_v10 }
  0x1c   : > { %669 = vmatpush3.bf16.msra.mxu0 %v715_v12 }
  0x1d   : > { %670 = vmatprep.subr.bf16.mxu0 %v716_v13 }
  0x20   : > { %671 = vmatpush3.bf16.msra.mxu0 %v717_v14 }
  0x21   : > { %672 = vmatprep.subr.bf16.mxu0 %v718_v15 }
  0x24   : > { %673 = vmatpush3.bf16.msra.mxu0 %v719_v16 }
  0x27   : > { %449 = vmatmul.mubr.bf16.vlgmr.msra.gmra.mrb[0].mxu0 %v720_v17 }
  0xfa   : > { %v674_v18 = vpop.f32.mrb[0].mxu0 }
  0xfb   : > { %v675_v19 = vpop.f32.mrb[1].mxu0 }
  0xfc   : > { %v676_v21 = vadd.f32 %v675_v19, %v674_v18  ;;  %v677_v22 = vpop.f32.mrb[2].mxu0 }
  0xfd   : > { %v678_v23 = vpop.f32.mrb[3].mxu0 }
  0xfe   : > { %v473_v24 = vadd.f32 %v676_v21, %v643_v20  ;;  %v679_v25 = vadd.f32 %v678_v23, %v677_v22 }
 0x100   : > { %v644_v26 = vmul.f32 -1.442695, %v473_v24  ;;  %v474_v27 = vadd.f32 %v679_v25, %v643_v20 }
 0x102   : > { %723 = vpow2.f32 %v644_v26  ;;  %v645_v28 = vmul.f32 -1.442695, %v474_v27 }
 0x104   : > { %725 = vpow2.f32 %v645_v28 }
 0x10c   : > { %v724_v29 = vpop.eup %723 }
 0x10d   : > { %v481_v30 = vadd.f32 1.0, %v724_v29 }
 0x10e   : > { %v726_v31 = vpop.eup %725 }
 0x10f   : > { %727 = vrcp.f32 %v481_v30  ;;  %v482_v32 = vadd.f32 1.0, %v726_v31 }
 0x111   : > { %729 = vrcp.f32 %v482_v32 }
 0x119   : > { %v728_v33 = vpop.eup %727 }
 0x11a   : > { %v487_v35 = vmul.f32 %v728_v33, %v473_v24 }
 0x11b   : > { %v730_v34 = vpop.eup %729 }
 0x11c   : > { %v488_v36 = vmul.f32 %v730_v34, %v474_v27 }
 0x11e   : > { %v656_v37 = vpack.c.bf16 %v488_v36, %v487_v35 }
 0x120   : > { %657 = vst [vmem:[%s265_s8] sm:$0xff] %v656_v37  }
 0x121 PF: > { %s13_s14 = sadd.s32 1, %s753_s14   ;;  %s867_s12 = smov %s749_s13 }
 0x122   : > { %p10_p5 = scmp.ge.s32.totalorder %s13_s14, 4   ;;  %s868_s13 = smov %s870_s15 }
 0x124   :  { %12 = sbr.rel (!%p10_p5) target bundleno = 2 (0x2), region = 76 }

// kernel: encoder_forward.6
= control target key start
LH: loop header
LB: loop body
LE: loop exit
PB: predicated region body
PF: predicated region fallthrough
CT: control target
= control target key end

     0   :  { %v290_v34 = vlaneseq  ;;  %s590_s1 = inlined_call_operand.vmem [shape: bf16[256,256], index: 1, kind: input, shape index: {}]   ;;  %s591_s0 = inlined_call_operand.vmem [shape: bf16[16,256], index: 0, kind: input, shape index: {}]   ;;  %s592_s2 = inlined_call_operand.vmem [shape: f32[1,256], index: 2, kind: input, shape index: {}]   ;;  %s593_s3 = inlined_call_operand.vmem [shape: bf16[16,256], index: 3, kind: output, shape index: {}]  }
   0x1   :  { %v392_v0 = vld [vmem:[%s590_s1 + $0x4] ss:$8 sps:$4 sm:$0xff]   ;;  %v394_v1 = vld [vmem:[%s590_s1] ss:$8 sps:$4 sm:$0xff]   ;;  %v395_v2 = vld [vmem:[%s590_s1 + $0x14] ss:$8 sps:$4 sm:$0xff]  }
   0x2   :  { %230 = vmatprep.subr.bf16.mxu0 %v392_v0  ;;  %v397_v3 = vld [vmem:[%s590_s1 + $0x10] ss:$8 sps:$4 sm:$0xff]   ;;  %v398_v4 = vld [vmem:[%s590_s1 + $0x24] ss:$8 sps:$4 sm:$0xff]   ;;  %v400_v5 = vld [vmem:[%s590_s1 + $0x20] ss:$8 sps:$4 sm:$0xff]  }
   0x3   :  { %231 = vmatpush1.bf16.msra.mxu0 %v394_v1  ;;  %v401_v6 = vld [vmem:[%s590_s1 + $0x34] ss:$8 sps:$4 sm:$0xff]   ;;  %v403_v7 = vld [vmem:[%s590_s1 + $0x30] ss:$8 sps:$4 sm:$0xff]   ;;  %v404_v8 = vld [vmem:[%s590_s1 + $0x44] ss:$8 sps:$4 sm:$0xff]  }
   0x4   :  { %232 = vmatprep.subr.bf16.mxu0 %v395_v2  ;;  %v406_v9 = vld [vmem:[%s590_s1 + $0x40] ss:$8 sps:$4 sm:$0xff]   ;;  %v407_v10 = vld [vmem:[%s590_s1 + $0x54] ss:$8 sps:$4 sm:$0xff]   ;;  %v409_v11 = vld [vmem:[%s590_s1 + $0x50] ss:$8 sps:$4 sm:$0xff]  }
   0x5   :  { %v410_v12 = vld [vmem:[%s590_s1 + $0x64] ss:$8 sps:$4 sm:$0xff]   ;;  %v412_v14 = vld [vmem:[%s590_s1 + $0x60] ss:$8 sps:$4 sm:$0xff]   ;;  %v413_v15 = vld [vmem:[%s590_s1 + $0x74] ss:$8 sps:$4 sm:$0xff]  }
   0x6   :  { %v442_v13 = vld [vmem:[%s591_s0 + $0x4] ss:$8 sps:$4 sm:$0xff]   ;;  %v415_v16 = vld [vmem:[%s590_s1 + $0x70] ss:$8 sps:$4 sm:$0xff]   ;;  %v418_v18 = vld [vmem:[%s590_s1 + $0x80] ss:$8 sps:$4 sm:$0xff]  }
   0x7   :  { %233 = vmatpush1.bf16.msra.mxu0 %v397_v3  ;;  %262 = vmatprep.mubr.bf16.mxu0 %v442_v13  ;;  %v416_v17 = vld [vmem:[%s590_s1 + $0x84] ss:$8 sps:$4 sm:$0xff]   ;;  %v419_v19 = vld [vmem:[%s590_s1 + $0x94] ss:$8 sps:$4 sm:$0xff]   ;;  %v421_v20 = vld [vmem:[%s590_s1 + $0x90] ss:$8 sps:$4 sm:$0xff]  }
   0x8   :  { %234 = vmatprep.subr.bf16.mxu0 %v398_v4  ;;  %v422_v21 = vld [vmem:[%s590_s1 + $0xa4] ss:$8 sps:$4 sm:$0xff]   ;;  %v424_v22 = vld [vmem:[%s590_s1 + $0xa0] ss:$8 sps:$4 sm:$0xff]   ;;  %v425_v23 = vld [vmem:[%s590_s1 + $0xb4] ss:$8 sps:$4 sm:$0xff]  }
   0x9   :  { %v427_v24 = vld [vmem:[%s590_s1 + $0xb0] ss:$8 sps:$4 sm:$0xff]   ;;  %v428_v25 = vld [vmem:[%s590_s1 + $0xc4] ss:$8 sps:$4 sm:$0xff]   ;;  %v430_v26 = vld [vmem:[%s590_s1 + $0xc0] ss:$8 sps:$4 sm:$0xff]  }
   0xa   :  { %v431_v27 = vld [vmem:[%s590_s1 + $0xd4] ss:$8 sps:$4 sm:$0xff]   ;;  %v433_v28 = vld [vmem:[%s590_s1 + $0xd0] ss:$8 sps:$4 sm:$0xff]   ;;  %v434_v29 = vld [vmem:[%s590_s1 + $0xe4] ss:$8 sps:$4 sm:$0xff]  }
   0xb   :  { %235 = vmatpush1.bf16.msra.mxu0 %v400_v5  ;;  %v436_v30 = vld [vmem:[%s590_s1 + $0xe0] ss:$8 sps:$4 sm:$0xff]   ;;  %v437_v31 = vld [vmem:[%s590_s1 + $0xf4] ss:$8 sps:$4 sm:$0xff]   ;;  %v439_v32 = vld [vmem:[%s590_s1 + $0xf0] ss:$8 sps:$4 sm:$0xff]  }
   0xc   :  { %236 = vmatprep.subr.bf16.mxu0 %v401_v6  ;;  %v440_v33 = vld [vmem:[%s591_s0] ss:$8 sps:$4 sm:$0xff]   ;;  %v291_v35 = vshrl.u32 %v290_v34, 7 }
   0xd   :  { %v288_v37 = vld [vmem:[%s592_s2] sm:$0x3] }
   0xe   :  { %v292_v36 = vsub.s32 0, %v291_v35  ;;  %v296_v38 = vsub.s32 1, %v291_v35 }
   0xf   :  { %237 = vmatpush1.bf16.msra.mxu0 %v403_v7 }
  0x10   :  { %238 = vmatprep.subr.bf16.mxu0 %v404_v8  ;;  %v293_v39 = vrot.slane %v288_v37, %v292_v36  ;;  %v297_v40 = vrot.slane %v288_v37, %v296_v38 }
  0x13   :  { %239 = vmatpush1.bf16.msra.mxu0 %v406_v9 }
  0x14   :  { %240 = vmatprep.subr.bf16.mxu0 %v407_v10 }
  0x17   :  { %241 = vmatpush1.bf16.msra.mxu0 %v409_v11 }
  0x18   :  { %242 = vmatprep.subr.bf16.mxu0 %v410_v12 }
  0x1b   :  { %243 = vmatpush1.bf16.msra.mxu0 %v412_v14 }
  0x1c   :  { %244 = vmatprep.subr.bf16.mxu0 %v413_v15 }
  0x1f   :  { %245 = vmatpush1.bf16.msra.mxu0 %v415_v16 }
  0x20   :  { %246 = vmatprep.subr.bf16.mxu0 %v416_v17 }
  0x23   :  { %247 = vmatpush1.bf16.msra.mxu0 %v418_v18 }
  0x24   :  { %248 = vmatprep.subr.bf16.mxu0 %v419_v19 }
  0x27   :  { %249 = vmatpush1.bf16.msra.mxu0 %v421_v20 }
  0x28   :  { %250 = vmatprep.subr.bf16.mxu0 %v422_v21 }
  0x2b   :  { %251 = vmatpush1.bf16.msra.mxu0 %v424_v22 }
  0x2c   :  { %252 = vmatprep.subr.bf16.mxu0 %v425_v23 }
  0x2f   :  { %253 = vmatpush1.bf16.msra.mxu0 %v427_v24 }
  0x30   :  { %254 = vmatprep.subr.bf16.mxu0 %v428_v25 }
  0x33   :  { %255 = vmatpush1.bf16.msra.mxu0 %v430_v26 }
  0x34   :  { %256 = vmatprep.subr.bf16.mxu0 %v431_v27 }
  0x37   :  { %257 = vmatpush1.bf16.msra.mxu0 %v433_v28 }
  0x38   :  { %258 = vmatprep.subr.bf16.mxu0 %v434_v29 }
  0x3b   :  { %259 = vmatpush1.bf16.msra.mxu0 %v436_v30 }
  0x3c   :  { %260 = vmatprep.subr.bf16.mxu0 %v437_v31 }
  0x3f   :  { %261 = vmatpush1.bf16.msra.mxu0 %v439_v32 }
  0x42   :  { %263 = vmatmul.mubr.bf16.vlgmr.msra.gmra.mrb[0].mxu0 %v440_v33 }
 0x115   :  { %v264_v41 = vpop.f32.mrb[0].mxu0 }
 0x116   :  { %v300_v42 = vadd.f32 %v293_v39, %v264_v41  ;;  %v266_v43 = vpop.f32.mrb[1].mxu0 }
 0x117   :  { %v301_v44 = vadd.f32 %v297_v40, %v266_v43  ;;  %v268_v45 = vpop.f32.mrb[2].mxu0 }
 0x118   :  { %v384_v46 = vmul.f32 -1.442695, %v300_v42  ;;  %v302_v47 = vadd.f32 %v293_v39, %v268_v45  ;;  %v270_v48 = vpop.f32.mrb[3].mxu0 }
 0x119   :  { %v385_v49 = vmul.f32 -1.442695, %v301_v44  ;;  %v303_v50 = vadd.f32 %v297_v40, %v270_v48 }
 0x11a   :  { %443 = vpow2.f32 %v384_v46  ;;  %v386_v51 = vmul.f32 -1.442695, %v302_v47 }
 0x11b   :  { %445 = vpow2.f32 %v385_v49  ;;  %v387_v52 = vmul.f32 -1.442695, %v303_v50 }
 0x11c   :  { %447 = vpow2.f32 %v386_v51 }
 0x11d   :  { %449 = vpow2.f32 %v387_v52 }
 0x124   :  { %v444_v53 = vpop.eup %443 }
 0x125   :  { %v446_v54 = vpop.eup %445  ;;  %v316_v55 = vadd.f32 1.0, %v444_v53 }
 0x126   :  { %v448_v56 = vpop.eup %447  ;;  %v317_v57 = vadd.f32 1.0, %v446_v54 }
 0x127   :  { %v450_v58 = vpop.eup %449  ;;  %451 = vrcp.f32 %v316_v55  ;;  %v318_v59 = vadd.f32 1.0, %v448_v56 }
 0x128   :  { %453 = vrcp.f32 %v317_v57  ;;  %v319_v60 = vadd.f32 1.0, %v450_v58 }
 0x129   :  { %455 = vrcp.f32 %v318_v59 }
 0x12a   :  { %457 = vrcp.f32 %v319_v60 }
 0x131   :  { %v452_v61 = vpop.eup %451 }
 0x132   :  { %v454_v62 = vpop.eup %453  ;;  %v328_v63 = vmul.f32 %v452_v61, %v300_v42 }
 0x133   :  { %v456_v0 = vpop.eup %455  ;;  %v329_v1 = vmul.f32 %v454_v62, %v301_v44 }
 0x134   :  { %v458_v2 = vpop.eup %457  ;;  %v330_v3 = vmul.f32 %v456_v0, %v302_v47 }
 0x135   :  { %v390_v4 = vpack.c.bf16 %v329_v1, %v328_v63  ;;  %v331_v5 = vmul.f32 %v458_v2, %v303_v50 }
 0x137   :  { %344 = vst [vmem:[%s593_s3] sm:$0xff] %v390_v4  ;;  %v391_v6 = vpack.c.bf16 %v331_v5, %v330_v3 }
 0x139   :  { %345 = vst [vmem:[%s593_s3 + $0x8] sm:$0xff] %v391_v6 }

// kernel: encoder_forward.8
= control target key start
LH: loop header
LB: loop body
LE: loop exit
PB: predicated region body
PF: predicated region fallthrough
CT: control target
= control target key end

     0   :  { %s2202_s9 = smov 0   ;;  %s2591_s0 = inlined_call_operand.vmem [shape: bf16[2,42,128], index: 0, kind: input, shape index: {}]   ;;  %s2592_s1 = inlined_call_operand.vmem [shape: bf16[9,128,128], index: 1, kind: input, shape index: {}]   ;;  %s2593_s2 = inlined_call_operand.vmem [shape: bf16[2,42,128], index: 2, kind: output, shape index: {}]  }
   0x1 LB: > { %s1546_s10 = sadd.s32 4294967295, %s2184_s9   ;;  %p1550_p0 = scmp.ge.s32.totalorder %s2184_s9, 1  ;;  %s2184_s9 = sphi %s2202_s9, %s12_s9  }
   0x2   : > { %p112_p1 = scmp.lt.s32.totalorder %s2184_s9, 3 }
   0x4   : > { %p113_p2 = pnand %p1550_p0, %p112_p1 }
   0x5   : > { %v2091_v0 = vld [vmem:[%s2592_s1 + $0x40] sm:$0xff] (!%p113_p2)   ;;  %p134_p3 = scmp.lt.s32.totalorder (!%p113_p2), %s1546_s10, 1  ;;  %v2093_v2 = vld [vmem:[%s2592_s1 + $0x48] sm:$0xff] (!%p113_p2)   ;;  %v2095_v4 = vld [vmem:[%s2592_s1 + $0x50] sm:$0xff] (!%p113_p2)   ;;  %vm192_vm0 = vsmask.f32 (!%p113_p2), 7424 }
   0x6   : > { %116 = sbr.rel (%p113_p2) target bundleno = 466 (0x1d2), region = 28  ;;  %v2092_v1 = vld [vmem:[%s2592_s1 + $0x100] sm:$0xff] (!%p113_p2)   ;;  %1864 = vmatprep.subr.bf16.mxu1 (!%p113_p2), %v2091_v0  ;;  %v2094_v3 = vld [vmem:[%s2592_s1 + $0x108] sm:$0xff] (!%p113_p2)   ;;  %v2096_v5 = vld [vmem:[%s2592_s1 + $0x110] sm:$0xff] (!%p113_p2)   ;;  %vm682_vm1 = vsmask.f32 (!%p113_p2), 4352 }
   0x7   : > { %1944 = vmatprep.subr.bf16.mxu0 (!%p113_p2), %v2092_v1  ;;  %1865 = vmatpush3.bf16.msra.mxu1 (!%p113_p2), %v2091_v0  ;;  %v2097_v6 = vld [vmem:[%s2592_s1 + $0x58] sm:$0xff] (!%p113_p2)   ;;  %v2099_v8 = vld [vmem:[%s2592_s1 + $0x60] sm:$0xff] (!%p113_p2)   ;;  %v2101_v10 = vld [vmem:[%s2592_s1 + $0x68] sm:$0xff] (!%p113_p2)   ;;  %vm426_vm2 = vcmask (!%p113_p2), 1046528   ;;  %vm952_vm3 = vcmask (!%p113_p2), 1045504   ;;  %vm556_vm4 = vcmask (!%p113_p2), 1044480  }
   0x8   : > { %1945 = vmatpush3.bf16.msra.mxu0 (!%p113_p2), %v2092_v1  ;;  %1866 = vmatprep.subr.bf16.mxu1 (!%p113_p2), %v2093_v2  ;;  %v2098_v7 = vld [vmem:[%s2592_s1 + $0x118] sm:$0xff] (!%p113_p2)   ;;  %v2100_v9 = vld [vmem:[%s2592_s1 + $0x120] sm:$0xff] (!%p113_p2)   ;;  %v2102_v11 = vld [vmem:[%s2592_s1 + $0x128] sm:$0xff] (!%p113_p2)   ;;  %vm1078_vm5 = vsmask.f32 (!%p113_p2), 5376 }
   0x9   : > { %1946 = vmatprep.subr.bf16.mxu0 (!%p113_p2), %v2094_v3  ;;  %v2103_v23 = vld [vmem:[%s2592_s1 + $0x70] sm:$0xff] (!%p113_p2)   ;;  %v2105_v30 = vld [vmem:[%s2592_s1 + $0x78] sm:$0xff] (!%p113_p2)   ;;  %v2109_v44 = vld [vmem:[%s2592_s1] sm:$0xff] (!%p113_p2)  }
   0xa   : > { %v2104_v26 = vld [vmem:[%s2592_s1 + $0x130] sm:$0xff] (!%p113_p2)   ;;  %v2106_v34 = vld [vmem:[%s2592_s1 + $0x138] sm:$0xff] (!%p113_p2)   ;;  %v2112_v46 = vld [vmem:[%s2592_s1 + $0x140] sm:$0xff] (!%p113_p2)  }
   0xb   : > { %1867 = vmatpush3.bf16.msra.mxu1 (!%p113_p2), %v2093_v2  ;;  %v2113_v48 = vld [vmem:[%s2592_s1 + $0x8] sm:$0xff] (!%p113_p2)   ;;  %v2115_v51 = vld [vmem:[%s2592_s1 + $0x10] sm:$0xff] (!%p113_p2)   ;;  %v2117_v53 = vld [vmem:[%s2592_s1 + $0x18] sm:$0xff] (!%p113_p2)  }
   0xc   : > { %1947 = vmatpush3.bf16.msra.mxu0 (!%p113_p2), %v2094_v3  ;;  %1868 = vmatprep.subr.bf16.mxu1 (!%p113_p2), %v2095_v4  ;;  %v2114_v49 = vld [vmem:[%s2592_s1 + $0x148] sm:$0xff] (!%p113_p2)   ;;  %v2116_v52 = vld [vmem:[%s2592_s1 + $0x150] sm:$0xff] (!%p113_p2)   ;;  %v2118_v54 = vld [vmem:[%s2592_s1 + $0x158] sm:$0xff] (!%p113_p2)  }
   0xd   : > { %s2603_s10 = smov (!%p134_p3, %s1546_s10), 1  ;;  %1948 = vmatprep.subr.bf16.mxu0 %v2096_v5  ;;  %v2119_v55 = vld [vmem:[%s2592_s1 + $0x20] sm:$0xff]   ;;  %v2121_v57 = vld [vmem:[%s2592_s1 + $0x28] sm:$0xff]   ;;  %v2123_v59 = vld [vmem:[%s2592_s1 + $0x30] sm:$0xff]  }
   0xe   : > { %s2075_s27 = smul.u32 24, %s2603_s10  ;;  %v2120_v56 = vld [vmem:[%s2592_s1 + $0x160] sm:$0xff]   ;;  %v2122_v58 = vld [vmem:[%s2592_s1 + $0x168] sm:$0xff]   ;;  %v2124_v60 = vld [vmem:[%s2592_s1 + $0x170] sm:$0xff]  }
   0xf   : > { %1869 = vmatpush3.bf16.msra.mxu1 %v2095_v4  ;;  %v2125_v61 = vld [vmem:[%s2592_s1 + $0x38] sm:$0xff]  }
  0x10   : > { %1949 = vmatpush3.bf16.msra.mxu0 %v2096_v5  ;;  %1870 = vmatprep.subr.bf16.mxu1 %v2097_v6  ;;  %s2248_s6 = scalar_lea.vmem %s2591_s0, %s2075_s27  ;;  %v2126_v3 = vld [vmem:[%s2592_s1 + $0x178] sm:$0xff]   ;;  %s2521_s14 = scalar_lea.vmem %s2593_s2, %s2075_s27 }
  0x11   : > { %1950 = vmatprep.subr.bf16.mxu0 %v2098_v7  ;;  %v145_v12 = vld [vmem:[%s2248_s6] sm:$0xf]  ;;  %v2258_v13 = vld [vmem:[%s2248_s6 + $0x4] sm:$0xf]  ;;  %v2261_v14 = vld [vmem:[%s2248_s6 + $0x8] sm:$0xf] }
  0x12   : > { %v164_v15 = vld [vmem:[%s2248_s6 + $0xc] sm:$0x1]  ;;  %v1569_v16 = vcombine.low %v145_v12, %v2258_v13  ;;  %v531_v18 = vld [vmem:[%s2248_s6] sm:$0x8]  ;;  %v1680_v50 = vcombine.low %v2258_v13, %v2261_v14  ;;  %v921_v63 = vld [vmem:[%s2248_s6 + $0x4] sm:$0xc] }
  0x13   : > { %1871 = vmatpush3.bf16.msra.mxu1 %v2097_v6  ;;  %v2266_v17 = vcombine.low %v2261_v14, %v164_v15  ;;  %v2270_v21 = vcombine.low %v531_v18, %v2258_v13  ;;  %v2273_v22 = vld [vmem:[%s2248_s6 + $0xc] sm:$0xf]  ;;  %v405_v62 = vld [vmem:[%s2248_s6] sm:$0xe]  ;;  %v2344_v0 = vld [vmem:[%s2248_s6 + $0x8] sm:$0xf] }
  0x14   : > { %1951 = vmatpush3.bf16.msra.mxu0 %v2098_v7  ;;  %1872 = vmatprep.subr.bf16.mxu1 %v2099_v8  ;;  %v194_v19 = vshrl.u32 %v1569_v16, 16  ;;  %v196_v20 = vshll.u32 %v1569_v16, 16  ;;  %v1655_v25 = vcombine.low %v2261_v14, %v2273_v22  ;;  %v2347_v1 = vld [vmem:[%s2248_s6 + $0xc] sm:$0xf]  ;;  %v924_v2 = vld [vmem:[%s2248_s6 + $0x10] sm:$0x3]  ;;  %v1604_v4 = vcombine.low %v405_v62, %v2258_v13 }
  0x15   : > { %1952 = vmatprep.subr.bf16.mxu0 %v2100_v9  ;;  %v201_v24 = vshll.u32 %v2266_v17, 16  ;;  %v684_v28 = vshrl.u32 %v2270_v21, 16  ;;  %v687_v29 = vshll.u32 %v2270_v21, 16  ;;  %v205_v43 = vshrl.u32 %v2266_v17, 16  ;;  %v2127_v7 = vld [vmem:[%s2592_s1 + $0x80] sm:$0xff]   ;;  %v2133_v18 = vld [vmem:[%s2592_s1 + $0x188] sm:$0xff]  }
  0x16   : > { %v198_v27 = vrot.slane %v196_v20, 1  ;;  %v692_v32 = vshrl.u32 %v1655_v25, 16  ;;  %v695_v33 = vshll.u32 %v1655_v25, 16  ;;  %v2355_v5 = vcombine.low %v921_v63, %v2344_v0  ;;  %v2163_v62 = vld [vmem:[%s2592_s1 + $0x1f0] sm:$0xff]   ;;  %v1197_v63 = vld [vmem:[%s2248_s6 + $0x4] sm:$0x8] }
  0x17   : > { %1873 = vmatpush3.bf16.msra.mxu1 %v2099_v8  ;;  %v203_v31 = vrot.slane %v201_v24, 1  ;;  %v686_v36 = vrot.slane %v684_v28, 3  ;;  %v689_v37 = vrot.slane %v687_v29, 4  ;;  %v1707_v6 = vcombine.low %v2347_v1, %v924_v2  ;;  %v2129_v8 = vld [vmem:[%s2592_s1 + $0x180] sm:$0xff]   ;;  %v532_v24 = vld [vmem:[%s2248_s6 + $0xc] sm:$0x7] }
  0x18   : > { %1953 = vmatpush3.bf16.msra.mxu0 %v2100_v9  ;;  %1874 = vmatprep.subr.bf16.mxu1 %v2101_v10  ;;  %v199_v35 = vor.u32 %v198_v27, %v194_v19  ;;  %v694_v38 = vrot.slane %v692_v32, 3  ;;  %v697_v39 = vrot.slane %v695_v33, 4  ;;  %v1579_v9 = vcombine.low %v2261_v14, %v2261_v14  ;;  %v2136_v27 = vld [vmem:[%s2592_s1 + $0x98] sm:$0xff]   ;;  %v1057_v32 = vld [vmem:[%s2248_s6 + $0x10] sm:$0x7]  ;;  %v2141_v33 = vld [vmem:[%s2592_s1 + $0x1a8] sm:$0xff]  }
  0x19   : > { %1954 = vmatprep.subr.bf16.mxu0 %v2102_v11  ;;  %v690_v41 = vor.u32 %v689_v37, %v686_v36  ;;  %v207_v47 = vor.u32 %v205_v43, %v203_v31  ;;  %v1681_v12 = vcombine.low %v2273_v22, %v2273_v22  ;;  %v953_v13 = vrot.slane %v2355_v5, 2  ;;  %v2134_v22 = vld [vmem:[%s2592_s1 + $0x90] sm:$0xff]   ;;  %v2137_v28 = vld [vmem:[%s2592_s1 + $0x198] sm:$0xff]  }
  0x1a   : > { %v204_v40 = vsel %vm192_vm0, %v199_v35, %v203_v31  ;;  %v698_v42 = vor.u32 %v697_v39, %v694_v38  ;;  %v2370_v15 = vrot.slane %v1707_v6, 2  ;;  %v557_v25 = vrot.slane %v2270_v21, 3  ;;  %v2140_v31 = vld [vmem:[%s2592_s1 + $0xa8] sm:$0xff]   ;;  %v2142_v35 = vld [vmem:[%s2592_s1 + $0xb0] sm:$0xff]   ;;  %v2165_v2 = vld [vmem:[%s2592_s1 + $0x1f8] sm:$0xff]  }
  0x1b   : > { %1875 = vmatpush3.bf16.msra.mxu1 %v2101_v10  ;;  %1880 = vmatprep.mubr.bf16.mxu1 %v204_v40  ;;  %v427_v10 = vrot.slane %v1604_v4, 1  ;;  %v2143_v36 = vld [vmem:[%s2592_s1 + $0x1b0] sm:$0xff]   ;;  %v1080_v37 = vshrl.u32 %v2355_v5, 16  ;;  %v1083_v38 = vshll.u32 %v2355_v5, 16  ;;  %v2167_v4 = vld [vmem:[%s2592_s1 + $0x200] sm:$0xff]  }
  0x1c   : > { %1955 = vmatpush3.bf16.msra.mxu0 %v2102_v11  ;;  %1876 = vmatprep.subr.bf16.mxu1 %v2103_v23  ;;  %v699_v45 = vsel %vm682_vm1, %v690_v41, %v698_v42  ;;  %v428_v11 = vrot.slane %v2266_v17, 1  ;;  %v955_v20 = vsel %vm952_vm3, %v953_v13, %v2370_v15  ;;  %v2144_v41 = vld [vmem:[%s2592_s1 + $0xb8] sm:$0xff]   ;;  %vm1471_vm3 = vsmask.f32 7950 }
  0x1d   : > { %1956 = vmatprep.subr.bf16.mxu0 %v2104_v26  ;;  %1960 = vmatprep.mubr.bf16.mxu0 %v699_v45  ;;  %v1082_v43 = vrot.slane %v1080_v37, 2  ;;  %v2156_v17 = vld [vmem:[%s2592_s1 + $0xd8] sm:$0xff]  }
  0x1e   : > { %v429_v19 = vsel %vm426_vm2, %v427_v10, %v428_v11  ;;  %v2171_v10 = vld [vmem:[%s2592_s1 + $0x220] sm:$0xff]   ;;  %v2174_v13 = vld [vmem:[%s2592_s1 + $0x238] sm:$0xff]   ;;  %vm1470_vm2 = vcmask 1043459  }
  0x1f   : > { %1877 = vmatpush3.bf16.msra.mxu1 %v2103_v23  ;;  %v2135_v23 = vld [vmem:[%s2592_s1 + $0x190] sm:$0xff]  }
  0x20   : > { %1957 = vmatpush3.bf16.msra.mxu0 %v2104_v26  ;;  %1878 = vmatprep.subr.bf16.mxu1 %v2105_v30  ;;  %v1630_v26 = vcombine.low %v2261_v14, %v532_v24  ;;  %v2138_v14 = vld [vmem:[%s2592_s1 + $0xa0] sm:$0xff]  }
  0x21   : > { %1958 = vmatprep.subr.bf16.mxu0 %v2106_v34 }
  0x22   : > { %v2396_v29 = vrot.slane %v1630_v26, 3 }
  0x23   : > { %1879 = vmatpush3.bf16.msra.mxu1 %v2105_v30  ;;  %v2139_v30 = vld [vmem:[%s2592_s1 + $0x1a0] sm:$0xff]  }
  0x24   : > { %1959 = vmatpush3.bf16.msra.mxu0 %v2106_v34  ;;  %1884 = vmatprep.subr.bf16.mxu1 %v2109_v44  ;;  %v559_v21 = vsel %vm556_vm4, %v557_v25, %v2396_v29  ;;  %v2414_v34 = vcombine.low %v2347_v1, %v1057_v32  ;;  %v2164_v1 = vld [vmem:[%s2592_s1 + $0xf8] sm:$0xff]  }
  0x25   : > { %1964 = vmatprep.subr.bf16.mxu0 %v2112_v46 }
  0x26   : > { %1881 = vmatmul.mubr.bf16.vlgmr.msra.gmra.mrb[0].mxu1 %v207_v47  ;;  %v1088_v39 = vshrl.u32 %v2414_v34, 16  ;;  %v1091_v40 = vshll.u32 %v2414_v34, 16  ;;  %v2147_v47 = vld [vmem:[%s2592_s1 + $0xc0] sm:$0xff]   ;;  %v1219_v6 = vrot.slane %v2414_v34, 3 }
  0x27   : > { %1885 = vmatpush3.bf16.msra.mxu1 %v2109_v44  ;;  %1961 = vmatmul.mubr.bf16.vlgmr.msra.gmra.mrb[0].mxu0 %v698_v42  ;;  %v2145_v42 = vld [vmem:[%s2592_s1 + $0x1b8] sm:$0xff]   ;;  %v1085_v44 = vrot.slane %v1083_v38, 3 }
  0x28   : > { %1965 = vmatpush3.bf16.msra.mxu0 %v2112_v46  ;;  %1886 = vmatprep.subr.bf16.mxu1 %v2113_v48  ;;  %v1090_v45 = vrot.slane %v1088_v39, 2  ;;  %v1093_v46 = vrot.slane %v1091_v40, 3 }
  0x29   : > { %1966 = vmatprep.subr.bf16.mxu0 %v2114_v49  ;;  %1900 = vmatprep.mubr.bf16.mxu1 %v1569_v16  ;;  %v2132_v16 = vld [vmem:[%s2592_s1 + $0x88] sm:$0xff]  }
  0x2a   : > { %1980 = vmatprep.mubr.bf16.mxu0 %v1680_v50  ;;  %v2438_v50 = vor.u32 %v1093_v46, %v1090_v45 }
  0x2b   : > { %1887 = vmatpush3.bf16.msra.mxu1 %v2113_v48  ;;  %v2151_v48 = vld [vmem:[%s2592_s1 + $0x1c0] sm:$0xff]  }
  0x2c   : > { %1967 = vmatpush3.bf16.msra.mxu0 %v2114_v49  ;;  %1888 = vmatprep.subr.bf16.mxu1 %v2115_v51  ;;  %v1086_v49 = vor.u32 %v1085_v44, %v1082_v43 }
  0x2d   : > { %1968 = vmatprep.subr.bf16.mxu0 %v2116_v52 }
  0x2f   : > { %1889 = vmatpush3.bf16.msra.mxu1 %v2115_v51  ;;  %v2152_v51 = vld [vmem:[%s2592_s1 + $0xc8] sm:$0xff]  }
  0x30   : > { %1969 = vmatpush3.bf16.msra.mxu0 %v2116_v52  ;;  %1890 = vmatprep.subr.bf16.mxu1 %v2117_v53  ;;  %v2153_v52 = vld [vmem:[%s2592_s1 + $0x1c8] sm:$0xff]  }
  0x31   : > { %1970 = vmatprep.subr.bf16.mxu0 %v2118_v54 }
  0x33   : > { %1891 = vmatpush3.bf16.msra.mxu1 %v2117_v53  ;;  %v1095_v53 = vsel %vm1078_vm5, %v1086_v49, %v2438_v50  ;;  %vm1435_vm5 = vsmask.f32 7440 }
  0x34   : > { %1971 = vmatpush3.bf16.msra.mxu0 %v2118_v54  ;;  %1892 = vmatprep.subr.bf16.mxu1 %v2119_v55  ;;  %v2154_v54 = vld [vmem:[%s2592_s1 + $0xd0] sm:$0xff]  }
  0x35   : > { %1972 = vmatprep.subr.bf16.mxu0 %v2120_v56 }
  0x37   : > { %1893 = vmatpush3.bf16.msra.mxu1 %v2119_v55  ;;  %v2155_v55 = vld [vmem:[%s2592_s1 + $0x1d0] sm:$0xff]  }
  0x38   : > { %1973 = vmatpush3.bf16.msra.mxu0 %v2120_v56  ;;  %1894 = vmatprep.subr.bf16.mxu1 %v2121_v57  ;;  %v2157_v56 = vld [vmem:[%s2592_s1 + $0x1d8] sm:$0xff]  }
  0x39   : > { %1974 = vmatprep.subr.bf16.mxu0 %v2122_v58 }
  0x3b   : > { %1895 = vmatpush3.bf16.msra.mxu1 %v2121_v57  ;;  %v2158_v57 = vld [vmem:[%s2592_s1 + $0xe0] sm:$0xff]  }
  0x3c   : > { %1975 = vmatpush3.bf16.msra.mxu0 %v2122_v58  ;;  %1896 = vmatprep.subr.bf16.mxu1 %v2123_v59  ;;  %v2159_v58 = vld [vmem:[%s2592_s1 + $0x1e0] sm:$0xff]  }
  0x3d   : > { %1976 = vmatprep.subr.bf16.mxu0 %v2124_v60 }
  0x3f   : > { %1897 = vmatpush3.bf16.msra.mxu1 %v2123_v59  ;;  %v2160_v59 = vld [vmem:[%s2592_s1 + $0xe8] sm:$0xff]  }
  0x40   : > { %1977 = vmatpush3.bf16.msra.mxu0 %v2124_v60  ;;  %1898 = vmatprep.subr.bf16.mxu1 %v2125_v61  ;;  %v2161_v60 = vld [vmem:[%s2592_s1 + $0x1e8] sm:$0xff]  }
  0x41   : > { %1978 = vmatprep.subr.bf16.mxu0 %v2126_v3 }
  0x43   : > { %1899 = vmatpush3.bf16.msra.mxu1 %v2125_v61  ;;  %v2162_v61 = vld [vmem:[%s2592_s1 + $0xf0] sm:$0xff]  }
  0x44   : > { %1979 = vmatpush3.bf16.msra.mxu0 %v2126_v3  ;;  %1904 = vmatprep.subr.bf16.mxu1 %v2127_v7  ;;  %v1757_v3 = vcombine.low %v1197_v63, %v2344_v0 }
  0x45   : > { %1984 = vmatprep.subr.bf16.mxu0 %v2129_v8 }
  0x46   : > { %1901 = vmatmul.mubr.bf16.vlgmr.msra.gmra.mrb[0].mxu1 %v1579_v9  ;;  %v1218_v5 = vrot.slane %v1757_v3, 3  ;;  %v2170_v9 = vld [vmem:[%s2592_s1 + $0x218] sm:$0xff]  }
  0x47   : > { %1905 = vmatpush3.bf16.msra.mxu1 %v2127_v7  ;;  %1981 = vmatmul.mubr.bf16.vlgmr.msra.gmra.mrb[0].mxu0 %v1681_v12  ;;  %v2168_v7 = vld [vmem:[%s2592_s1 + $0x208] sm:$0xff]   ;;  %v2173_v12 = vld [vmem:[%s2592_s1 + $0x230] sm:$0xff]  }
  0x48   : > { %1985 = vmatpush3.bf16.msra.mxu0 %v2129_v8  ;;  %1906 = vmatprep.subr.bf16.mxu1 %v2132_v16  ;;  %v1220_v0 = vsel %vm556_vm4, %v1218_v5, %v1219_v6  ;;  %v2169_v8 = vld [vmem:[%s2592_s1 + $0x210] sm:$0xff]   ;;  %vm1434_vm4 = vsmask.f32 3328 }
  0x49   : > { %1986 = vmatprep.subr.bf16.mxu0 %v2133_v18  ;;  %1920 = vmatprep.mubr.bf16.mxu1 %v429_v19 }
  0x4a   : > { %2000 = vmatprep.mubr.bf16.mxu0 %v955_v20 }
  0x4b   : > { %1907 = vmatpush3.bf16.msra.mxu1 %v2132_v16  ;;  %v1322_v16 = vlaneseq }
  0x4c   : > { %1987 = vmatpush3.bf16.msra.mxu0 %v2133_v18  ;;  %1908 = vmatprep.subr.bf16.mxu1 %v2134_v22 }
  0x4d   : > { %1988 = vmatprep.subr.bf16.mxu0 %v2135_v23  ;;  %v1323_v20 = vshrl.u32 %v1322_v16, 7 }
  0x4f   : > { %1909 = vmatpush3.bf16.msra.mxu1 %v2134_v22  ;;  %v1324_v24 = vadd.s32 8, %v1323_v20  ;;  %v1325_v25 = vadd.s32 16, %v1323_v20 }
  0x50   : > { %1989 = vmatpush3.bf16.msra.mxu0 %v2135_v23  ;;  %1910 = vmatprep.subr.bf16.mxu1 %v2136_v27 }
  0x51   : > { %1990 = vmatprep.subr.bf16.mxu0 %v2137_v28 }
  0x53   : > { %1911 = vmatpush3.bf16.msra.mxu1 %v2136_v27  ;;  %v2525_v26 = vmul.u32.u64.low 2863311531, %v1323_v20  ;;  %v2526_v27 = vmul.u32.u64.high 2863311531, %v1323_v20, %v2525_v26 }
  0x54   : > { %1991 = vmatpush3.bf16.msra.mxu0 %v2137_v28  ;;  %1912 = vmatprep.subr.bf16.mxu1 %v2138_v14 }
  0x55   : > { %1992 = vmatprep.subr.bf16.mxu0 %v2139_v30 }
  0x57   : > { %1913 = vmatpush3.bf16.msra.mxu1 %v2138_v14 }
  0x58   : > { %1993 = vmatpush3.bf16.msra.mxu0 %v2139_v30  ;;  %1914 = vmatprep.subr.bf16.mxu1 %v2140_v31  ;;  %v1332_v30 = vshrl.u32 %v2526_v27, 2 }
  0x59   : > { %1994 = vmatprep.subr.bf16.mxu0 %v2141_v33 }
  0x5b   : > { %1915 = vmatpush3.bf16.msra.mxu1 %v2140_v31 }
  0x5c   : > { %1995 = vmatpush3.bf16.msra.mxu0 %v2141_v33  ;;  %1916 = vmatprep.subr.bf16.mxu1 %v2142_v35  ;;  %v1333_v33 = vmul.u32 6, %v1332_v30 }
  0x5d   : > { %1996 = vmatprep.subr.bf16.mxu0 %v2143_v36 }
  0x5f   : > { %1917 = vmatpush3.bf16.msra.mxu1 %v2142_v35 }
  0x60   : > { %1997 = vmatpush3.bf16.msra.mxu0 %v2143_v36  ;;  %1918 = vmatprep.subr.bf16.mxu1 %v2144_v41  ;;  %v1334_v36 = vsub.s32 %v1323_v20, %v1333_v33 }
  0x61   : > { %1998 = vmatprep.subr.bf16.mxu0 %v2145_v42 }
  0x62   : > { %vm1359_vm6 = vcmp.ne.s32.totalorder %v1334_v36, 0  ;;  %vm1362_vm7 = vcmp.lt.s32.totalorder %v1334_v36, 0  ;;  %v1368_v39 = vadd.s32 6, %v1334_v36 }
  0x63   : > { %1919 = vmatpush3.bf16.msra.mxu1 %v2144_v41  ;;  %vm1365_vm12 = vmand %vm1362_vm7, %vm1359_vm6  ;;  %vm1478_vm7 = vcmask 1043456  }
  0x64   : > { %1999 = vmatpush3.bf16.msra.mxu0 %v2145_v42  ;;  %1924 = vmatprep.subr.bf16.mxu1 %v2147_v47  ;;  %v1371_v43 = vsel %vm1365_vm12, %v1368_v39, %v1334_v36  ;;  %vm2567_vm6 = vmand %vm1470_vm2, %vm1471_vm3 }
  0x65   : > { %2004 = vmatprep.subr.bf16.mxu0 %v2151_v48  ;;  %vm2537_vm15 = vcmp.lt.s32.totalorder %v1371_v43, 4 }
  0x66   : > { %1921 = vmatmul.mubr.bf16.vlgmr.msra.gmra.mrb[0].mxu1 %v428_v11  ;;  %v2172_v11 = vld [vmem:[%s2592_s1 + $0x228] sm:$0xff]  }
  0x67   : > { %1925 = vmatpush3.bf16.msra.mxu1 %v2147_v47  ;;  %2001 = vmatmul.mubr.bf16.vlgmr.msra.gmra.mrb[0].mxu0 %v2370_v15  ;;  %v2186_v15 = vmov 0  }
  0x68   : > { %2005 = vmatpush3.bf16.msra.mxu0 %v2151_v48  ;;  %1926 = vmatprep.subr.bf16.mxu1 %v2152_v51  ;;  %1489 = vst [vmem:[%s2521_s14 + $0x10] sm:$0xf] %v2186_v15  ;;  %1490 = vst [vmem:[%s2521_s14 + $0x14] sm:$0x1] %v2186_v15 }
  0x69   : > { %2006 = vmatprep.subr.bf16.mxu0 %v2153_v52  ;;  %1940 = vmatprep.mubr.bf16.mxu1 %v559_v21  ;;  %v2531_v21 = vmul.u32.u64.low 2863311531, %v1325_v25  ;;  %v2532_v14 = vmul.u32.u64.high 2863311531, %v1325_v25, %v2531_v21 }
  0x6a   : > { %2020 = vmatprep.mubr.bf16.mxu0 %v1095_v53 }
  0x6b   : > { %1927 = vmatpush3.bf16.msra.mxu1 %v2152_v51  ;;  %v1354_v32 = vshrl.u32 %v2532_v14, 2 }
  0x6c   : > { %2007 = vmatpush3.bf16.msra.mxu0 %v2153_v52  ;;  %1928 = vmatprep.subr.bf16.mxu1 %v2154_v54 }
  0x6d   : > { %2008 = vmatprep.subr.bf16.mxu0 %v2155_v55  ;;  %v1355_v35 = vmul.u32 6, %v1354_v32 }
  0x6f   : > { %1929 = vmatpush3.bf16.msra.mxu1 %v2154_v54  ;;  %v1356_v38 = vsub.s32 %v1325_v25, %v1355_v35 }
  0x70   : > { %2009 = vmatpush3.bf16.msra.mxu0 %v2155_v55  ;;  %1930 = vmatprep.subr.bf16.mxu1 %v2156_v17 }
  0x71   : > { %2010 = vmatprep.subr.bf16.mxu0 %v2157_v56  ;;  %vm1361_vm10 = vcmp.ne.s32.totalorder %v1356_v38, 0  ;;  %vm1364_vm11 = vcmp.lt.s32.totalorder %v1356_v38, 0  ;;  %v1370_v41 = vadd.s32 6, %v1356_v38 }
  0x72   : > { %vm1367_vm14 = vmand %vm1364_vm11, %vm1361_vm10 }
  0x73   : > { %1931 = vmatpush3.bf16.msra.mxu1 %v2156_v17  ;;  %v1373_v47 = vsel %vm1367_vm14, %v1370_v41, %v1356_v38 }
  0x74   : > { %2011 = vmatpush3.bf16.msra.mxu0 %v2157_v56  ;;  %1932 = vmatprep.subr.bf16.mxu1 %v2158_v57  ;;  %vm2545_vm1 = vcmp.lt.s32.totalorder %v1373_v47, 4 }
  0x75   : > { %2012 = vmatprep.subr.bf16.mxu0 %v2159_v58 }
  0x77   : > { %1933 = vmatpush3.bf16.msra.mxu1 %v2158_v57 }
  0x78   : > { %2013 = vmatpush3.bf16.msra.mxu0 %v2159_v58  ;;  %1934 = vmatprep.subr.bf16.mxu1 %v2160_v59 }
  0x79   : > { %2014 = vmatprep.subr.bf16.mxu0 %v2161_v60 }
  0x7b   : > { %1935 = vmatpush3.bf16.msra.mxu1 %v2160_v59 }
  0x7c   : > { %2015 = vmatpush3.bf16.msra.mxu0 %v2161_v60  ;;  %1936 = vmatprep.subr.bf16.mxu1 %v2162_v61 }
  0x7d   : > { %2016 = vmatprep.subr.bf16.mxu0 %v2163_v62 }
  0x7f   : > { %1937 = vmatpush3.bf16.msra.mxu1 %v2162_v61 }
  0x80   : > { %2017 = vmatpush3.bf16.msra.mxu0 %v2163_v62  ;;  %1938 = vmatprep.subr.bf16.mxu1 %v2164_v1 }
  0x81   : > { %2018 = vmatprep.subr.bf16.mxu0 %v2165_v2 }
  0x83   : > { %1939 = vmatpush3.bf16.msra.mxu1 %v2164_v1 }
  0x84   : > { %2019 = vmatpush3.bf16.msra.mxu0 %v2165_v2 }
  0x85   : > { %2024 = vmatprep.subr.bf16.mxu0 %v2167_v4 }
  0x86   : > { %1941 = vmatmul.mubr.bf16.vlgmr.msra.gmra.mrb[0].mxu1 %v2396_v29  ;;  %v2528_v28 = vmul.u32.u64.low 2863311531, %v1324_v24  ;;  %v2529_v29 = vmul.u32.u64.high 2863311531, %v1324_v24, %v2528_v28 }
  0x87   : > { %2021 = vmatmul.mubr.bf16.vlgmr.msra.gmra.mrb[0].mxu0 %v2438_v50 }
  0x88   : > { %2025 = vmatpush3.bf16.msra.mxu0 %v2167_v4  ;;  %2040 = vmatprep.mubr.bf16.mxu0 %v1220_v0  ;;  %v1343_v31 = vshrl.u32 %v2529_v29, 2 }
  0x89   : > { %2026 = vmatprep.subr.bf16.mxu0 %v2168_v7 }
  0x8a   : > { %v1344_v34 = vmul.u32 6, %v1343_v31 }
  0x8c   : > { %2027 = vmatpush3.bf16.msra.mxu0 %v2168_v7  ;;  %v1345_v37 = vsub.s32 %v1324_v24, %v1344_v34 }
  0x8d   : > { %2028 = vmatprep.subr.bf16.mxu0 %v2169_v8 }
  0x8e   : > { %vm1360_vm8 = vcmp.ne.s32.totalorder %v1345_v37, 0  ;;  %vm1363_vm9 = vcmp.lt.s32.totalorder %v1345_v37, 0  ;;  %v1369_v40 = vadd.s32 6, %v1345_v37 }
  0x8f   : > { %vm1366_vm13 = vmand %vm1363_vm9, %vm1360_vm8 }
  0x90   : > { %2029 = vmatpush3.bf16.msra.mxu0 %v2169_v8  ;;  %v1372_v44 = vsel %vm1366_vm13, %v1369_v40, %v1345_v37  ;;  %vm1436_vm8 = vmor %vm1434_vm4, %vm1435_vm5 }
  0x91   : > { %2030 = vmatprep.subr.bf16.mxu0 %v2170_v9  ;;  %vm2541_vm0 = vcmp.lt.s32.totalorder %v1372_v44, 4  ;;  %vm1479_vm9 = vmand %vm1478_vm7, %vm1434_vm4 }
  0x94   : > { %2031 = vmatpush3.bf16.msra.mxu0 %v2170_v9 }
  0x95   : > { %2032 = vmatprep.subr.bf16.mxu0 %v2171_v10 }
  0x98   : > { %2033 = vmatpush3.bf16.msra.mxu0 %v2171_v10 }
  0x99   : > { %2034 = vmatprep.subr.bf16.mxu0 %v2172_v11 }
  0x9c   : > { %2035 = vmatpush3.bf16.msra.mxu0 %v2172_v11 }
  0x9d   : > { %2036 = vmatprep.subr.bf16.mxu0 %v2173_v12 }
  0xa0   : > { %2037 = vmatpush3.bf16.msra.mxu0 %v2173_v12 }
  0xa1   : > { %2038 = vmatprep.subr.bf16.mxu0 %v2174_v13 }
  0xa4   : > { %2039 = vmatpush3.bf16.msra.mxu0 %v2174_v13 }
  0xa7   : > { %2041 = vmatmul.mubr.bf16.vlgmr.msra.gmra.mrb[0].mxu0 %v1219_v6 }
 0x159   : > { %v1942_v18 = vpop.f32.mrb[0].mxu1 }
 0x15a   : > { %v644_v19 = vpop.f32.mrb[1].mxu1 }
 0x15b   : > { %v1943_v22 = vpop.f32.mrb[2].mxu1 }
 0x15c   : > { %v647_v23 = vpop.f32.mrb[3].mxu1 }
 0x17a   : > { %v2042_v42 = vpop.f32.mrb[0].mxu0 }
 0x17b   : > { %v2044_v45 = vadd.f32 %v2042_v42, %v1942_v18  ;;  %v1305_v46 = vpop.f32.mrb[1].mxu0  ;;  %v1473_v42 = vld [vmem:[%s2521_s14] sm:$0x8] }
 0x17c   : > { %v2045_v48 = vadd.f32 %v1305_v46, %v644_v19  ;;  %v2043_v49 = vpop.f32.mrb[2].mxu0 }
 0x17d   : > { %v1308_v51 = vpop.f32.mrb[3].mxu0  ;;  %v1385_v57 = vsel %vm2545_vm1, %v2044_v45, 0.0 }
 0x17e   : > { %v2046_v53 = vadd.f32 %v1308_v51, %v647_v23  ;;  %v1383_v55 = vsel %vm2537_vm15, %v2045_v48, 0.0 }
 0x180   : > { %v1384_v17 = vsel %vm2541_vm0, %v2046_v53, 0.0 }
 0x181   : > { %v1386_v56 = vadd.f32 %v1384_v17, %v1383_v55  ;;  %v1480_v55 = vld [vmem:[%s2521_s14 + $0xc] sm:$0xf] }
 0x183   : > { %v1387_v58 = vadd.f32 %v1386_v56, %v1385_v57 }
 0x185   : > { %v1388_v59 = vrot.slane %v1387_v58, 4 }
 0x187   : > { %v1389_v60 = vadd.f32 %v1388_v59, %v1387_v58 }
 0x189   : > { %v1390_v61 = vrot.slane %v1389_v60, 2 }
 0x18b   : > { %v1391_v62 = vadd.f32 %v1390_v61, %v1389_v60 }
 0x18d   : > { %v1392_v63 = vrot.slane %v1391_v62, 1 }
 0x18f   : > { %v1393_v1 = vadd.f32 %v1392_v63, %v1391_v62 }
 0x191   : > { %v1394_v2 = vmul.f32 0.0625, %v1393_v1 }
 0x193   : > { %v1395_v3 = vsub.f32 %v2045_v48, %v1394_v2  ;;  %v1396_v4 = vsub.f32 %v2046_v53, %v1394_v2  ;;  %v1397_v5 = vsub.f32 %v2044_v45, %v1394_v2 }
 0x195   : > { %v1398_v6 = vmul.f32 %v1395_v3, %v1395_v3  ;;  %v1399_v7 = vmul.f32 %v1396_v4, %v1396_v4  ;;  %v1400_v0 = vmul.f32 %v1397_v5, %v1397_v5 }
 0x197   : > { %v1401_v8 = vsel %vm2537_vm15, %v1398_v6, 0.0  ;;  %v1402_v9 = vsel %vm2541_vm0, %v1399_v7, 0.0  ;;  %v1403_v11 = vsel %vm2545_vm1, %v1400_v0, 0.0 }
 0x198   : > { %v1404_v10 = vadd.f32 %v1402_v9, %v1401_v8 }
 0x19a   : > { %v1405_v12 = vadd.f32 %v1404_v10, %v1403_v11 }
 0x19c   : > { %v1406_v13 = vrot.slane %v1405_v12, 4 }
 0x19e   : > { %v1407_v15 = vadd.f32 %v1406_v13, %v1405_v12 }
 0x1a0   : > { %v1408_v16 = vrot.slane %v1407_v15, 2 }
 0x1a2   : > { %v1409_v18 = vadd.f32 %v1408_v16, %v1407_v15 }
 0x1a4   : > { %v1410_v19 = vrot.slane %v1409_v18, 1 }
 0x1a6   : > { %v1411_v20 = vadd.f32 %v1410_v19, %v1409_v18 }
 0x1a8   : > { %v1412_v22 = vmul.f32 0.0625, %v1411_v20 }
 0x1aa   : > { %v1413_v23 = vadd.f32 1e-05, %v1412_v22 }
 0x1ac   : > { %2176 = vrsqrt.f32 %v1413_v23 }
 0x1b6   : > { %v2177_v24 = vpop.eup %2176 }
 0x1b7   : > { %v1415_v25 = vmul.f32 %v2177_v24, %v1395_v3  ;;  %v1416_v26 = vmul.f32 %v2177_v24, %v1396_v4  ;;  %v1417_v27 = vmul.f32 %v2177_v24, %v1397_v5 }
 0x1b9   : > { %v1418_v28 = vmax.f32 %v1415_v25, 0.0  ;;  %v1419_v29 = vmax.f32 %v1416_v26, 0.0  ;;  %v1420_v21 = vmax.f32 %v1417_v27, 0.0 }
 0x1bb   : > { %v1421_v14 = vsel %vm2537_vm15, %v1418_v28, 0.0  ;;  %v1422_v30 = vsel %vm2541_vm0, %v1419_v29, 0.0  ;;  %v1423_v31 = vsel %vm2545_vm1, %v1420_v21, 0.0 }
 0x1bc   : > { %v1771_v32 = vpack.c.bf16 %v1421_v14, %v1421_v14  ;;  %v1772_v33 = vpack.c.bf16 %v1422_v30, %v1422_v30  ;;  %v1773_v34 = vpack.c.bf16 %v1423_v31, %v1423_v31 }
 0x1be   : > { %v1438_v35 = vshll.u32 %v1771_v32, 16  ;;  %v1441_v36 = vshrl.u32 %v1771_v32, 16  ;;  %v1447_v37 = vshll.u32 %v1772_v33, 16  ;;  %v1451_v38 = vshrl.u32 %v1772_v33, 16 }
 0x1bf   : > { %v1457_v39 = vshll.u32 %v1773_v34, 16  ;;  %v1461_v40 = vshrl.u32 %v1773_v34, 16 }
 0x1c0   : > { %v1440_v43 = vrot.slane %v1438_v35, 5  ;;  %v1443_v44 = vrot.slane %v1441_v36, 4  ;;  %v1449_v45 = vrot.slane %v1447_v37, 5  ;;  %v1453_v46 = vrot.slane %v1451_v38, 4 }
 0x1c1   : > { %v1459_v47 = vrot.slane %v1457_v39, 5  ;;  %v1463_v48 = vrot.slane %v1461_v40, 4 }
 0x1c2   : > { %v1444_v49 = vor.u32 %v1443_v44, %v1440_v43  ;;  %v1454_v50 = vor.u32 %v1453_v46, %v1449_v45  ;;  %v1474_v51 = vsel %vm2567_vm6, %v1440_v43, %v1473_v42 }
 0x1c3   : > { %v1464_v52 = vor.u32 %v1463_v48, %v1459_v47  ;;  %1475 = vst [vmem:[%s2521_s14] sm:$0x8] %v1474_v51 }
 0x1c4   : > { %v1445_v53 = vrot.slane %v1444_v49, 4  ;;  %v1455_v54 = vrot.slane %v1454_v50, 4 }
 0x1c5   : > { %v1465_v17 = vrot.slane %v1464_v52, 4 }
 0x1c6   : > { %v1450_v56 = vsel %vm1436_vm8, %v1445_v53, %v1449_v45  ;;  %v1460_v57 = vsel %vm1436_vm8, %v1455_v54, %v1459_v47 }
 0x1c7   : > { %1476 = vst [vmem:[%s2521_s14 + $0x4] sm:$0xf] %v1450_v56  ;;  %1477 = vst [vmem:[%s2521_s14 + $0x8] sm:$0xf] %v1460_v57  ;;  %v1481_v58 = vsel %vm1479_vm9, %v1465_v17, %v1480_v55 }
 0x1c8   : > { %1482 = vst [vmem:[%s2521_s14 + $0xc] sm:$0xf] %v1481_v58 }
 0x1ca   : > { %v1483_v59 = vld [vmem:[%s2521_s14] sm:$0xf] }
 0x1cb   : > { %v1484_v60 = vsel %vm1479_vm9, 0, %v1483_v59 }
 0x1cc   : > { %1485 = vst [vmem:[%s2521_s14] sm:$0xf] %v1484_v60 }
 0x1cf   : > { %v1486_v61 = vld [vmem:[%s2521_s14 + $0xc] sm:$0x8] }
 0x1d0   : > { %v1487_v62 = vsel %vm2567_vm6, 0, %v1486_v61 }
 0x1d1   : > { %1488 = vst [vmem:[%s2521_s14 + $0xc] sm:$0x8] %v1487_v62 }
 0x1d2 PF: > { %s12_s9 = sadd.s32 1, %s2184_s9  }
 0x1d3   : > { %p9_p4 = scmp.ge.s32.totalorder %s12_s9, 4  }
 0x1d5   :  { %11 = sbr.rel (!%p9_p4) target bundleno = 1 (0x1), region = 66 }

// kernel: encoder_forward.7
= control target key start
LH: loop header
LB: loop body
LE: loop exit
PB: predicated region body
PF: predicated region fallthrough
CT: control target
= control target key end

     0   :  { %s3687_s15 = smov 0   ;;  %s4580_s0 = inlined_call_operand.vmem [shape: bf16[2,42,56], index: 0, kind: input, shape index: {}]   ;;  %s4581_s1 = inlined_call_operand.vmem [shape: bf16[2,42,160], index: 1, kind: input, shape index: {}]   ;;  %s4582_s2 = inlined_call_operand.vmem [shape: bf16[9,56,128], index: 2, kind: input, shape index: {}]   ;;  %s4583_s3 = inlined_call_operand.vmem [shape: bf16[9,160,128], index: 3, kind: input, shape index: {}]   ;;  %s4584_s4 = inlined_call_operand.vmem [shape: bf16[2,42,128], index: 4, kind: output, shape index: {}]  }
   0x1 LB: > { %s2861_s16 = sadd.s32 4294967295, %s3659_s15   ;;  %p2865_p0 = scmp.ge.s32.totalorder %s3659_s15, 1  ;;  %s3659_s15 = sphi %s3687_s15, %s14_s15  }
   0x2   : > { %p172_p1 = scmp.lt.s32.totalorder %s3659_s15, 3 }
   0x4   : > { %p173_p2 = pnand %p2865_p0, %p172_p1 }
   0x5   : > { %v3485_v0 = vld [vmem:[%s4583_s3] sm:$0xff] (!%p173_p2)   ;;  %v3661_v1 = vmov (!%p173_p2), 0   ;;  %v3487_v3 = vld [vmem:[%s4583_s3 + $0x8] sm:$0xff] (!%p173_p2)   ;;  %p203_p3 = scmp.lt.s32.totalorder (!%p173_p2), %s2861_s16, 1  ;;  %v3490_v5 = vld [vmem:[%s4582_s2 + $0x10] sm:$0xff] (!%p173_p2)   ;;  %vm411_vm0 = vcmask (!%p173_p2), 457728  }
   0x6   : > { %176 = sbr.rel (%p173_p2) target bundleno = 564 (0x234), region = 36  ;;  %334 = vmatprep.subr.bf16.mxu0 (!%p173_p2), %v3661_v1  ;;  %v3486_v2 = vld [vmem:[%s4582_s2] sm:$0xff] (!%p173_p2)   ;;  %v3488_v4 = vld [vmem:[%s4582_s2 + $0x8] sm:$0xff] (!%p173_p2)   ;;  %v3489_v6 = vld [vmem:[%s4583_s3 + $0x10] sm:$0xff] (!%p173_p2)   ;;  %vm418_vm1 = vcmask (!%p173_p2), 1043456   ;;  %vm327_vm3 = vcmask (!%p173_p2), 261120  }
   0x7   : > { %335 = vmatpush1.bf16.msra.mxu0 (!%p173_p2), %v3485_v0  ;;  %3351 = vmatprep.subr.bf16.mxu1 (!%p173_p2), %v3486_v2  ;;  %v3492_v7 = vld [vmem:[%s4582_s2 + $0x18] ss:$0 sps:$4 sm:$0xff] (!%p173_p2)   ;;  %v3496_v11 = vld [vmem:[%s4582_s2 + $0x1c] sm:$0xff] (!%p173_p2)   ;;  %v3498_v14 = vld [vmem:[%s4582_s2 + $0x24] sm:$0xff] (!%p173_p2)   ;;  %vm492_vm2 = vsmask.f32 (!%p173_p2), 7424 }
   0x8   : > { %336 = vmatprep.subr.bf16.mxu0 (!%p173_p2), %v3661_v1  ;;  %3352 = vmatpush3.bf16.msra.mxu1 (!%p173_p2), %v3486_v2  ;;  %v3491_v9 = vld [vmem:[%s4583_s3 + $0x18] sm:$0xff] (!%p173_p2)   ;;  %v420_v10 = vsel (!%p173_p2), %vm418_vm1, %v3492_v7, 0  ;;  %v3494_v12 = vld [vmem:[%s4583_s3 + $0x20] sm:$0xff] (!%p173_p2)   ;;  %v3497_v18 = vld [vmem:[%s4583_s3 + $0x28] sm:$0xff] (!%p173_p2)   ;;  %vm791_vm4 = vcmask (!%p173_p2), 1046528   ;;  %vm1044_vm5 = vcmask (!%p173_p2), 1044480  }
   0x9   : > { %3353 = vmatprep.subr.bf16.mxu1 (!%p173_p2), %v3488_v4  ;;  %v3500_v25 = vld [vmem:[%s4582_s2 + $0x2c] sm:$0xff] (!%p173_p2)   ;;  %v3502_v34 = vld [vmem:[%s4582_s2 + $0x34] ss:$0 sps:$4 sm:$0xff] (!%p173_p2)   ;;  %v3501_v35 = vld [vmem:[%s4583_s3 + $0x38] sm:$0xff] (!%p173_p2)   ;;  %vm1299_vm6 = vsmask.f32 (!%p173_p2), 4352 }
   0xa   : > { %v3499_v27 = vld [vmem:[%s4583_s3 + $0x30] sm:$0xff] (!%p173_p2)   ;;  %v536_v38 = vsel (!%p173_p2), %vm418_vm1, %v3502_v34, 0  ;;  %v3505_v39 = vld [vmem:[%s4583_s3 + $0x40] sm:$0xff] (!%p173_p2)   ;;  %v3507_v42 = vld [vmem:[%s4583_s3 + $0x48] sm:$0xff] (!%p173_p2)   ;;  %vm1835_vm7 = vcmask (!%p173_p2), 1045504  }
   0xb   : > { %337 = vmatpush1.bf16.msra.mxu0 (!%p173_p2), %v3487_v3  ;;  %v3506_v41 = vld [vmem:[%s4583_s3 + $0x50] sm:$0xff] (!%p173_p2)   ;;  %v3508_v43 = vld [vmem:[%s4583_s3 + $0x58] sm:$0xff] (!%p173_p2)   ;;  %v3512_v49 = vld [vmem:[%s4583_s3 + $0x60] sm:$0xff] (!%p173_p2)   ;;  %vm2098_vm8 = vsmask.f32 (!%p173_p2), 5376 }
   0xc   : > { %338 = vmatprep.subr.bf16.mxu0 (!%p173_p2), %v3661_v1  ;;  %3354 = vmatpush3.bf16.msra.mxu1 (!%p173_p2), %v3488_v4  ;;  %v3511_v44 = vld [vmem:[%s4582_s2 + $0x38] sm:$0xff] (!%p173_p2)   ;;  %v3513_v50 = vld [vmem:[%s4582_s2 + $0x40] sm:$0xff] (!%p173_p2)   ;;  %v3517_v57 = vld [vmem:[%s4582_s2 + $0x48] sm:$0xff] (!%p173_p2)  }
   0xd   : > { %s4598_s16 = smov (!%p203_p3, %s2861_s16), 1  ;;  %3355 = vmatprep.subr.bf16.mxu1 %v3490_v5  ;;  %v3514_v62 = vld [vmem:[%s4583_s3 + $0x68] sm:$0xff]   ;;  %v3519_v2 = vld [vmem:[%s4582_s2 + $0x50] ss:$0 sps:$4 sm:$0xff]  }
   0xe   : > { %s3468_s29 = smul.u32 24, %s4598_s16 }
   0xf   : > { %339 = vmatpush1.bf16.msra.mxu0 %v3489_v6  ;;  %s3469_s19 = smul.u32 48, %s4598_s16  ;;  %v823_v6 = vsel %vm418_vm1, %v3519_v2, 0 }
  0x10   : > { %s3727_s8 = scalar_lea.vmem %s4580_s0, %s3468_s29  ;;  %340 = vmatprep.subr.bf16.mxu0 %v3661_v1  ;;  %3356 = vmatpush3.bf16.msra.mxu1 %v3490_v5  ;;  %v3518_v5 = vld [vmem:[%s4583_s3 + $0x70] sm:$0xff]   ;;  %s4496_s17 = scalar_lea.vmem %s4584_s4, %s3468_s29 }
  0x11   : > { %v3493_v8 = vld [vmem:[%s3727_s8] sm:$0xff]   ;;  %3459 = vmatprep.subr.msk.bf16.mxu1 %vm418_vm1, %v3492_v7  ;;  %v3495_v13 = vld [vmem:[%s3727_s8 + $0x8] ss:$0 sps:$4 sm:$0xff]   ;;  %v473_v19 = vld [vmem:[%s3727_s8 + $0xc] sm:$0x1]  ;;  %s3771_s24 = scalar_lea.vmem %s4581_s1, %s3469_s19 }
  0x12   : > { %3359 = vmatprep.mubr.msk.bf16.mxu1 %vm411_vm0, %v3493_v8  ;;  %v470_v15 = vld [vmem:[%s3727_s8] sm:$0xf]  ;;  %v3751_v16 = vld [vmem:[%s3727_s8 + $0x4] sm:$0xf]  ;;  %v3754_v17 = vld [vmem:[%s3727_s8 + $0x8] sm:$0xf] }
  0x13   : > { %341 = vmatpush1.bf16.msra.mxu0 %v3491_v9  ;;  %v2900_v20 = vcombine.low %v470_v15, %v3751_v16  ;;  %v3098_v21 = vcombine.low %v3751_v16, %v3754_v17  ;;  %v3766_v22 = vcombine.low %v3754_v17, %v473_v19  ;;  %v229_v30 = vld [vmem:[%s3771_s24] sm:$0xff]  ;;  %v3783_v31 = vld [vmem:[%s3771_s24 + $0x8] sm:$0xff]  ;;  %v3819_v45 = vld [vmem:[%s3771_s24 + $0x10] sm:$0xff]  ;;  %2792 = vst [vmem:[%s4496_s17 + $0x10] sm:$0xf] %v3661_v1 }
  0x14   : > { %342 = vmatprep.subr.bf16.mxu0 %v3661_v1  ;;  %3358 = vmatpush3.bf16.msra.mxu1 %v420_v10  ;;  %v2870_v33 = vcombine.high %v229_v30, %v3783_v31  ;;  %v779_v47 = vld [vmem:[%s3727_s8] sm:$0xe]  ;;  %v3824_v48 = vcombine.low %v229_v30, %v3783_v31  ;;  %v2872_v51 = vcombine.high %v3819_v45, %v3819_v45  ;;  %v592_v55 = vld [vmem:[%s3771_s24 + $0x18] sm:$0x11] }
  0x15   : > { %3363 = vmatprep.subr.bf16.mxu1 %v3496_v11  ;;  %v494_v23 = vshrl.u32 %v2900_v20, 16  ;;  %v496_v24 = vshll.u32 %v2900_v20, 16  ;;  %v501_v26 = vshll.u32 %v3766_v22, 16  ;;  %v505_v37 = vshrl.u32 %v3766_v22, 16  ;;  %v3520_v7 = vld [vmem:[%s4583_s3 + $0x78] sm:$0xff]   ;;  %v3522_v9 = vld [vmem:[%s4583_s3 + $0xa0] sm:$0xff]  }
  0x16   : > { %2883 = vmatprep.mubr.msk.bf16.mxu0 %vm327_vm3, %v2870_v33  ;;  %v645_v46 = vshll.u32 %v2870_v33, 16  ;;  %v2951_v52 = vcombine.low %v779_v47, %v3751_v16  ;;  %v643_v53 = vshrl.u32 %v2870_v33, 16  ;;  %v3839_v56 = vcombine.high %v3819_v45, %v592_v55  ;;  %v3874_v8 = vld [vmem:[%s3771_s24] sm:$0xee]  ;;  %v3529_v30 = vld [vmem:[%s4583_s3 + $0x98] sm:$0xff]  }
  0x17   : > { %343 = vmatpush1.bf16.msra.mxu0 %v3494_v12  ;;  %3360 = vmatmul.mubr.msk.bf16.vlgmr.msra.gmra.mrb[0].mxu1 %vm411_vm0, %v3495_v13  ;;  %v498_v28 = vrot.slane %v496_v24, 1  ;;  %v503_v29 = vrot.slane %v501_v26, 1  ;;  %v793_v59 = vrot.slane %v3766_v22, 1  ;;  %v2871_v63 = vcombine.low %v3819_v45, %v3819_v45  ;;  %v3523_v12 = vld [vmem:[%s4583_s3 + $0x80] sm:$0xff]   ;;  %v3525_v22 = vld [vmem:[%s4583_s3 + $0x88] sm:$0xff]   ;;  %v3526_v24 = vld [vmem:[%s4583_s3 + $0xb0] sm:$0xff]  }
  0x18   : > { %344 = vmatprep.subr.bf16.mxu0 %v3661_v1  ;;  %3364 = vmatpush3.bf16.msra.mxu1 %v3496_v11  ;;  %v647_v54 = vrot.slane %v645_v46, 1  ;;  %v792_v58 = vrot.slane %v2951_v52, 1  ;;  %v650_v61 = vshll.u32 %v3839_v56, 16  ;;  %v2979_v10 = vcombine.high %v3874_v8, %v3783_v31  ;;  %v3527_v26 = vld [vmem:[%s4583_s3 + $0x90] sm:$0xff]   ;;  %v3535_v47 = vld [vmem:[%s4582_s2 + $0x5c] sm:$0xff]  }
  0x19   : > { %3365 = vmatprep.subr.bf16.mxu1 %v3498_v14  ;;  %v499_v32 = vor.u32 %v498_v28, %v494_v23  ;;  %v507_v40 = vor.u32 %v505_v37, %v503_v29  ;;  %v907_v11 = vrot.slane %v3839_v56, 1  ;;  %v3126_v15 = vcombine.low %v3783_v31, %v3819_v45  ;;  %v1028_v37 = vld [vmem:[%s3727_s8] sm:$0x8]  ;;  %2793 = vst [vmem:[%s4496_s17 + $0x14] sm:$0x1] %v3661_v1 }
  0x1a   : > { %v648_v60 = vor.u32 %v647_v54, %v643_v53  ;;  %v3853_v0 = vrot.slane %v650_v61, 1  ;;  %v794_v3 = vsel %vm791_vm4, %v792_v58, %v793_v59  ;;  %v906_v13 = vrot.slane %v2979_v10, 1  ;;  %v3537_v54 = vld [vmem:[%s4582_s2 + $0x64] sm:$0xff]   ;;  %v3536_v58 = vld [vmem:[%s4583_s3 + $0xd0] sm:$0xff]   ;;  %v3539_v61 = vld [vmem:[%s4582_s2 + $0x6c] ss:$0 sps:$4 sm:$0xff]  }
  0x1b   : > { %345 = vmatpush1.bf16.msra.mxu0 %v3497_v18  ;;  %v504_v36 = vsel %vm492_vm2, %v499_v32, %v503_v29  ;;  %v3524_v18 = vld [vmem:[%s4583_s3 + $0xa8] sm:$0xff]   ;;  %v3896_v19 = vcombine.low %v3819_v45, %v592_v55  ;;  %v633_v23 = vshll.u32 %v3824_v48, 16  ;;  %v3528_v29 = vld [vmem:[%s4583_s3 + $0xb8] sm:$0xff]   ;;  %v657_v33 = vshrl.u32 %v3839_v56, 16  ;;  %v3542_v10 = vld [vmem:[%s4583_s3 + $0xe0] sm:$0xff]  }
  0x1c   : > { %346 = vmatprep.subr.bf16.mxu0 %v3661_v1  ;;  %3366 = vmatpush3.bf16.msra.mxu1 %v3498_v14  ;;  %v653_v4 = vsel %vm492_vm2, %v648_v60, %v3853_v0  ;;  %v3127_v14 = vcombine.high %v3783_v31, %v3819_v45  ;;  %v908_v20 = vsel %vm791_vm4, %v906_v13, %v907_v11  ;;  %v3554_v56 = vld [vmem:[%s4582_s2 + $0x88] ss:$0 sps:$4 sm:$0xff]  }
  0x1d   : > { %3367 = vmatprep.subr.bf16.mxu1 %v3500_v25  ;;  %3371 = vmatprep.mubr.msk.bf16.mxu1 %vm411_vm0, %v504_v36  ;;  %v635_v28 = vrot.slane %v633_v23, 1  ;;  %v3532_v36 = vld [vmem:[%s4583_s3 + $0xc0] sm:$0xff]   ;;  %v654_v52 = vshrl.u32 %v3896_v19, 16 }
  0x1f   : > { %347 = vmatpush1.bf16.msra.mxu0 %v3499_v27  ;;  %v631_v27 = vshrl.u32 %v3824_v48, 16 }
  0x20   : > { %348 = vmatprep.subr.bf16.mxu0 %v3661_v1  ;;  %3368 = vmatpush3.bf16.msra.mxu1 %v3500_v25  ;;  %v638_v25 = vshll.u32 %v3896_v19, 16 }
  0x21   : > { %3460 = vmatprep.subr.msk.bf16.mxu1 %vm418_vm1, %v3502_v34  ;;  %v3533_v34 = vld [vmem:[%s4582_s2 + $0x54] sm:$0xff]  }
  0x22   : > { %v640_v32 = vrot.slane %v638_v25, 1 }
  0x23   : > { %349 = vmatpush1.bf16.msra.mxu0 %v3501_v35  ;;  %v636_v35 = vor.u32 %v635_v28, %v631_v27 }
  0x24   : > { %350 = vmatprep.subr.bf16.mxu0 %v3661_v1  ;;  %3370 = vmatpush3.bf16.msra.mxu1 %v536_v38  ;;  %v1029_v38 = vld [vmem:[%s3727_s8 + $0xc] sm:$0x7] }
  0x25   : > { %728 = vmatprep.subr.bf16.mxu1 %v3661_v1 }
  0x27   : > { %351 = vmatpush1.bf16.msra.mxu0 %v3505_v39  ;;  %3372 = vmatmul.mubr.msk.bf16.vlgmr.msra.gmra.mrb[4].mxu1 %vm411_vm0, %v507_v40  ;;  %v1129_v39 = vld [vmem:[%s3771_s24] sm:$0x88]  ;;  %v1130_v40 = vld [vmem:[%s3771_s24 + $0x18] sm:$0x77] }
  0x28   : > { %352 = vmatprep.subr.bf16.mxu0 %v3661_v1  ;;  %729 = vmatpush1.bf16.msra.mxu1 %v3506_v41  ;;  %v3027_v41 = vcombine.low %v1129_v39, %v3783_v31 }
  0x29   : > { %730 = vmatprep.subr.bf16.mxu1 %v3661_v1  ;;  %2942 = vmatprep.mubr.msk.bf16.mxu1 %vm327_vm3, %v653_v4  ;;  %v3984_v4 = vld [vmem:[%s3771_s24 + $0x18] sm:$0xff] }
  0x2a   : > { %v1162_v46 = vrot.slane %v3027_v41, 3  ;;  %v1426_v60 = vshrl.u32 %v3027_v41, 16 }
  0x2b   : > { %353 = vmatpush1.bf16.msra.mxu0 %v3507_v42  ;;  %v3029_v42 = vcombine.low %v3819_v45, %v1130_v40 }
  0x2c   : > { %3375 = vmatprep.subr.bf16.mxu0 %v3511_v44  ;;  %731 = vmatpush1.bf16.msra.mxu1 %v3508_v43  ;;  %v641_v43 = vsel %vm492_vm2, %v636_v35, %v640_v32  ;;  %v3548_v35 = vld [vmem:[%s4582_s2 + $0x70] sm:$0xff]  }
  0x2d   : > { %732 = vmatprep.subr.bf16.mxu1 %v3661_v1 }
  0x2e   : > { %367 = vmatmul.mubr.bf16.vlgmr.msra.gmra.mrb[0].mxu0 %v3824_v48  ;;  %v3946_v48 = vcombine.low %v1028_v37, %v3751_v16 }
  0x2f   : > { %3376 = vmatpush3.bf16.msra.mxu0 %v3511_v44  ;;  %2884 = vmatprep.mubr.msk.bf16.mxu0 %vm327_vm3, %v2872_v51  ;;  %v659_v44 = vor.u32 %v657_v33, %v3853_v0  ;;  %v3534_v51 = vld [vmem:[%s4583_s3 + $0xc8] sm:$0xff]   ;;  %v3977_v0 = vcombine.high %v1129_v39, %v3783_v31  ;;  %v3545_v39 = vld [vmem:[%s4583_s3 + $0xf8] sm:$0xff]  }
  0x30   : > { %3377 = vmatprep.subr.bf16.mxu0 %v3513_v50  ;;  %733 = vmatpush1.bf16.msra.mxu1 %v3512_v49  ;;  %v3000_v49 = vcombine.low %v3754_v17, %v1029_v38  ;;  %v1045_v55 = vrot.slane %v3946_v48, 3  ;;  %v1301_v25 = vshrl.u32 %v3946_v48, 16 }
  0x31   : > { %734 = vmatprep.subr.bf16.mxu1 %v3661_v1 }
  0x33   : > { %3378 = vmatpush3.bf16.msra.mxu0 %v3513_v50  ;;  %v3949_v50 = vrot.slane %v3029_v42, 3  ;;  %v3550_v42 = vld [vmem:[%s4582_s2 + $0x78] sm:$0xff]  }
  0x34   : > { %3379 = vmatprep.subr.bf16.mxu0 %v3517_v57  ;;  %735 = vmatpush1.bf16.msra.mxu1 %v3514_v62  ;;  %v3538_v62 = vld [vmem:[%s4583_s3 + $0xd8] sm:$0xff]  }
  0x35   : > { %736 = vmatprep.subr.bf16.mxu1 %v3661_v1  ;;  %v3958_v53 = vsel %vm1044_vm5, %v1162_v46, %v3949_v50 }
  0x36   : > { %375 = vmatmul.mubr.bf16.gmra.mrb[4].mxu0 %v2871_v63 }
  0x37   : > { %3380 = vmatpush3.bf16.msra.mxu0 %v3517_v57  ;;  %3383 = vmatprep.mubr.msk.bf16.mxu0 %vm411_vm0, %v794_v3  ;;  %v1046_v57 = vrot.slane %v3000_v49, 3  ;;  %v3981_v3 = vld [vmem:[%s3727_s8 + $0xc] sm:$0xf]  ;;  %v3552_v49 = vld [vmem:[%s4582_s2 + $0x80] sm:$0xff]  }
  0x38   : > { %3461 = vmatprep.subr.msk.bf16.mxu0 %vm418_vm1, %v3519_v2  ;;  %737 = vmatpush1.bf16.msra.mxu1 %v3518_v5  ;;  %v3030_v2 = vcombine.high %v3819_v45, %v1130_v40  ;;  %v1429_v5 = vshll.u32 %v3027_v41, 16  ;;  %v1303_v40 = vrot.slane %v1301_v25, 3  ;;  %v3565_v25 = vld [vmem:[%s4583_s3 + $0x138] sm:$0xff]   ;;  %v3099_v16 = vcombine.low %v3981_v3, %v3981_v3 }
  0x39   : > { %738 = vmatprep.subr.bf16.mxu1 %v3661_v1  ;;  %v1047_v63 = vsel %vm1044_vm5, %v1045_v55, %v1046_v57 }
  0x3a   : > { %v1431_v13 = vrot.slane %v1429_v5, 4 }
  0x3b   : > { %3382 = vmatpush3.bf16.msra.mxu0 %v823_v6  ;;  %v3077_v6 = vcombine.low %v3819_v45, %v3984_v4 }
  0x3c   : > { %977 = vmatprep.subr.bf16.mxu0 %v3661_v1  ;;  %739 = vmatpush1.bf16.msra.mxu1 %v3520_v7  ;;  %v1428_v7 = vrot.slane %v1426_v60, 3 }
  0x3d   : > { %740 = vmatprep.subr.bf16.mxu1 %v3661_v1  ;;  %v1437_v23 = vshll.u32 %v3077_v6, 16 }
  0x3e   : > { %3384 = vmatmul.mubr.msk.bf16.vlgmr.msra.gmra.mrb[8].mxu0 %vm411_vm0, %v793_v59  ;;  %v656_v59 = vor.u32 %v654_v52, %v640_v32  ;;  %v1432_v27 = vor.u32 %v1431_v13, %v1428_v7  ;;  %v1304_v32 = vshll.u32 %v3946_v48, 16  ;;  %v3549_v48 = vld [vmem:[%s4583_s3 + $0x100] sm:$0xff]   ;;  %v1446_v52 = vshll.u32 %v3977_v0, 16  ;;  %v3555_v7 = vld [vmem:[%s4583_s3 + $0x118] sm:$0xff]   ;;  %v3560_v13 = vld [vmem:[%s4583_s3 + $0x148] sm:$0xff]  }
  0x3f   : > { %978 = vmatpush1.bf16.msra.mxu0 %v3522_v9  ;;  %2990 = vmatprep.mubr.msk.bf16.mxu0 %vm327_vm3, %v908_v20  ;;  %v1076_v9 = vsel %vm418_vm1, %v3539_v61, 0  ;;  %v3998_v20 = vrot.slane %v3030_v2, 3  ;;  %v1345_v2 = vsel %vm418_vm1, %v3554_v56, 0 }
  0x40   : > { %979 = vmatprep.subr.bf16.mxu0 %v3661_v1  ;;  %741 = vmatpush1.bf16.msra.mxu1 %v3523_v12  ;;  %v2978_v12 = vcombine.low %v3874_v8, %v3783_v31  ;;  %v3543_v8 = vld [vmem:[%s4583_s3 + $0xf0] sm:$0xff]   ;;  %v1448_v60 = vrot.slane %v1446_v52, 4  ;;  %v3589_v52 = vld [vmem:[%s4582_s2 + $0xb8] sm:$0xff]  }
  0x41   : > { %742 = vmatprep.subr.bf16.mxu1 %v3661_v1 }
  0x43   : > { %980 = vmatpush1.bf16.msra.mxu0 %v3524_v18  ;;  %v1165_v18 = vrot.slane %v3977_v0, 3 }
  0x44   : > { %981 = vmatprep.subr.bf16.mxu0 %v3661_v1  ;;  %743 = vmatpush1.bf16.msra.mxu1 %v3525_v22  ;;  %v1434_v22 = vshrl.u32 %v3077_v6, 16 }
  0x45   : > { %744 = vmatprep.subr.bf16.mxu1 %v3661_v1  ;;  %v1167_v33 = vsel %vm1044_vm5, %v1165_v18, %v3998_v20  ;;  %v3561_v18 = vld [vmem:[%s4583_s3 + $0x128] sm:$0xff]  }
  0x46   : > { %v1436_v28 = vrot.slane %v1434_v22, 3  ;;  %v3562_v22 = vld [vmem:[%s4583_s3 + $0x150] sm:$0xff]  }
  0x47   : > { %982 = vmatpush1.bf16.msra.mxu0 %v3526_v24  ;;  %v904_v24 = vrot.slane %v3896_v19, 1  ;;  %v903_v19 = vrot.slane %v2978_v12, 1  ;;  %v3559_v12 = vld [vmem:[%s4583_s3 + $0x120] sm:$0xff]  }
  0x48   : > { %983 = vmatprep.subr.bf16.mxu0 %v3661_v1  ;;  %745 = vmatpush1.bf16.msra.mxu1 %v3527_v26  ;;  %v3050_v26 = vcombine.low %v3754_v17, %v3981_v3  ;;  %v3580_v17 = vld [vmem:[%s4583_s3 + $0x190] sm:$0xff]   ;;  %v3582_v3 = vld [vmem:[%s4583_s3 + $0x198] sm:$0xff]  }
  0x49   : > { %746 = vmatprep.subr.bf16.mxu1 %v3661_v1  ;;  %v905_v41 = vsel %vm791_vm4, %v903_v19, %v904_v24  ;;  %v3574_v19 = vld [vmem:[%s4583_s3 + $0x170] sm:$0xff]  }
  0x4a   : > { %v1312_v37 = vshll.u32 %v3050_v26, 16 }
  0x4b   : > { %984 = vmatpush1.bf16.msra.mxu0 %v3528_v29  ;;  %v1439_v29 = vrot.slane %v1437_v23, 4  ;;  %v3563_v23 = vld [vmem:[%s4583_s3 + $0x130] sm:$0xff]  }
  0x4c   : > { %985 = vmatprep.subr.bf16.mxu0 %v3661_v1  ;;  %747 = vmatpush1.bf16.msra.mxu1 %v3529_v30  ;;  %v3544_v30 = vld [vmem:[%s4583_s3 + $0xe8] sm:$0xff]   ;;  %v1314_v46 = vrot.slane %v1312_v37, 4  ;;  %v3576_v37 = vld [vmem:[%s4583_s3 + $0x178] sm:$0xff]  }
  0x4d   : > { %3387 = vmatprep.subr.bf16.mxu1 %v3533_v34 }
  0x4f   : > { %986 = vmatpush1.bf16.msra.mxu0 %v3532_v36  ;;  %761 = vmatmul.mubr.bf16.vlgmr.msra.gmra.mrb[8].mxu1 %v641_v43  ;;  %v1309_v36 = vshrl.u32 %v3050_v26, 16  ;;  %v1306_v43 = vrot.slane %v1304_v32, 4  ;;  %v3570_v26 = vld [vmem:[%s4583_s3 + $0x160] sm:$0xff]   ;;  %v4141_v32 = vld [vmem:[%s3771_s24 + $0x8] sm:$0x88] }
  0x50   : > { %987 = vmatprep.subr.bf16.mxu0 %v3661_v1  ;;  %3388 = vmatpush3.bf16.msra.mxu1 %v3533_v34  ;;  %v4015_v34 = vor.u32 %v1439_v29, %v1436_v28  ;;  %v3572_v28 = vld [vmem:[%s4583_s3 + $0x168] sm:$0xff]   ;;  %v4124_v29 = vld [vmem:[%s3771_s24 + $0x20] sm:$0x77] }
  0x51   : > { %2943 = vmatprep.mubr.msk.bf16.mxu1 %vm327_vm3, %v659_v44  ;;  %3389 = vmatprep.subr.bf16.mxu1 %v3535_v47  ;;  %v1311_v44 = vrot.slane %v1309_v36, 3 }
  0x52   : > { %v4024_v38 = vsel %vm1299_vm6, %v1432_v27, %v4015_v34  ;;  %v3573_v27 = vld [vmem:[%s4582_s2 + $0x94] sm:$0xff]  }
  0x53   : > { %988 = vmatpush1.bf16.msra.mxu0 %v3534_v51  ;;  %v1443_v51 = vshrl.u32 %v3977_v0, 16  ;;  %v1315_v55 = vor.u32 %v1314_v46, %v1311_v44  ;;  %v3553_v0 = vld [vmem:[%s4583_s3 + $0x110] sm:$0xff]   ;;  %v4188_v44 = vld [vmem:[%s3727_s8 + $0x8] sm:$0xf]  ;;  %v4191_v46 = vld [vmem:[%s3727_s8 + $0xc] sm:$0xf] }
  0x54   : > { %989 = vmatprep.subr.bf16.mxu0 %v3661_v1  ;;  %3390 = vmatpush3.bf16.msra.mxu1 %v3535_v47  ;;  %v3078_v47 = vcombine.high %v3819_v45, %v3984_v4 }
  0x55   : > { %3391 = vmatprep.subr.bf16.mxu1 %v3537_v54 }
  0x57   : > { %990 = vmatpush1.bf16.msra.mxu0 %v3536_v58  ;;  %769 = vmatmul.mubr.bf16.gmra.mrb[12].mxu1 %v656_v59  ;;  %v1454_v58 = vshll.u32 %v3078_v47, 16  ;;  %v3551_v59 = vld [vmem:[%s4583_s3 + $0x108] sm:$0xff]  }
  0x58   : > { %991 = vmatprep.subr.bf16.mxu0 %v3661_v1  ;;  %3392 = vmatpush3.bf16.msra.mxu1 %v3537_v54  ;;  %v1307_v54 = vor.u32 %v1306_v43, %v1303_v40  ;;  %v1813_v43 = vld [vmem:[%s3727_s8 + $0x4] sm:$0xc] }
  0x59   : > { %3395 = vmatprep.mubr.msk.bf16.mxu1 %vm411_vm0, %v1047_v63  ;;  %3462 = vmatprep.subr.msk.bf16.mxu1 %vm418_vm1, %v3539_v61  ;;  %v1456_v63 = vrot.slane %v1454_v58, 4  ;;  %v4224_v58 = vld [vmem:[%s3771_s24 + $0x20] sm:$0x33] }
  0x5a   : > { %v1316_v61 = vsel %vm1299_vm6, %v1307_v54, %v1315_v55 }
  0x5b   : > { %992 = vmatpush1.bf16.msra.mxu0 %v3538_v62 }
  0x5c   : > { %993 = vmatprep.subr.bf16.mxu0 %v3661_v1  ;;  %3394 = vmatpush3.bf16.msra.mxu1 %v1076_v9  ;;  %v3558_v9 = vld [vmem:[%s4583_s3 + $0x140] sm:$0xff]  }
  0x5d   : > { %1236 = vmatprep.subr.bf16.mxu1 %v3661_v1 }
  0x5f   : > { %994 = vmatpush1.bf16.msra.mxu0 %v3542_v10  ;;  %3396 = vmatmul.mubr.msk.bf16.vlgmr.msra.gmra.mrb[16].mxu1 %vm411_vm0, %v1046_v57  ;;  %v1451_v57 = vshrl.u32 %v3078_v47, 16  ;;  %v1816_v47 = vld [vmem:[%s3727_s8 + $0x10] sm:$0x3] }
  0x60   : > { %995 = vmatprep.subr.bf16.mxu0 %v3661_v1  ;;  %1237 = vmatpush1.bf16.msra.mxu1 %v3543_v8  ;;  %v3571_v8 = vld [vmem:[%s4582_s2 + $0x8c] sm:$0xff]  }
  0x61   : > { %3041 = vmatprep.mubr.msk.bf16.mxu1 %vm327_vm3, %v1167_v33  ;;  %1238 = vmatprep.subr.bf16.mxu1 %v3661_v1  ;;  %v1453_v62 = vrot.slane %v1451_v57, 3  ;;  %v3577_v33 = vld [vmem:[%s4582_s2 + $0xa4] ss:$0 sps:$4 sm:$0xff]   ;;  %v3588_v57 = vld [vmem:[%s4583_s3 + $0x1a8] sm:$0xff]  }
  0x62   : > { %v1616_v40 = vsel %vm418_vm1, %v3577_v33, 0 }
  0x63   : > { %996 = vmatpush1.bf16.msra.mxu0 %v3544_v30  ;;  %v4064_v6 = vor.u32 %v1456_v63, %v1453_v62  ;;  %v3575_v30 = vld [vmem:[%s4582_s2 + $0x9c] sm:$0xff]  }
  0x64   : > { %3399 = vmatprep.subr.bf16.mxu0 %v3548_v35  ;;  %1239 = vmatpush1.bf16.msra.mxu1 %v3545_v39 }
  0x65   : > { %1240 = vmatprep.subr.bf16.mxu1 %v3661_v1 }
  0x66   : > { %1010 = vmatmul.mubr.bf16.vlgmr.msra.gmra.mrb[12].mxu0 %v905_v41 }
  0x67   : > { %3400 = vmatpush3.bf16.msra.mxu0 %v3548_v35  ;;  %2991 = vmatprep.mubr.msk.bf16.mxu0 %vm327_vm3, %v907_v11  ;;  %v1445_v11 = vrot.slane %v1443_v51, 3  ;;  %v3150_v51 = vcombine.low %v4191_v46, %v1816_v47 }
  0x68   : > { %3401 = vmatprep.subr.bf16.mxu0 %v3550_v42  ;;  %1241 = vmatpush1.bf16.msra.mxu1 %v3549_v48  ;;  %v3587_v48 = vld [vmem:[%s4582_s2 + $0xb0] sm:$0xff]  }
  0x69   : > { %1242 = vmatprep.subr.bf16.mxu1 %v3661_v1  ;;  %v1449_v5 = vor.u32 %v1448_v60, %v1445_v11  ;;  %v3180_v60 = vcombine.high %v3984_v4, %v4224_v58 }
  0x6b   : > { %3402 = vmatpush3.bf16.msra.mxu0 %v3550_v42  ;;  %v1458_v10 = vsel %vm1299_vm6, %v1449_v5, %v4064_v6  ;;  %v3585_v42 = vld [vmem:[%s4582_s2 + $0xa8] sm:$0xff]   ;;  %vm2773_vm6 = vcmask 1043459  }
  0x6c   : > { %3403 = vmatprep.subr.bf16.mxu0 %v3552_v49  ;;  %1243 = vmatpush1.bf16.msra.mxu1 %v3551_v59  ;;  %v3591_v59 = vld [vmem:[%s4582_s2 + $0xc0] ss:$0 sps:$4 sm:$0xff]  }
  0x6d   : > { %1244 = vmatprep.subr.bf16.mxu1 %v3661_v1  ;;  %v1867_v62 = vsel %vm418_vm1, %v3591_v59, 0 }
  0x6e   : > { %1018 = vmatmul.mubr.bf16.gmra.mrb[16].mxu0 %v904_v24  ;;  %v3564_v24 = vld [vmem:[%s4583_s3 + $0x158] sm:$0xff]  }
  0x6f   : > { %3404 = vmatpush3.bf16.msra.mxu0 %v3552_v49  ;;  %3407 = vmatprep.mubr.msk.bf16.mxu0 %vm411_vm0, %v1316_v61  ;;  %v4203_v49 = vcombine.low %v1813_v43, %v4188_v44  ;;  %v3590_v61 = vld [vmem:[%s4583_s3 + $0x1b0] sm:$0xff]  }
  0x70   : > { %3463 = vmatprep.subr.msk.bf16.mxu0 %vm418_vm1, %v3554_v56  ;;  %1245 = vmatpush1.bf16.msra.mxu1 %v3553_v0  ;;  %v4246_v0 = vrot.slane %v3180_v60, 2 }
  0x71   : > { %1246 = vmatprep.subr.bf16.mxu1 %v3661_v1  ;;  %v1836_v54 = vrot.slane %v4203_v49, 2 }
  0x73   : > { %3406 = vmatpush3.bf16.msra.mxu0 %v1345_v2  ;;  %v3592_v2 = vld [vmem:[%s4583_s3 + $0x1b8] sm:$0xff]  }
  0x74   : > { %1527 = vmatprep.subr.bf16.mxu0 %v3661_v1  ;;  %1247 = vmatpush1.bf16.msra.mxu1 %v3555_v7  ;;  %v3598_v7 = vld [vmem:[%s4583_s3 + $0x1e8] sm:$0xff]  }
  0x75   : > { %1248 = vmatprep.subr.bf16.mxu1 %v3661_v1 }
  0x76   : > { %3408 = vmatmul.mubr.msk.bf16.vlgmr.msra.gmra.mrb[20].mxu0 %vm411_vm0, %v1315_v55  ;;  %v1837_v55 = vrot.slane %v3150_v51, 2 }
  0x77   : > { %1528 = vmatpush1.bf16.msra.mxu0 %v3558_v9  ;;  %3089 = vmatprep.mubr.msk.bf16.mxu0 %vm327_vm3, %v1458_v10  ;;  %v3599_v9 = vld [vmem:[%s4583_s3 + $0x1c8] sm:$0xff]   ;;  %v2086_v10 = vld [vmem:[%s3727_s8 + $0x10] sm:$0x7] }
  0x78   : > { %1529 = vmatprep.subr.bf16.mxu0 %v3661_v1  ;;  %1249 = vmatpush1.bf16.msra.mxu1 %v3559_v12  ;;  %v1838_v56 = vsel %vm1835_vm7, %v1836_v54, %v1837_v55  ;;  %v3600_v12 = vld [vmem:[%s4583_s3 + $0x1f0] sm:$0xff]  }
  0x79   : > { %1250 = vmatprep.subr.bf16.mxu1 %v3661_v1 }
  0x7b   : > { %1530 = vmatpush1.bf16.msra.mxu0 %v3560_v13  ;;  %v4278_v13 = vcombine.low %v4191_v46, %v2086_v10  ;;  %v3615_v46 = vld [vmem:[%s4582_s2 + $0xdc] ss:$0 sps:$4 sm:$0xff]  }
  0x7c   : > { %1531 = vmatprep.subr.bf16.mxu0 %v3661_v1  ;;  %1251 = vmatpush1.bf16.msra.mxu1 %v3561_v18  ;;  %v3601_v18 = vld [vmem:[%s4583_s3 + $0x1d0] sm:$0xff]   ;;  %v3631_v10 = vld [vmem:[%s4583_s3 + $0x298] sm:$0xff]  }
  0x7d   : > { %1252 = vmatprep.subr.bf16.mxu1 %v3661_v1 }
  0x7f   : > { %1532 = vmatpush1.bf16.msra.mxu0 %v3562_v22  ;;  %v3602_v22 = vld [vmem:[%s4583_s3 + $0x1f8] sm:$0xff]  }
  0x80   : > { %1533 = vmatprep.subr.bf16.mxu0 %v3661_v1  ;;  %1253 = vmatpush1.bf16.msra.mxu1 %v3563_v23  ;;  %v3603_v23 = vld [vmem:[%s4583_s3 + $0x1d8] sm:$0xff]  }
  0x81   : > { %1254 = vmatprep.subr.bf16.mxu1 %v3661_v1 }
  0x83   : > { %1534 = vmatpush1.bf16.msra.mxu0 %v3564_v24  ;;  %v2100_v24 = vshrl.u32 %v4203_v49, 16 }
  0x84   : > { %1535 = vmatprep.subr.bf16.mxu0 %v3661_v1  ;;  %1255 = vmatpush1.bf16.msra.mxu1 %v3565_v25  ;;  %v2103_v25 = vshll.u32 %v4203_v49, 16 }
  0x85   : > { %3411 = vmatprep.subr.bf16.mxu1 %v3571_v8 }
  0x87   : > { %1536 = vmatpush1.bf16.msra.mxu0 %v3570_v26  ;;  %1269 = vmatmul.mubr.bf16.vlgmr.msra.gmra.mrb[20].mxu1 %v3958_v53  ;;  %v4135_v53 = vcombine.low %v3984_v4, %v4124_v29  ;;  %v2111_v26 = vshll.u32 %v4278_v13, 16 }
  0x88   : > { %1537 = vmatprep.subr.bf16.mxu0 %v3661_v1  ;;  %3412 = vmatpush3.bf16.msra.mxu1 %v3571_v8  ;;  %v2108_v8 = vshrl.u32 %v4278_v13, 16 }
  0x89   : > { %3042 = vmatprep.mubr.msk.bf16.mxu1 %vm327_vm3, %v3998_v20  ;;  %3413 = vmatprep.subr.bf16.mxu1 %v3573_v27  ;;  %v4138_v20 = vld [vmem:[%s3771_s24 + $0x10] sm:$0xff]  ;;  %v2501_v36 = vrot.slane %v4135_v53, 3 }
  0x8a   : > { %v3275_v35 = vcombine.low %v4141_v32, %v4138_v20 }
  0x8b   : > { %1538 = vmatpush1.bf16.msra.mxu0 %v3572_v28  ;;  %v3606_v28 = vld [vmem:[%s4583_s3 + $0x200] sm:$0xff]  }
  0x8c   : > { %1539 = vmatprep.subr.bf16.mxu0 %v3661_v1  ;;  %3414 = vmatpush3.bf16.msra.mxu1 %v3573_v27  ;;  %v2500_v39 = vrot.slane %v3275_v35, 3  ;;  %v3607_v27 = vld [vmem:[%s4582_s2 + $0xc4] sm:$0xff]   ;;  %v2110_v35 = vrot.slane %v2108_v8, 2 }
  0x8d   : > { %3415 = vmatprep.subr.bf16.mxu1 %v3575_v30 }
  0x8e   : > { %v4163_v41 = vsel %vm1044_vm5, %v2500_v39, %v2501_v36  ;;  %v3609_v39 = vld [vmem:[%s4582_s2 + $0xcc] sm:$0xff]  }
  0x8f   : > { %1540 = vmatpush1.bf16.msra.mxu0 %v3574_v19  ;;  %1277 = vmatmul.mubr.bf16.gmra.mrb[24].mxu1 %v3949_v50  ;;  %v3579_v50 = vld [vmem:[%s4583_s3 + $0x180] sm:$0xff]   ;;  %v2102_v19 = vrot.slane %v2100_v24, 2  ;;  %v3634_v24 = vld [vmem:[%s4583_s3 + $0x268] sm:$0xff]  }
  0x90   : > { %1541 = vmatprep.subr.bf16.mxu0 %v3661_v1  ;;  %3416 = vmatpush3.bf16.msra.mxu1 %v3575_v30  ;;  %v3129_v30 = vcombine.high %v3984_v4, %v3984_v4 }
  0x91   : > { %3419 = vmatprep.mubr.msk.bf16.mxu1 %vm411_vm0, %v3098_v21  ;;  %3464 = vmatprep.subr.msk.bf16.mxu1 %vm418_vm1, %v3577_v33  ;;  %v3581_v21 = vld [vmem:[%s4583_s3 + $0x188] sm:$0xff]   ;;  %v2105_v33 = vrot.slane %v2103_v25, 3 }
  0x93   : > { %1542 = vmatpush1.bf16.msra.mxu0 %v3576_v37  ;;  %v2113_v37 = vrot.slane %v2111_v26, 3  ;;  %v2233_v26 = vshrl.u32 %v4135_v53, 16 }
  0x94   : > { %1543 = vmatprep.subr.bf16.mxu0 %v3661_v1  ;;  %3418 = vmatpush3.bf16.msra.mxu1 %v1616_v40  ;;  %v4310_v40 = vcombine.high %v3984_v4, %v4124_v29  ;;  %v3613_v29 = vld [vmem:[%s4582_s2 + $0xd4] sm:$0xff]  }
  0x95   : > { %1762 = vmatprep.subr.bf16.mxu1 %v3661_v1 }
  0x96   : > { %v2250_v31 = vshrl.u32 %v4310_v40, 16  ;;  %v2253_v45 = vshll.u32 %v4310_v40, 16 }
  0x97   : > { %1544 = vmatpush1.bf16.msra.mxu0 %v3579_v50  ;;  %3420 = vmatmul.mubr.msk.bf16.vlgmr.msra.gmra.mrb[28].mxu1 %vm411_vm0, %v3099_v16  ;;  %v3608_v50 = vld [vmem:[%s4583_s3 + $0x208] sm:$0xff]   ;;  %v2106_v16 = vor.u32 %v2105_v33, %v2102_v19 }
  0x98   : > { %1545 = vmatprep.subr.bf16.mxu0 %v3661_v1  ;;  %1763 = vmatpush1.bf16.msra.mxu1 %v3580_v17  ;;  %v2114_v17 = vor.u32 %v2113_v37, %v2110_v35  ;;  %v2252_v49 = vrot.slane %v2250_v31, 2  ;;  %v2255_v51 = vrot.slane %v2253_v45, 3  ;;  %v3636_v35 = vld [vmem:[%s4583_s3 + $0x270] sm:$0xff]   ;;  %v3642_v45 = vld [vmem:[%s4582_s2 + $0xe0] sm:$0xff]  }
  0x99   : > { %3140 = vmatprep.mubr.msk.bf16.mxu1 %vm327_vm3, %v3127_v14  ;;  %1764 = vmatprep.subr.bf16.mxu1 %v3661_v1  ;;  %v3586_v14 = vld [vmem:[%s4583_s3 + $0x1a0] sm:$0xff]  }
  0x9a   : > { %v2115_v43 = vsel %vm2098_vm8, %v2106_v16, %v2114_v17 }
  0x9b   : > { %1546 = vmatpush1.bf16.msra.mxu0 %v3581_v21 }
  0x9c   : > { %3423 = vmatprep.subr.bf16.mxu0 %v3585_v42  ;;  %1765 = vmatpush1.bf16.msra.mxu1 %v3582_v3 }
  0x9d   : > { %1766 = vmatprep.subr.bf16.mxu1 %v3661_v1 }
  0x9e   : > { %1560 = vmatmul.mubr.bf16.vlgmr.msra.gmra.mrb[24].mxu0 %v4024_v38  ;;  %v4221_v38 = vld [vmem:[%s3771_s24 + $0x8] sm:$0xcc] }
  0x9f   : > { %3424 = vmatpush3.bf16.msra.mxu0 %v3585_v42  ;;  %3090 = vmatprep.mubr.msk.bf16.mxu0 %vm327_vm3, %v4064_v6  ;;  %v4233_v11 = vcombine.high %v4221_v38, %v4138_v20  ;;  %v3597_v6 = vld [vmem:[%s4583_s3 + $0x1c0] sm:$0xff]   ;;  %v3128_v42 = vcombine.low %v3984_v4, %v3984_v4 }
  0xa0   : > { %3425 = vmatprep.subr.bf16.mxu0 %v3587_v48  ;;  %1767 = vmatpush1.bf16.msra.mxu1 %v3586_v14  ;;  %v3614_v14 = vld [vmem:[%s4583_s3 + $0x218] sm:$0xff]  }
  0xa1   : > { %1768 = vmatprep.subr.bf16.mxu1 %v3661_v1  ;;  %v1964_v63 = vrot.slane %v4233_v11, 2  ;;  %v2242_v21 = vshrl.u32 %v4233_v11, 16  ;;  %v2245_v3 = vshll.u32 %v4233_v11, 16  ;;  %v3617_v11 = vld [vmem:[%s4583_s3 + $0x230] sm:$0xff]  }
  0xa3   : > { %3426 = vmatpush3.bf16.msra.mxu0 %v3587_v48  ;;  %v1966_v5 = vsel %vm1835_vm7, %v1964_v63, %v4246_v0  ;;  %v2244_v47 = vrot.slane %v2242_v21, 2  ;;  %v2247_v48 = vrot.slane %v2245_v3, 3  ;;  %v3625_v63 = vld [vmem:[%s4583_s3 + $0x280] sm:$0xff]   ;;  %v3638_v21 = vld [vmem:[%s4583_s3 + $0x278] sm:$0xff]  }
  0xa4   : > { %3427 = vmatprep.subr.bf16.mxu0 %v3589_v52  ;;  %1769 = vmatpush1.bf16.msra.mxu1 %v3588_v57  ;;  %v3616_v57 = vld [vmem:[%s4583_s3 + $0x220] sm:$0xff]  }
  0xa5   : > { %1770 = vmatprep.subr.bf16.mxu1 %v3661_v1  ;;  %v2248_v54 = vor.u32 %v2247_v48, %v2244_v47  ;;  %v3645_v48 = vld [vmem:[%s4583_s3 + $0x2c8] sm:$0xff]  }
  0xa6   : > { %1568 = vmatmul.mubr.bf16.gmra.mrb[28].mxu0 %v4015_v34  ;;  %v3596_v34 = vld [vmem:[%s4583_s3 + $0x1e0] sm:$0xff]  }
  0xa7   : > { %3428 = vmatpush3.bf16.msra.mxu0 %v3589_v52  ;;  %3431 = vmatprep.mubr.msk.bf16.mxu0 %vm411_vm0, %v1838_v56  ;;  %v2144_v52 = vsel %vm418_vm1, %v3615_v46, 0  ;;  %v3179_v56 = vcombine.low %v3984_v4, %v4224_v58  ;;  %v3619_v58 = vld [vmem:[%s4583_s3 + $0x238] sm:$0xff]  }
  0xa8   : > { %3465 = vmatprep.subr.msk.bf16.mxu0 %vm418_vm1, %v3591_v59  ;;  %1771 = vmatpush1.bf16.msra.mxu1 %v3590_v61  ;;  %v4351_v59 = vcombine.low %v4221_v38, %v4138_v20  ;;  %v3618_v38 = vld [vmem:[%s4583_s3 + $0x228] sm:$0xff]  }
  0xa9   : > { %1772 = vmatprep.subr.bf16.mxu1 %v3661_v1  ;;  %v1962_v4 = vrot.slane %v3179_v56, 2 }
  0xaa   : > { %v1961_v61 = vrot.slane %v4351_v59, 2  ;;  %v2225_v25 = vshrl.u32 %v4351_v59, 16  ;;  %v2228_v8 = vshll.u32 %v4351_v59, 16 }
  0xab   : > { %3430 = vmatpush3.bf16.msra.mxu0 %v1867_v62 }
  0xac   : > { %2035 = vmatprep.subr.bf16.mxu0 %v3661_v1  ;;  %1773 = vmatpush1.bf16.msra.mxu1 %v3592_v2  ;;  %v1963_v62 = vsel %vm1835_vm7, %v1961_v61, %v1962_v4  ;;  %v3276_v2 = vcombine.high %v4141_v32, %v4138_v20  ;;  %v2504_v20 = vrot.slane %v4310_v40, 3  ;;  %v3626_v32 = vld [vmem:[%s4583_s3 + $0x248] sm:$0xff]   ;;  %v2227_v37 = vrot.slane %v2225_v25, 2 }
  0xad   : > { %1774 = vmatprep.subr.bf16.mxu1 %v3661_v1  ;;  %vm2774_vm7 = vsmask.f32 7950 }
  0xae   : > { %3432 = vmatmul.mubr.msk.bf16.vlgmr.msra.gmra.mrb[32].mxu0 %vm411_vm0, %v1837_v55  ;;  %v4344_v55 = vor.u32 %v2255_v51, %v2252_v49  ;;  %v3646_v49 = vld [vmem:[%s4582_s2 + $0xf0] sm:$0xff]  }
  0xaf   : > { %2036 = vmatpush1.bf16.msra.mxu0 %v3596_v34  ;;  %3191 = vmatprep.mubr.msk.bf16.mxu0 %vm327_vm3, %v1966_v5  ;;  %v3624_v34 = vld [vmem:[%s4583_s3 + $0x240] sm:$0xff]   ;;  %v3627_v5 = vld [vmem:[%s4583_s3 + $0x288] sm:$0xff]  }
  0xb0   : > { %2037 = vmatprep.subr.bf16.mxu0 %v3661_v1  ;;  %1775 = vmatpush1.bf16.msra.mxu1 %v3597_v6  ;;  %v2257_v60 = vsel %vm2098_vm8, %v2248_v54, %v4344_v55  ;;  %v2503_v6 = vrot.slane %v3276_v2, 3 }
  0xb1   : > { %1776 = vmatprep.subr.bf16.mxu1 %v3661_v1 }
  0xb3   : > { %2038 = vmatpush1.bf16.msra.mxu0 %v3598_v7  ;;  %v2505_v7 = vsel %vm1044_vm5, %v2503_v6, %v2504_v20 }
  0xb4   : > { %2039 = vmatprep.subr.bf16.mxu0 %v3661_v1  ;;  %1777 = vmatpush1.bf16.msra.mxu1 %v3599_v9  ;;  %v3628_v9 = vld [vmem:[%s4583_s3 + $0x250] sm:$0xff]  }
  0xb5   : > { %1778 = vmatprep.subr.bf16.mxu1 %v3661_v1 }
  0xb7   : > { %2040 = vmatpush1.bf16.msra.mxu0 %v3600_v12  ;;  %v3630_v12 = vld [vmem:[%s4583_s3 + $0x258] sm:$0xff]  }
  0xb8   : > { %2041 = vmatprep.subr.bf16.mxu0 %v3661_v1  ;;  %1779 = vmatpush1.bf16.msra.mxu1 %v3601_v18  ;;  %v3633_v18 = vld [vmem:[%s4583_s3 + $0x2a0] sm:$0xff]  }
  0xb9   : > { %1780 = vmatprep.subr.bf16.mxu1 %v3661_v1 }
  0xbb   : > { %2042 = vmatpush1.bf16.msra.mxu0 %v3602_v22  ;;  %v3632_v22 = vld [vmem:[%s4583_s3 + $0x260] sm:$0xff]  }
  0xbc   : > { %2043 = vmatprep.subr.bf16.mxu0 %v3661_v1  ;;  %1781 = vmatpush1.bf16.msra.mxu1 %v3603_v23  ;;  %v3635_v23 = vld [vmem:[%s4583_s3 + $0x2a8] sm:$0xff]  }
  0xbd   : > { %3435 = vmatprep.subr.bf16.mxu1 %v3607_v27 }
  0xbf   : > { %2044 = vmatpush1.bf16.msra.mxu0 %v3606_v28  ;;  %1795 = vmatmul.mubr.bf16.vlgmr.msra.gmra.mrb[32].mxu1 %v3126_v15  ;;  %v3612_v15 = vld [vmem:[%s4583_s3 + $0x210] sm:$0xff]  }
  0xc0   : > { %2045 = vmatprep.subr.bf16.mxu0 %v3661_v1  ;;  %3436 = vmatpush3.bf16.msra.mxu1 %v3607_v27  ;;  %v2236_v27 = vshll.u32 %v4135_v53, 16 }
  0xc1   : > { %3141 = vmatprep.mubr.msk.bf16.mxu1 %vm327_vm3, %v3129_v30  ;;  %3437 = vmatprep.subr.bf16.mxu1 %v3609_v39  ;;  %v3637_v30 = vld [vmem:[%s4583_s3 + $0x2b0] sm:$0xff]  }
  0xc2   : > { %v2238_v16 = vrot.slane %v2236_v27, 3 }
  0xc3   : > { %2046 = vmatpush1.bf16.msra.mxu0 %v3608_v50  ;;  %v2235_v50 = vrot.slane %v2233_v26, 2 }
  0xc4   : > { %2047 = vmatprep.subr.bf16.mxu0 %v3661_v1  ;;  %3438 = vmatpush3.bf16.msra.mxu1 %v3609_v39  ;;  %v2230_v39 = vrot.slane %v2228_v8, 3 }
  0xc5   : > { %3439 = vmatprep.subr.bf16.mxu1 %v3613_v29  ;;  %v2239_v31 = vor.u32 %v2238_v16, %v2235_v50 }
  0xc6   : > { %v2231_v3 = vor.u32 %v2230_v39, %v2227_v37 }
  0xc7   : > { %2048 = vmatpush1.bf16.msra.mxu0 %v3612_v15  ;;  %1803 = vmatmul.mubr.bf16.gmra.mrb[36].mxu1 %v3128_v42  ;;  %v3643_v15 = vld [vmem:[%s4583_s3 + $0x2c0] sm:$0xff]  }
  0xc8   : > { %2049 = vmatprep.subr.bf16.mxu0 %v3661_v1  ;;  %3440 = vmatpush3.bf16.msra.mxu1 %v3613_v29  ;;  %v3640_v29 = vld [vmem:[%s4583_s3 + $0x2b8] sm:$0xff]   ;;  %v2377_v42 = vld [vmem:[%s3727_s8 + $0x4] sm:$0x8] }
  0xc9   : > { %3443 = vmatprep.mubr.msk.bf16.mxu1 %vm411_vm0, %v2115_v43  ;;  %3466 = vmatprep.subr.msk.bf16.mxu1 %vm418_vm1, %v3615_v46  ;;  %v2240_v43 = vsel %vm2098_vm8, %v2231_v3, %v2239_v31  ;;  %v3644_v46 = vld [vmem:[%s4582_s2 + $0xe8] sm:$0xff]   ;;  %v3248_v47 = vcombine.low %v2377_v42, %v4188_v44  ;;  %v2390_v44 = vrot.slane %v4278_v13, 3  ;;  %vm2737_vm8 = vsmask.f32 3328 }
  0xcb   : > { %2050 = vmatpush1.bf16.msra.mxu0 %v3614_v14  ;;  %v2389_v51 = vrot.slane %v3248_v47, 3 }
  0xcc   : > { %2051 = vmatprep.subr.bf16.mxu0 %v3661_v1  ;;  %3442 = vmatpush3.bf16.msra.mxu1 %v2144_v52 }
  0xcd   : > { %2326 = vmatprep.subr.bf16.mxu1 %v3661_v1  ;;  %v2391_v59 = vsel %vm1044_vm5, %v2389_v51, %v2390_v44 }
  0xcf   : > { %2052 = vmatpush1.bf16.msra.mxu0 %v3616_v57  ;;  %3444 = vmatmul.mubr.msk.bf16.vlgmr.msra.gmra.mrb[40].mxu1 %vm411_vm0, %v2114_v17 }
  0xd0   : > { %2053 = vmatprep.subr.bf16.mxu0 %v3661_v1  ;;  %2327 = vmatpush1.bf16.msra.mxu1 %v3617_v11 }
  0xd1   : > { %3239 = vmatprep.mubr.msk.bf16.mxu1 %vm327_vm3, %v2257_v60  ;;  %2328 = vmatprep.subr.bf16.mxu1 %v3661_v1 }
  0xd3   : > { %2054 = vmatpush1.bf16.msra.mxu0 %v3618_v38 }
  0xd4   : > { %2574 = vmatprep.subr.bf16.mxu0 %v3661_v1  ;;  %2329 = vmatpush1.bf16.msra.mxu1 %v3619_v58 }
  0xd5   : > { %2330 = vmatprep.subr.bf16.mxu1 %v3661_v1 }
  0xd6   : > { %2068 = vmatmul.mubr.bf16.vlgmr.msra.gmra.mrb[36].mxu0 %v1963_v62 }
  0xd7   : > { %2575 = vmatpush1.bf16.msra.mxu0 %v3625_v63  ;;  %3192 = vmatprep.mubr.msk.bf16.mxu0 %vm327_vm3, %v4246_v0  ;;  %v3629_v0 = vld [vmem:[%s4583_s3 + $0x290] sm:$0xff]  }
  0xd8   : > { %2576 = vmatprep.subr.bf16.mxu0 %v3661_v1  ;;  %2331 = vmatpush1.bf16.msra.mxu1 %v3624_v34 }
  0xd9   : > { %2332 = vmatprep.subr.bf16.mxu1 %v3661_v1 }
  0xdb   : > { %2577 = vmatpush1.bf16.msra.mxu0 %v3627_v5 }
  0xdc   : > { %2578 = vmatprep.subr.bf16.mxu0 %v3661_v1  ;;  %2333 = vmatpush1.bf16.msra.mxu1 %v3626_v32 }
  0xdd   : > { %2334 = vmatprep.subr.bf16.mxu1 %v3661_v1 }
  0xde   : > { %2076 = vmatmul.mubr.bf16.gmra.mrb[40].mxu0 %v1962_v4 }
  0xdf   : > { %2579 = vmatpush1.bf16.msra.mxu0 %v3629_v0  ;;  %3287 = vmatprep.mubr.msk.bf16.mxu0 %vm327_vm3, %v2505_v7 }
  0xe0   : > { %2580 = vmatprep.subr.bf16.mxu0 %v3661_v1  ;;  %2335 = vmatpush1.bf16.msra.mxu1 %v3628_v9 }
  0xe1   : > { %2336 = vmatprep.subr.bf16.mxu1 %v3661_v1 }
  0xe3   : > { %2581 = vmatpush1.bf16.msra.mxu0 %v3631_v10 }
  0xe4   : > { %2582 = vmatprep.subr.bf16.mxu0 %v3661_v1  ;;  %2337 = vmatpush1.bf16.msra.mxu1 %v3630_v12 }
  0xe5   : > { %2338 = vmatprep.subr.bf16.mxu1 %v3661_v1 }
  0xe7   : > { %2583 = vmatpush1.bf16.msra.mxu0 %v3633_v18 }
  0xe8   : > { %2584 = vmatprep.subr.bf16.mxu0 %v3661_v1  ;;  %2339 = vmatpush1.bf16.msra.mxu1 %v3632_v22 }
  0xe9   : > { %2340 = vmatprep.subr.bf16.mxu1 %v3661_v1 }
  0xea   : > { %v4435_v28 = vpop.f32.mrb[0].mxu1 }
  0xeb   : > { %2585 = vmatpush1.bf16.msra.mxu0 %v3635_v23  ;;  %v456_v19 = vpop.f32.mrb[1].mxu1 }
  0xec   : > { %2586 = vmatprep.subr.bf16.mxu0 %v3661_v1  ;;  %v3362_v33 = vpop.f32.mrb[2].mxu1  ;;  %2341 = vmatpush1.bf16.msra.mxu1 %v3634_v24 }
  0xed   : > { %v459_v17 = vpop.f32.mrb[3].mxu1  ;;  %2342 = vmatprep.subr.bf16.mxu1 %v3661_v1 }
  0xef   : > { %2587 = vmatpush1.bf16.msra.mxu0 %v3637_v30 }
  0xf0   : > { %2588 = vmatprep.subr.bf16.mxu0 %v3661_v1  ;;  %2343 = vmatpush1.bf16.msra.mxu1 %v3636_v35 }
  0xf1   : > { %2344 = vmatprep.subr.bf16.mxu1 %v3661_v1 }
  0xf3   : > { %2589 = vmatpush1.bf16.msra.mxu0 %v3640_v29 }
  0xf4   : > { %2590 = vmatprep.subr.bf16.mxu0 %v3661_v1  ;;  %2345 = vmatpush1.bf16.msra.mxu1 %v3638_v21 }
  0xf5   : > { %3447 = vmatprep.subr.bf16.mxu1 %v3642_v45 }
  0xf7   : > { %2591 = vmatpush1.bf16.msra.mxu0 %v3643_v15  ;;  %2359 = vmatmul.mubr.bf16.vlgmr.msra.gmra.mrb[44].mxu1 %v2240_v43 }
  0xf8   : > { %2592 = vmatprep.subr.bf16.mxu0 %v3661_v1  ;;  %3448 = vmatpush3.bf16.msra.mxu1 %v3642_v45 }
  0xf9   : > { %3240 = vmatprep.mubr.msk.bf16.mxu1 %vm327_vm3, %v4344_v55  ;;  %3449 = vmatprep.subr.bf16.mxu1 %v3644_v46  ;;  %v3649_v55 = vld [vmem:[%s4582_s2 + $0xf8] ss:$0 sps:$4 sm:$0xff]  }
  0xfa   : > { %v3373_v14 = vpop.f32.mrb[4].mxu1 }
  0xfb   : > { %2593 = vmatpush1.bf16.msra.mxu0 %v3645_v48  ;;  %v572_v52 = vpop.f32.mrb[5].mxu1 }
  0xfc   : > { %v3374_v54 = vpop.f32.mrb[6].mxu1  ;;  %3450 = vmatpush3.bf16.msra.mxu1 %v3644_v46 }
  0xfd   : > { %v575_v57 = vpop.f32.mrb[7].mxu1  ;;  %3451 = vmatprep.subr.bf16.mxu1 %v3646_v49 }
  0xfe   : > { %2607 = vmatmul.mubr.bf16.vlgmr.msra.gmra.mrb[44].mxu0 %v4163_v41  ;;  %v2420_v41 = vsel %vm418_vm1, %v3649_v55, 0 }
  0xff   : > { %3288 = vmatprep.mubr.msk.bf16.mxu0 %vm327_vm3, %v2504_v20  ;;  %2367 = vmatmul.mubr.bf16.gmra.mrb[48].mxu1 %v2239_v31 }
 0x100   : > { %3452 = vmatpush3.bf16.msra.mxu1 %v3646_v49  ;;  %3455 = vmatprep.mubr.msk.bf16.mxu1 %vm411_vm0, %v2391_v59 }
 0x101   : > { %v368_v13 = vpop.f32.mrb[0].mxu0  ;;  %3467 = vmatprep.subr.msk.bf16.mxu1 %vm418_vm1, %v3649_v55 }
 0x102   : > { %v457_v56 = vadd.f32 %v456_v19, %v368_v13  ;;  %v370_v11 = vpop.f32.mrb[1].mxu0 }
 0x103   : > { %v371_v60 = vpop.f32.mrb[2].mxu0 }
 0x104   : > { %v460_v38 = vadd.f32 %v459_v17, %v371_v60  ;;  %v373_v61 = vpop.f32.mrb[3].mxu0  ;;  %v586_v4 = vadd.f32 %v572_v52, %v457_v56  ;;  %3454 = vmatpush3.bf16.msra.mxu1 %v2420_v41 }
 0x106   : > { %2615 = vmatmul.mubr.bf16.gmra.mrb[48].mxu0 %v2501_v36  ;;  %v587_v40 = vadd.f32 %v575_v57, %v460_v38 }
 0x107   : > { %3456 = vmatmul.mubr.msk.bf16.vlgmr.msra.gmra.mrb[52].mxu1 %vm411_vm0, %v2390_v44 }
 0x109   : > { %v376_v58 = vpop.f32.mrb[4].mxu0 }
 0x10a   : > { %v465_v62 = vadd.f32 %v4435_v28, %v376_v58  ;;  %v378_v63 = vpop.f32.mrb[5].mxu0 }
 0x10b   : > { %v379_v2 = vpop.f32.mrb[6].mxu0 }
 0x10c   : > { %v380_v34 = vpop.f32.mrb[7].mxu0  ;;  %v588_v5 = vadd.f32 %v3373_v14, %v465_v62 }
 0x111   : > { %v3385_v6 = vpop.f32.mrb[8].mxu0 }
 0x112   : > { %v859_v20 = vpop.f32.mrb[9].mxu0 }
 0x113   : > { %v3386_v32 = vpop.f32.mrb[10].mxu0 }
 0x114   : > { %v862_v0 = vpop.f32.mrb[11].mxu0 }
 0x122   : > { %v762_v7 = vpop.f32.mrb[8].mxu1 }
 0x123   : > { %v776_v9 = vadd.f32 %v762_v7, %v586_v4  ;;  %v764_v10 = vpop.f32.mrb[9].mxu1 }
 0x124   : > { %v765_v12 = vpop.f32.mrb[10].mxu1 }
 0x125   : > { %v777_v53 = vadd.f32 %v765_v12, %v587_v40  ;;  %v767_v36 = vpop.f32.mrb[11].mxu1  ;;  %v873_v18 = vadd.f32 %v859_v20, %v776_v9 }
 0x127   : > { %v874_v22 = vadd.f32 %v862_v0, %v777_v53 }
 0x12a   : > { %v770_v23 = vpop.f32.mrb[12].mxu1 }
 0x12b   : > { %v778_v24 = vadd.f32 %v770_v23, %v588_v5  ;;  %v772_v25 = vpop.f32.mrb[13].mxu1 }
 0x12c   : > { %v773_v8 = vpop.f32.mrb[14].mxu1 }
 0x12d   : > { %v774_v26 = vpop.f32.mrb[15].mxu1  ;;  %v875_v27 = vadd.f32 %v3385_v6, %v778_v24 }
 0x132   : > { %v3397_v28 = vpop.f32.mrb[16].mxu1 }
 0x133   : > { %v1112_v30 = vpop.f32.mrb[17].mxu1 }
 0x134   : > { %v3398_v19 = vpop.f32.mrb[18].mxu1 }
 0x135   : > { %v1115_v33 = vpop.f32.mrb[19].mxu1 }
 0x139   : > { %v1011_v35 = vpop.f32.mrb[12].mxu0 }
 0x13a   : > { %v1025_v37 = vadd.f32 %v1011_v35, %v873_v18  ;;  %v1013_v39 = vpop.f32.mrb[13].mxu0 }
 0x13b   : > { %v1014_v50 = vpop.f32.mrb[14].mxu0 }
 0x13c   : > { %v1026_v16 = vadd.f32 %v1014_v50, %v874_v22  ;;  %v1016_v17 = vpop.f32.mrb[15].mxu0  ;;  %v1126_v29 = vadd.f32 %v1112_v30, %v1025_v37 }
 0x13e   : > { %v1127_v21 = vadd.f32 %v1115_v33, %v1026_v16 }
 0x141   : > { %v1019_v3 = vpop.f32.mrb[16].mxu0 }
 0x142   : > { %v1027_v31 = vadd.f32 %v1019_v3, %v875_v27  ;;  %v1021_v45 = vpop.f32.mrb[17].mxu0 }
 0x143   : > { %v1022_v15 = vpop.f32.mrb[18].mxu0 }
 0x144   : > { %v1023_v42 = vpop.f32.mrb[19].mxu0  ;;  %v1128_v43 = vadd.f32 %v3397_v28, %v1027_v31 }
 0x149   : > { %v3409_v46 = vpop.f32.mrb[20].mxu0 }
 0x14a   : > { %v1381_v47 = vpop.f32.mrb[21].mxu0 }
 0x14b   : > { %v3410_v48 = vpop.f32.mrb[22].mxu0 }
 0x14c   : > { %v1384_v49 = vpop.f32.mrb[23].mxu0 }
 0x15a   : > { %v1270_v51 = vpop.f32.mrb[20].mxu1 }
 0x15b   : > { %v1284_v44 = vadd.f32 %v1270_v51, %v1126_v29  ;;  %v1272_v14 = vpop.f32.mrb[21].mxu1 }
 0x15c   : > { %v1273_v52 = vpop.f32.mrb[22].mxu1 }
 0x15d   : > { %v1285_v54 = vadd.f32 %v1273_v52, %v1127_v21  ;;  %v1275_v57 = vpop.f32.mrb[23].mxu1  ;;  %v1395_v55 = vadd.f32 %v1381_v47, %v1284_v44 }
 0x15f   : > { %v1396_v59 = vadd.f32 %v1384_v49, %v1285_v54  ;;  %v2625_v54 = vlaneseq }
 0x161   : > { %v2626_v57 = vshrl.u32 %v2625_v54, 7 }
 0x162   : > { %v1278_v13 = vpop.f32.mrb[24].mxu1 }
 0x163   : > { %v1286_v56 = vadd.f32 %v1278_v13, %v1128_v43  ;;  %v1280_v11 = vpop.f32.mrb[25].mxu1 }
 0x164   : > { %v1281_v41 = vpop.f32.mrb[26].mxu1 }
 0x165   : > { %v1282_v60 = vpop.f32.mrb[27].mxu1  ;;  %v1397_v38 = vadd.f32 %v3409_v46, %v1286_v56  ;;  %v4502_v13 = vmul.u32.u64.low 2863311531, %v2626_v57  ;;  %v4503_v56 = vmul.u32.u64.high 2863311531, %v2626_v57, %v4502_v13 }
 0x16a   : > { %v3421_v61 = vpop.f32.mrb[28].mxu1 }
 0x16b   : > { %v1652_v4 = vpop.f32.mrb[29].mxu1 }
 0x16c   : > { %v3422_v40 = vpop.f32.mrb[30].mxu1 }
 0x16d   : > { %v1655_v58 = vpop.f32.mrb[31].mxu1 }
 0x171   : > { %v1561_v62 = vpop.f32.mrb[24].mxu0 }
 0x172   : > { %v1575_v63 = vadd.f32 %v1561_v62, %v1395_v55  ;;  %v1563_v2 = vpop.f32.mrb[25].mxu0  ;;  %v2627_v55 = vadd.s32 8, %v2626_v57 }
 0x173   : > { %v1564_v34 = vpop.f32.mrb[26].mxu0 }
 0x174   : > { %v1576_v5 = vadd.f32 %v1564_v34, %v1396_v59  ;;  %v1566_v6 = vpop.f32.mrb[27].mxu0  ;;  %v1666_v20 = vadd.f32 %v1652_v4, %v1575_v63  ;;  %v2628_v59 = vadd.s32 16, %v2626_v57 }
 0x175   : > { %v4505_v11 = vmul.u32.u64.low 2863311531, %v2627_v55  ;;  %v4506_v41 = vmul.u32.u64.high 2863311531, %v2627_v55, %v4505_v11 }
 0x176   : > { %v1667_v32 = vadd.f32 %v1655_v58, %v1576_v5 }
 0x177   : > { %v2646_v40 = vshrl.u32 %v4506_v41, 2 }
 0x179   : > { %v1569_v0 = vpop.f32.mrb[28].mxu0 }
 0x17a   : > { %v1577_v1 = vadd.f32 %v1569_v0, %v1397_v38  ;;  %v1571_v7 = vpop.f32.mrb[29].mxu0  ;;  %v4508_v60 = vmul.u32.u64.low 2863311531, %v2628_v59  ;;  %v4509_v38 = vmul.u32.u64.high 2863311531, %v2628_v59, %v4508_v60 }
 0x17b   : > { %v1572_v9 = vpop.f32.mrb[30].mxu0 }
 0x17c   : > { %v1573_v10 = vpop.f32.mrb[31].mxu0  ;;  %v1668_v12 = vadd.f32 %v3421_v61, %v1577_v1  ;;  %v2635_v61 = vshrl.u32 %v4503_v56, 2  ;;  %v2657_v2 = vshrl.u32 %v4509_v38, 2 }
 0x17e   : > { %v2636_v6 = vmul.u32 6, %v2635_v61  ;;  %v2658_v0 = vmul.u32 6, %v2657_v2 }
 0x180   : > { %v2637_v7 = vsub.s32 %v2626_v57, %v2636_v6 }
 0x181   : > { %v3433_v53 = vpop.f32.mrb[32].mxu0 }
 0x182   : > { %v1903_v36 = vpop.f32.mrb[33].mxu0  ;;  %vm2662_vm9 = vcmp.ne.s32.totalorder %v2637_v7, 0  ;;  %vm2665_vm10 = vcmp.lt.s32.totalorder %v2637_v7, 0 }
 0x183   : > { %v3434_v18 = vpop.f32.mrb[34].mxu0  ;;  %vm4514_vm13 = vmand %vm2665_vm10, %vm2662_vm9  ;;  %vm2738_vm9 = vsmask.f32 7440 }
 0x184   : > { %v1906_v22 = vpop.f32.mrb[35].mxu0  ;;  %vm4556_vm10 = vmand %vm2773_vm6, %vm2774_vm7 }
 0x192   : > { %v1796_v23 = vpop.f32.mrb[32].mxu1 }
 0x193   : > { %v1810_v24 = vadd.f32 %v1796_v23, %v1666_v20  ;;  %v1798_v25 = vpop.f32.mrb[33].mxu1  ;;  %v2647_v20 = vmul.u32 6, %v2646_v40  ;;  %v2659_v23 = vsub.s32 %v2628_v59, %v2658_v0 }
 0x194   : > { %v1799_v8 = vpop.f32.mrb[34].mxu1 }
 0x195   : > { %v1811_v26 = vadd.f32 %v1799_v8, %v1667_v32  ;;  %v1801_v27 = vpop.f32.mrb[35].mxu1  ;;  %v1917_v28 = vadd.f32 %v1903_v36, %v1810_v24  ;;  %v2671_v8 = vadd.s32 6, %v2637_v7  ;;  %vm2664_vm14 = vcmp.ne.s32.totalorder %v2659_v23, 0 }
 0x196   : > { %vm2667_vm15 = vcmp.lt.s32.totalorder %v2659_v23, 0 }
 0x197   : > { %v1918_v30 = vadd.f32 %v1906_v22, %v1811_v26  ;;  %vm2670_vm2 = vmand %vm2667_vm15, %vm2664_vm14 }
 0x19a   : > { %v1804_v19 = vpop.f32.mrb[36].mxu1 }
 0x19b   : > { %v1812_v33 = vadd.f32 %v1804_v19, %v1668_v12  ;;  %v1806_v35 = vpop.f32.mrb[37].mxu1  ;;  %v2648_v12 = vsub.s32 %v2627_v55, %v2647_v20 }
 0x19c   : > { %v1807_v37 = vpop.f32.mrb[38].mxu1 }
 0x19d   : > { %v1808_v39 = vpop.f32.mrb[39].mxu1  ;;  %v1919_v50 = vadd.f32 %v3433_v53, %v1812_v33  ;;  %vm2663_vm11 = vcmp.ne.s32.totalorder %v2648_v12, 0  ;;  %vm2666_vm12 = vcmp.lt.s32.totalorder %v2648_v12, 0  ;;  %v2672_v27 = vadd.s32 6, %v2648_v12 }
 0x19e   : > { %vm4518_vm0 = vmand %vm2666_vm12, %vm2663_vm11  ;;  %v2673_v33 = vadd.s32 6, %v2659_v23 }
 0x19f   : > { %vm2739_vm11 = vmor %vm2737_vm8, %vm2738_vm9 }
 0x1a0   : > { %vm2782_vm12 = vmand %vm418_vm1, %vm2737_vm8 }
 0x1a2   : > { %v3445_v16 = vpop.f32.mrb[40].mxu1 }
 0x1a3   : > { %v2180_v17 = vpop.f32.mrb[41].mxu1 }
 0x1a4   : > { %v3446_v29 = vpop.f32.mrb[42].mxu1 }
 0x1a5   : > { %v2183_v21 = vpop.f32.mrb[43].mxu1 }
 0x1a9   : > { %v2069_v3 = vpop.f32.mrb[36].mxu0 }
 0x1aa   : > { %v2083_v31 = vadd.f32 %v2069_v3, %v1917_v28  ;;  %v2071_v45 = vpop.f32.mrb[37].mxu0 }
 0x1ab   : > { %v2072_v15 = vpop.f32.mrb[38].mxu0 }
 0x1ac   : > { %v2084_v42 = vadd.f32 %v2072_v15, %v1918_v30  ;;  %v2074_v43 = vpop.f32.mrb[39].mxu0  ;;  %v2194_v46 = vadd.f32 %v2180_v17, %v2083_v31  ;;  %v2674_v17 = vsel %vm4514_vm13, %v2671_v8, %v2637_v7  ;;  %v2676_v15 = vsel %vm2670_vm2, %v2673_v33, %v2659_v23 }
 0x1ad   : > { %vm4526_vm3 = vcmp.lt.s32.totalorder %v2674_v17, 4  ;;  %vm4534_vm5 = vcmp.lt.s32.totalorder %v2676_v15, 4 }
 0x1ae   : > { %v2195_v47 = vadd.f32 %v2183_v21, %v2084_v42  ;;  %v2675_v21 = vsel %vm4518_vm0, %v2672_v27, %v2648_v12 }
 0x1af   : > { %vm4530_vm4 = vcmp.lt.s32.totalorder %v2675_v21, 4 }
 0x1b1   : > { %v2077_v48 = vpop.f32.mrb[40].mxu0 }
 0x1b2   : > { %v2085_v49 = vadd.f32 %v2077_v48, %v1919_v50  ;;  %v2079_v51 = vpop.f32.mrb[41].mxu0 }
 0x1b3   : > { %v2080_v44 = vpop.f32.mrb[42].mxu0 }
 0x1b4   : > { %v2081_v14 = vpop.f32.mrb[43].mxu0  ;;  %v2196_v52 = vadd.f32 %v3445_v16, %v2085_v49 }
 0x1ca   : > { %v2360_v4 = vpop.f32.mrb[44].mxu1 }
 0x1cb   : > { %v2374_v58 = vadd.f32 %v2360_v4, %v2194_v46  ;;  %v2362_v62 = vpop.f32.mrb[45].mxu1 }
 0x1cc   : > { %v2363_v63 = vpop.f32.mrb[46].mxu1 }
 0x1cd   : > { %v2375_v34 = vadd.f32 %v2363_v63, %v2195_v47  ;;  %v2365_v5 = vpop.f32.mrb[47].mxu1 }
 0x1d1   : > { %v2608_v32 = vpop.f32.mrb[44].mxu0 }
 0x1d2   : > { %v2610_v1 = vpop.f32.mrb[45].mxu0  ;;  %v2368_v9 = vpop.f32.mrb[48].mxu1 }
 0x1d3   : > { %v2611_v10 = vpop.f32.mrb[46].mxu0  ;;  %v2376_v53 = vadd.f32 %v2368_v9, %v2196_v52  ;;  %v2370_v36 = vpop.f32.mrb[49].mxu1 }
 0x1d4   : > { %v2613_v18 = vpop.f32.mrb[47].mxu0  ;;  %v2371_v22 = vpop.f32.mrb[50].mxu1 }
 0x1d5   : > { %v2372_v24 = vpop.f32.mrb[51].mxu1 }
 0x1d9   : > { %v2616_v26 = vpop.f32.mrb[48].mxu0 }
 0x1da   : > { %v2618_v30 = vpop.f32.mrb[49].mxu0  ;;  %v3457_v19 = vpop.f32.mrb[52].mxu1 }
 0x1db   : > { %v2619_v35 = vpop.f32.mrb[50].mxu0  ;;  %v2472_v37 = vadd.f32 %v3457_v19, %v2376_v53  ;;  %v2456_v39 = vpop.f32.mrb[53].mxu1 }
 0x1dc   : > { %v2620_v50 = vpop.f32.mrb[51].mxu0  ;;  %v2470_v16 = vadd.f32 %v2456_v39, %v2374_v58  ;;  %v3458_v29 = vpop.f32.mrb[54].mxu1 }
 0x1dd   : > { %v2624_v3 = vadd.f32 %v2616_v26, %v2472_v37  ;;  %v2459_v31 = vpop.f32.mrb[55].mxu1 }
 0x1de   : > { %v2622_v45 = vadd.f32 %v2608_v32, %v2470_v16  ;;  %v2471_v42 = vadd.f32 %v2459_v31, %v2375_v34  ;;  %v2776_v16 = vld [vmem:[%s4496_s17] sm:$0x8] }
 0x1df   : > { %v2688_v14 = vsel %vm4534_vm5, %v2624_v3, 0.0 }
 0x1e0   : > { %v2623_v47 = vadd.f32 %v2611_v10, %v2471_v42  ;;  %v2686_v49 = vsel %vm4526_vm3, %v2622_v45, 0.0 }
 0x1e2   : > { %v2687_v51 = vsel %vm4530_vm4, %v2623_v47, 0.0 }
 0x1e3   : > { %v2689_v44 = vadd.f32 %v2687_v51, %v2686_v49  ;;  %v2783_v49 = vld [vmem:[%s4496_s17 + $0xc] sm:$0xf] }
 0x1e5   : > { %v2690_v52 = vadd.f32 %v2689_v44, %v2688_v14 }
 0x1e7   : > { %v2691_v54 = vrot.slane %v2690_v52, 4 }
 0x1e9   : > { %v2692_v57 = vadd.f32 %v2691_v54, %v2690_v52 }
 0x1eb   : > { %v2693_v55 = vrot.slane %v2692_v57, 2 }
 0x1ed   : > { %v2694_v59 = vadd.f32 %v2693_v55, %v2692_v57 }
 0x1ef   : > { %v2695_v13 = vrot.slane %v2694_v59, 1 }
 0x1f1   : > { %v2696_v56 = vadd.f32 %v2695_v13, %v2694_v59 }
 0x1f3   : > { %v2697_v11 = vmul.f32 0.0625, %v2696_v56 }
 0x1f5   : > { %v2698_v41 = vsub.f32 %v2622_v45, %v2697_v11  ;;  %v2699_v60 = vsub.f32 %v2623_v47, %v2697_v11  ;;  %v2700_v38 = vsub.f32 %v2624_v3, %v2697_v11 }
 0x1f7   : > { %v2701_v61 = vmul.f32 %v2698_v41, %v2698_v41  ;;  %v2702_v4 = vmul.f32 %v2699_v60, %v2699_v60  ;;  %v2703_v40 = vmul.f32 %v2700_v38, %v2700_v38 }
 0x1f9   : > { %v2704_v58 = vsel %vm4526_vm3, %v2701_v61, 0.0  ;;  %v2705_v62 = vsel %vm4530_vm4, %v2702_v4, 0.0  ;;  %v2706_v2 = vsel %vm4534_vm5, %v2703_v40, 0.0 }
 0x1fa   : > { %v2707_v63 = vadd.f32 %v2705_v62, %v2704_v58 }
 0x1fc   : > { %v2708_v34 = vadd.f32 %v2707_v63, %v2706_v2 }
 0x1fe   : > { %v2709_v5 = vrot.slane %v2708_v34, 4 }
 0x200   : > { %v2710_v6 = vadd.f32 %v2709_v5, %v2708_v34 }
 0x202   : > { %v2711_v20 = vrot.slane %v2710_v6, 2 }
 0x204   : > { %v2712_v32 = vadd.f32 %v2711_v20, %v2710_v6 }
 0x206   : > { %v2713_v0 = vrot.slane %v2712_v32, 1 }
 0x208   : > { %v2714_v1 = vadd.f32 %v2713_v0, %v2712_v32 }
 0x20a   : > { %v2715_v7 = vmul.f32 0.0625, %v2714_v1 }
 0x20c   : > { %v2716_v9 = vadd.f32 1e-05, %v2715_v7 }
 0x20e   : > { %3651 = vrsqrt.f32 %v2716_v9 }
 0x218   : > { %v3652_v10 = vpop.eup %3651 }
 0x219   : > { %v2718_v12 = vmul.f32 %v3652_v10, %v2698_v41  ;;  %v2719_v53 = vmul.f32 %v3652_v10, %v2699_v60  ;;  %v2720_v36 = vmul.f32 %v3652_v10, %v2700_v38 }
 0x21b   : > { %v2721_v18 = vmax.f32 %v2718_v12, 0.0  ;;  %v2722_v22 = vmax.f32 %v2719_v53, 0.0  ;;  %v2723_v23 = vmax.f32 %v2720_v36, 0.0 }
 0x21d   : > { %v2724_v24 = vsel %vm4526_vm3, %v2721_v18, 0.0  ;;  %v2725_v25 = vsel %vm4530_vm4, %v2722_v22, 0.0  ;;  %v2726_v8 = vsel %vm4534_vm5, %v2723_v23, 0.0 }
 0x21e   : > { %v3294_v26 = vpack.c.bf16 %v2724_v24, %v2724_v24  ;;  %v3295_v27 = vpack.c.bf16 %v2725_v25, %v2725_v25  ;;  %v3296_v28 = vpack.c.bf16 %v2726_v8, %v2726_v8 }
 0x220   : > { %v2741_v30 = vshll.u32 %v3294_v26, 16  ;;  %v2744_v19 = vshrl.u32 %v3294_v26, 16  ;;  %v2750_v33 = vshll.u32 %v3295_v27, 16  ;;  %v2754_v35 = vshrl.u32 %v3295_v27, 16 }
 0x221   : > { %v2760_v37 = vshll.u32 %v3296_v28, 16  ;;  %v2764_v39 = vshrl.u32 %v3296_v28, 16 }
 0x222   : > { %v2743_v17 = vrot.slane %v2741_v30, 5  ;;  %v2746_v29 = vrot.slane %v2744_v19, 4  ;;  %v2752_v21 = vrot.slane %v2750_v33, 5  ;;  %v2756_v3 = vrot.slane %v2754_v35, 4 }
 0x223   : > { %v2762_v31 = vrot.slane %v2760_v37, 5  ;;  %v2766_v45 = vrot.slane %v2764_v39, 4 }
 0x224   : > { %v2747_v15 = vor.u32 %v2746_v29, %v2743_v17  ;;  %v2757_v42 = vor.u32 %v2756_v3, %v2752_v21  ;;  %v2777_v43 = vsel %vm4556_vm10, %v2743_v17, %v2776_v16 }
 0x225   : > { %v2767_v46 = vor.u32 %v2766_v45, %v2762_v31  ;;  %2778 = vst [vmem:[%s4496_s17] sm:$0x8] %v2777_v43 }
 0x226   : > { %v2748_v47 = vrot.slane %v2747_v15, 4  ;;  %v2758_v48 = vrot.slane %v2757_v42, 4 }
 0x227   : > { %v2768_v51 = vrot.slane %v2767_v46, 4 }
 0x228   : > { %v2753_v44 = vsel %vm2739_vm11, %v2748_v47, %v2752_v21  ;;  %v2763_v14 = vsel %vm2739_vm11, %v2758_v48, %v2762_v31 }
 0x229   : > { %2779 = vst [vmem:[%s4496_s17 + $0x4] sm:$0xf] %v2753_v44  ;;  %2780 = vst [vmem:[%s4496_s17 + $0x8] sm:$0xf] %v2763_v14  ;;  %v2784_v52 = vsel %vm2782_vm12, %v2768_v51, %v2783_v49 }
 0x22a   : > { %2785 = vst [vmem:[%s4496_s17 + $0xc] sm:$0xf] %v2784_v52 }
 0x22c   : > { %v2786_v54 = vld [vmem:[%s4496_s17] sm:$0xf] }
 0x22d   : > { %v2787_v57 = vsel %vm2782_vm12, 0, %v2786_v54 }
 0x22e   : > { %2788 = vst [vmem:[%s4496_s17] sm:$0xf] %v2787_v57 }
 0x231   : > { %v2789_v55 = vld [vmem:[%s4496_s17 + $0xc] sm:$0x8] }
 0x232   : > { %v2790_v59 = vsel %vm4556_vm10, 0, %v2789_v55 }
 0x233   : > { %2791 = vst [vmem:[%s4496_s17 + $0xc] sm:$0x8] %v2790_v59 }
 0x234 PF: > { %s14_s15 = sadd.s32 1, %s3659_s15  }
 0x235   : > { %p11_p4 = scmp.ge.s32.totalorder %s14_s15, 4  }
 0x237   :  { %13 = sbr.rel (!%p11_p4) target bundleno = 1 (0x1), region = 85 }

// kernel: encoder_forward.9
= control target key start
LH: loop header
LB: loop body
LE: loop exit
PB: predicated region body
PF: predicated region fallthrough
CT: control target
= control target key end

     0   :  { %s844_s12 = smov 0   ;;  %s1108_s0 = inlined_call_operand.vmem [shape: bf16[96,128], index: 0, kind: input, shape index: {}]   ;;  %s1109_s1 = inlined_call_operand.vmem [shape: bf16[128,128], index: 1, kind: input, shape index: {}]   ;;  %s1110_s2 = inlined_call_operand.vmem [shape: f32[1,128], index: 2, kind: input, shape index: {}]   ;;  %s1111_s3 = inlined_call_operand.vmem [shape: f32[96,128], index: 3, kind: output, shape index: {}]  }
   0x1 LB: > { %s679_s13 = sadd.s32 4294967295, %s813_s12   ;;  %p683_p0 = scmp.ge.s32.totalorder %s813_s12, 1  ;;  %s813_s12 = sphi %s844_s12, %s13_s12  }
   0x2   : > { %p138_p1 = scmp.lt.s32.totalorder %s813_s12, 3 }
   0x4   : > { %p139_p2 = pnand %p683_p0, %p138_p1 }
   0x5   : > { %v772_v0 = vld [vmem:[%s1109_s1] sm:$0xff] (!%p139_p2)   ;;  %v815_v1 = vmov (!%p139_p2), 0.0   ;;  %v773_v2 = vld [vmem:[%s1109_s1 + $0x8] sm:$0xff] (!%p139_p2)   ;;  %s162_s18 = smul.u32 (!%p139_p2), 6, %s679_s13  ;;  %vm816_vm0 = vmmov (!%p139_p2), 0   ;;  %v774_v3 = vld [vmem:[%s1109_s1 + $0x10] sm:$0xff] (!%p139_p2)  }
   0x6   : > { %142 = sbr.rel (%p139_p2) target bundleno = 890 (0x37a), region = 32  ;;  %711 = vmatprep.subr.bf16.mxu0 (!%p139_p2), %v815_v1  ;;  %739 = vmatprep.subr.bf16.mxu1 (!%p139_p2), %v815_v1  ;;  %v775_v4 = vld [vmem:[%s1109_s1 + $0x18] sm:$0xff] (!%p139_p2)   ;;  %v776_v5 = vld [vmem:[%s1109_s1 + $0x20] sm:$0xff] (!%p139_p2)   ;;  %v777_v6 = vld [vmem:[%s1109_s1 + $0x28] sm:$0xff] (!%p139_p2)   ;;  %vm327_vm1 = vcmask (!%p139_p2), 97280   ;;  %s817_s10 = smov (!%p139_p2), 12  }
   0x7   : > { %712 = vmatpush3.bf16.msra.mxu0 (!%p139_p2), %v772_v0  ;;  %747 = vmatpush3.bf16.msra.mxu1 (!%p139_p2), %v772_v0  ;;  %p163_p3 = scmp.lt.s32.totalorder (!%p139_p2), %s162_s18, 11  ;;  %v778_v7 = vld [vmem:[%s1109_s1 + $0x30] sm:$0xff] (!%p139_p2)   ;;  %v779_v8 = vld [vmem:[%s1109_s1 + $0x38] sm:$0xff] (!%p139_p2)   ;;  %v686_v12 = vld [vmem:[%s1110_s2] ss:$0 sm:$0xff] (!%p139_p2)  ;;  %s818_s11 = smov (!%p139_p2), 24  }
   0x8   : > { %713 = vmatprep.subr.bf16.mxu0 (!%p139_p2), %v815_v1  ;;  %740 = vmatprep.subr.bf16.mxu1 (!%p139_p2), %v815_v1  ;;  %s819_s13 = smov (!%p139_p2), 36   ;;  %s820_s14 = smov (!%p139_p2), 48   ;;  %vm532_vm2 = vcmask (!%p139_p2), 195584   ;;  %vm539_vm3 = vcmask (!%p139_p2), 293888   ;;  %vm546_vm4 = vcmask (!%p139_p2), 392192   ;;  %vm553_vm5 = vcmask (!%p139_p2), 490496  }
   0x9   : > { %727 = vmatprep.mubr.msk.bf16.mxu0 (!%p139_p2), %vm816_vm0, %v815_v1  ;;  %731 = vmatprep.mubr.msk.bf16.mxu1 (!%p139_p2), %vm816_vm0, %v815_v1  ;;  %s821_s15 = smov (!%p139_p2), 60   ;;  %s822_s16 = smov (!%p139_p2), 72   ;;  %vm560_vm6 = vcmask (!%p139_p2), 588800   ;;  %vm567_vm7 = vcmask (!%p139_p2), 687104   ;;  %vm610_vm8 = vcmask (!%p139_p2), 883712  }
   0xa   : > { %s823_s17 = smov (!%p139_p2), 84  }
   0xb   : > { %714 = vmatpush3.bf16.msra.mxu0 (!%p139_p2), %v773_v2  ;;  %748 = vmatpush3.bf16.msra.mxu1 (!%p139_p2), %v773_v2 }
   0xc   : > { %715 = vmatprep.subr.bf16.mxu0 (!%p139_p2), %v815_v1  ;;  %741 = vmatprep.subr.bf16.mxu1 (!%p139_p2), %v815_v1 }
   0xd   : > { %s1113_s18 = smov (!%p163_p3, %s162_s18), 11 }
   0xe   : > { %s684_s21 = sshll.u32 %s1113_s18, 2  ;;  %s685_s19 = sshll.u32 %s1113_s18, 3 }
   0xf   : > { %s869_s24 = scalar_lea.vmem %s1108_s0, %s684_s21  ;;  %716 = vmatpush3.bf16.msra.mxu0 %v774_v3  ;;  %749 = vmatpush3.bf16.msra.mxu1 %v774_v3  ;;  %s172_s22 = scalar_lea.vmem %s1111_s3, %s685_s19 }
  0x10   : > { %717 = vmatprep.subr.bf16.mxu0 %v815_v1  ;;  %742 = vmatprep.subr.bf16.mxu1 %v815_v1  ;;  %v780_v9 = vld [vmem:[%s869_s24] sm:$0xff]   ;;  %v781_v10 = vld [vmem:[%s869_s24 + $0x8] sm:$0xff]   ;;  %v782_v11 = vld [vmem:[%s869_s24 + $0x10] sm:$0xff]  }
  0x13   : > { %718 = vmatpush3.bf16.msra.mxu0 %v775_v4  ;;  %750 = vmatpush3.bf16.msra.mxu1 %v775_v4 }
  0x14   : > { %719 = vmatprep.subr.bf16.mxu0 %v815_v1  ;;  %743 = vmatprep.subr.bf16.mxu1 %v815_v1 }
  0x17   : > { %720 = vmatpush3.bf16.msra.mxu0 %v776_v5  ;;  %751 = vmatpush3.bf16.msra.mxu1 %v776_v5 }
  0x18   : > { %721 = vmatprep.subr.bf16.mxu0 %v815_v1  ;;  %744 = vmatprep.subr.bf16.mxu1 %v815_v1 }
  0x1b   : > { %722 = vmatpush3.bf16.msra.mxu0 %v777_v6  ;;  %752 = vmatpush3.bf16.msra.mxu1 %v777_v6 }
  0x1c   : > { %723 = vmatprep.subr.bf16.mxu0 %v815_v1  ;;  %745 = vmatprep.subr.bf16.mxu1 %v815_v1 }
  0x1f   : > { %724 = vmatpush3.bf16.msra.mxu0 %v778_v7  ;;  %753 = vmatpush3.bf16.msra.mxu1 %v778_v7 }
  0x20   : > { %725 = vmatprep.subr.bf16.mxu0 %v815_v1  ;;  %746 = vmatprep.subr.bf16.mxu1 %v815_v1 }
  0x23   : > { %726 = vmatpush3.bf16.msra.mxu0 %v779_v8  ;;  %754 = vmatpush3.bf16.msra.mxu1 %v779_v8 }
  0x26   : > { %728 = vmatmul.mubr.bf16.vlgmr.msra.gmra.mrb[0].mxu0 %v780_v9  ;;  %732 = vmatmul.mubr.bf16.vlgmr.msra.gmra.mrb[0].mxu1 %v781_v10 }
  0x27   : > { %735 = vmatprep.mubr.msk.bf16.mxu1 %vm816_vm0, %v815_v1 }
  0x2e   : > { %736 = vmatmul.mubr.bf16.gmra.mrb[4].mxu1 %v782_v11 }
  0xf9   : > { %v304_v13 = vpop.f32.mrb[0].mxu0  ;;  %v312_v14 = vpop.f32.mrb[0].mxu1 }
  0xfa   : > { %v893_v15 = vadd.f32 %v686_v12, %v304_v13  ;;  %v895_v16 = vadd.f32 %v686_v12, %v312_v14  ;;  %v729_v17 = vpop.f32.mrb[1].mxu0  ;;  %v733_v18 = vpop.f32.mrb[1].mxu1 }
  0xfb   : > { %v307_v19 = vpop.f32.mrb[2].mxu0  ;;  %v315_v20 = vpop.f32.mrb[2].mxu1 }
  0xfc   : > { %v897_v21 = vadd.f32 %v686_v12, %v307_v19  ;;  %v730_v22 = vpop.f32.mrb[3].mxu0  ;;  %v899_v23 = vadd.f32 %v686_v12, %v315_v20  ;;  %v334_v24 = vsel %vm327_vm1, %v895_v16, -inf  ;;  %v734_v25 = vpop.f32.mrb[3].mxu1  ;;  %v328_v26 = vsel %vm327_vm1, %v893_v15, -inf }
  0xfd   : > { %335 = vmax.xlane.f32.xlu1 %v334_v24  ;;  %329 = vmax.xlane.f32.xlu0 %v328_v26 }
  0xfe   : > { %v337_v27 = vsel %vm327_vm1, %v899_v23, -inf  ;;  %v331_v28 = vsel %vm327_vm1, %v897_v21, -inf }
 0x101   : > { %338 = vmax.xlane.f32.xlu1 %v337_v27  ;;  %v320_v29 = vpop.f32.mrb[4].mxu1  ;;  %332 = vmax.xlane.f32.xlu0 %v331_v28 }
 0x102   : > { %v909_v30 = vadd.f32 %v686_v12, %v320_v29  ;;  %v737_v31 = vpop.f32.mrb[5].mxu1 }
 0x103   : > { %v323_v32 = vpop.f32.mrb[6].mxu1 }
 0x104   : > { %v911_v33 = vadd.f32 %v686_v12, %v323_v32  ;;  %v340_v34 = vsel %vm327_vm1, %v909_v30, -inf  ;;  %v738_v35 = vpop.f32.mrb[7].mxu1 }
 0x105   : > { %341 = vmax.xlane.f32.xlu0 %v340_v34 }
 0x106   : > { %v343_v36 = vsel %vm327_vm1, %v911_v33, -inf }
 0x107   : > { %344 = vmax.xlane.f32.xlu1 %v343_v36 }
 0x18a   : > { %v336_v37 = vpop.xlane.xlu1 %335  ;;  %v330_v38 = vpop.xlane.xlu0 %329 }
 0x18b   : > { %v348_v39 = vsub.f32 %v895_v16, %v336_v37  ;;  %v346_v40 = vsub.f32 %v893_v15, %v330_v38 }
 0x18d   : > { %v352_v41 = vmul.f32 1.442695, %v346_v40  ;;  %v356_v42 = vmul.f32 1.442695, %v348_v39 }
 0x18e   : > { %v339_v43 = vpop.xlane.xlu1 %338  ;;  %v333_v44 = vpop.xlane.xlu0 %332 }
 0x18f   : > { %v349_v45 = vsub.f32 %v899_v23, %v339_v43  ;;  %v347_v46 = vsub.f32 %v897_v21, %v333_v44  ;;  %783 = vpow2.f32 %v352_v41 }
 0x190   : > { %785 = vpow2.f32 %v356_v42 }
 0x191   : > { %v354_v47 = vmul.f32 1.442695, %v347_v46  ;;  %v358_v48 = vmul.f32 1.442695, %v349_v45 }
 0x192   : > { %v342_v49 = vpop.xlane.xlu0 %341 }
 0x193   : > { %v350_v50 = vsub.f32 %v909_v30, %v342_v49  ;;  %787 = vpow2.f32 %v354_v47 }
 0x194   : > { %v345_v51 = vpop.xlane.xlu1 %344  ;;  %789 = vpow2.f32 %v358_v48 }
 0x195   : > { %v360_v52 = vmul.f32 1.442695, %v350_v50  ;;  %v351_v53 = vsub.f32 %v911_v33, %v345_v51 }
 0x197   : > { %791 = vpow2.f32 %v360_v52  ;;  %v362_v54 = vmul.f32 1.442695, %v351_v53 }
 0x199   : > { %v784_v55 = vpop.eup %783  ;;  %793 = vpow2.f32 %v362_v54 }
 0x19a   : > { %v364_v56 = vsel %vm327_vm1, %v784_v55, 0.0  ;;  %v786_v57 = vpop.eup %785 }
 0x19b   : > { %365 = vadd.xlane.f32.xlu0 %v364_v56  ;;  %v370_v59 = vsel %vm327_vm1, %v786_v57, 0.0 }
 0x19d   : > { %v788_v58 = vpop.eup %787 }
 0x19e   : > { %v367_v60 = vsel %vm327_vm1, %v788_v58, 0.0  ;;  %v790_v61 = vpop.eup %789 }
 0x19f   : > { %371 = vadd.xlane.f32.xlu0 %v370_v59  ;;  %368 = vadd.xlane.f32.xlu1 %v367_v60  ;;  %v373_v0 = vsel %vm327_vm1, %v790_v61, 0.0 }
 0x1a1   : > { %v792_v62 = vpop.eup %791 }
 0x1a2   : > { %v376_v63 = vsel %vm327_vm1, %v792_v62, 0.0 }
 0x1a3   : > { %v928_v1 = vpop.eup %793  ;;  %374 = vadd.xlane.f32.xlu1 %v373_v0  ;;  %377 = vadd.xlane.f32.xlu0 %v376_v63 }
 0x1a4   : > { %v379_v2 = vsel %vm327_vm1, %v928_v1, 0.0 }
 0x1a7   : > { %380 = vadd.xlane.f32.xlu1 %v379_v2 }
 0x228   : > { %v366_v3 = vpop.xlane.xlu0 %365 }
 0x229   : > { %795 = vrcp.f32 %v366_v3 }
 0x22c   : > { %v369_v4 = vpop.xlane.xlu1 %368  ;;  %v372_v5 = vpop.xlane.xlu0 %371 }
 0x22d   : > { %797 = vrcp.f32 %v372_v5 }
 0x22e   : > { %799 = vrcp.f32 %v369_v4 }
 0x230   : > { %v375_v6 = vpop.xlane.xlu1 %374  ;;  %v378_v17 = vpop.xlane.xlu0 %377 }
 0x231   : > { %801 = vrcp.f32 %v375_v6 }
 0x232   : > { %803 = vrcp.f32 %v378_v17 }
 0x233   : > { %v796_v7 = vpop.eup %795 }
 0x234   : > { %v932_v8 = vmul.f32 %v796_v7, %v784_v55  ;;  %v381_v19 = vpop.xlane.xlu1 %380 }
 0x235   : > { %805 = vrcp.f32 %v381_v19 }
 0x236   : > { %400 = vrot.lane.b32.xlu0 %v932_v8, %s817_s10 }
 0x237   : > { %v798_v9 = vpop.eup %797 }
 0x238   : > { %v936_v10 = vmul.f32 %v798_v9, %v786_v57  ;;  %v800_v11 = vpop.eup %799 }
 0x239   : > { %v942_v12 = vmul.f32 %v800_v11, %v788_v58 }
 0x23a   : > { %418 = vrot.lane.b32.xlu0 %v932_v8, %s818_s11  ;;  %404 = vrot.lane.b32.xlu1 %v936_v10, %s817_s10 }
 0x23b   : > { %v802_v13 = vpop.eup %801 }
 0x23c   : > { %v948_v14 = vmul.f32 %v802_v13, %v790_v61  ;;  %v804_v18 = vpop.eup %803 }
 0x23d   : > { %v988_v20 = vmul.f32 %v804_v18, %v792_v62 }
 0x23e   : > { %422 = vrot.lane.b32.xlu0 %v936_v10, %s818_s11  ;;  %402 = vrot.lane.b32.xlu1 %v942_v12, %s817_s10 }
 0x23f   : > { %v806_v22 = vpop.eup %805 }
 0x240   : > { %v1001_v24 = vmul.f32 %v806_v22, %v928_v1 }
 0x242   : > { %436 = vrot.lane.b32.xlu0 %v932_v8, %s819_s13  ;;  %406 = vrot.lane.b32.xlu1 %v948_v14, %s817_s10 }
 0x246   : > { %440 = vrot.lane.b32.xlu0 %v936_v10, %s819_s13  ;;  %420 = vrot.lane.b32.xlu1 %v942_v12, %s818_s11 }
 0x24a   : > { %454 = vrot.lane.b32.xlu0 %v932_v8, %s820_s14  ;;  %424 = vrot.lane.b32.xlu1 %v948_v14, %s818_s11 }
 0x24e   : > { %458 = vrot.lane.b32.xlu0 %v936_v10, %s820_s14  ;;  %438 = vrot.lane.b32.xlu1 %v942_v12, %s819_s13 }
 0x252   : > { %472 = vrot.lane.b32.xlu0 %v932_v8, %s821_s15  ;;  %442 = vrot.lane.b32.xlu1 %v948_v14, %s819_s13 }
 0x256   : > { %476 = vrot.lane.b32.xlu0 %v936_v10, %s821_s15  ;;  %456 = vrot.lane.b32.xlu1 %v942_v12, %s820_s14 }
 0x25a   : > { %490 = vrot.lane.b32.xlu0 %v932_v8, %s822_s16  ;;  %460 = vrot.lane.b32.xlu1 %v948_v14, %s820_s14 }
 0x25e   : > { %494 = vrot.lane.b32.xlu0 %v936_v10, %s822_s16  ;;  %474 = vrot.lane.b32.xlu1 %v942_v12, %s821_s15 }
 0x262   : > { %508 = vrot.lane.b32.xlu0 %v932_v8, %s823_s17  ;;  %478 = vrot.lane.b32.xlu1 %v948_v14, %s821_s15 }
 0x266   : > { %512 = vrot.lane.b32.xlu0 %v936_v10, %s823_s17  ;;  %492 = vrot.lane.b32.xlu1 %v942_v12, %s822_s16 }
 0x26a   : > { %408 = vrot.lane.b32.xlu0 %v988_v20, %s817_s10  ;;  %496 = vrot.lane.b32.xlu1 %v948_v14, %s822_s16 }
 0x26e   : > { %426 = vrot.lane.b32.xlu0 %v988_v20, %s818_s11  ;;  %510 = vrot.lane.b32.xlu1 %v942_v12, %s823_s17 }
 0x272   : > { %444 = vrot.lane.b32.xlu0 %v988_v20, %s819_s13  ;;  %514 = vrot.lane.b32.xlu1 %v948_v14, %s823_s17 }
 0x276   : > { %462 = vrot.lane.b32.xlu0 %v988_v20, %s820_s14  ;;  %410 = vrot.lane.b32.xlu1 %v1001_v24, %s817_s10 }
 0x27a   : > { %480 = vrot.lane.b32.xlu0 %v988_v20, %s821_s15  ;;  %428 = vrot.lane.b32.xlu1 %v1001_v24, %s818_s11 }
 0x27e   : > { %498 = vrot.lane.b32.xlu0 %v988_v20, %s822_s16  ;;  %446 = vrot.lane.b32.xlu1 %v1001_v24, %s819_s13 }
 0x282   : > { %516 = vrot.lane.b32.xlu0 %v988_v20, %s823_s17  ;;  %464 = vrot.lane.b32.xlu1 %v1001_v24, %s820_s14 }
 0x286   : > { %482 = vrot.lane.b32.xlu1 %v1001_v24, %s821_s15 }
 0x28a   : > { %500 = vrot.lane.b32.xlu1 %v1001_v24, %s822_s16 }
 0x28e   : > { %518 = vrot.lane.b32.xlu1 %v1001_v24, %s823_s17 }
 0x2a8   : > { %v401_v25 = vpop.permute.xlu0 %400 }
 0x2a9   : > { %v526_v46 = vsel %vm327_vm1, %v932_v8, %v401_v25 }
 0x2ac   : > { %v419_v26 = vpop.permute.xlu0 %418  ;;  %v405_v27 = vpop.permute.xlu1 %404 }
 0x2ad   : > { %v533_v47 = vsel %vm532_vm2, %v526_v46, %v419_v26  ;;  %v528_v52 = vsel %vm327_vm1, %v936_v10, %v405_v27 }
 0x2b0   : > { %v423_v28 = vpop.permute.xlu0 %422  ;;  %v403_v29 = vpop.permute.xlu1 %402 }
 0x2b1   : > { %v535_v54 = vsel %vm532_vm2, %v528_v52, %v423_v28  ;;  %v527_v2 = vsel %vm327_vm1, %v942_v12, %v403_v29 }
 0x2b4   : > { %v437_v31 = vpop.permute.xlu0 %436  ;;  %v407_v32 = vpop.permute.xlu1 %406 }
 0x2b5   : > { %v540_v49 = vsel %vm539_vm3, %v533_v47, %v437_v31  ;;  %v529_v9 = vsel %vm327_vm1, %v948_v14, %v407_v32 }
 0x2b8   : > { %v441_v34 = vpop.permute.xlu0 %440  ;;  %v421_v35 = vpop.permute.xlu1 %420 }
 0x2b9   : > { %v542_v57 = vsel %vm539_vm3, %v535_v54, %v441_v34  ;;  %v534_v4 = vsel %vm532_vm2, %v527_v2, %v421_v35 }
 0x2bc   : > { %v455_v36 = vpop.permute.xlu0 %454  ;;  %v425_v37 = vpop.permute.xlu1 %424 }
 0x2bd   : > { %v547_v51 = vsel %vm546_vm4, %v540_v49, %v455_v36  ;;  %v536_v17 = vsel %vm532_vm2, %v529_v9, %v425_v37 }
 0x2c0   : > { %v459_v38 = vpop.permute.xlu0 %458  ;;  %v439_v39 = vpop.permute.xlu1 %438 }
 0x2c1   : > { %v549_v60 = vsel %vm546_vm4, %v542_v57, %v459_v38  ;;  %v541_v6 = vsel %vm539_vm3, %v534_v4, %v439_v39 }
 0x2c4   : > { %v473_v40 = vpop.permute.xlu0 %472  ;;  %v443_v41 = vpop.permute.xlu1 %442 }
 0x2c5   : > { %v554_v53 = vsel %vm553_vm5, %v547_v51, %v473_v40  ;;  %v543_v22 = vsel %vm539_vm3, %v536_v17, %v443_v41 }
 0x2c8   : > { %v477_v42 = vpop.permute.xlu0 %476  ;;  %v457_v43 = vpop.permute.xlu1 %456 }
 0x2c9   : > { %v556_v61 = vsel %vm553_vm5, %v549_v60, %v477_v42  ;;  %v548_v7 = vsel %vm546_vm4, %v541_v6, %v457_v43 }
 0x2cc   : > { %v491_v44 = vpop.permute.xlu0 %490  ;;  %v461_v45 = vpop.permute.xlu1 %460 }
 0x2cd   : > { %v561_v55 = vsel %vm560_vm6, %v554_v53, %v491_v44  ;;  %v550_v26 = vsel %vm546_vm4, %v543_v22, %v461_v45 }
 0x2d0   : > { %v495_v48 = vpop.permute.xlu0 %494  ;;  %v475_v50 = vpop.permute.xlu1 %474 }
 0x2d1   : > { %v563_v62 = vsel %vm560_vm6, %v556_v61, %v495_v48  ;;  %v555_v11 = vsel %vm553_vm5, %v548_v7, %v475_v50 }
 0x2d4   : > { %v509_v56 = vpop.permute.xlu0 %508  ;;  %v479_v58 = vpop.permute.xlu1 %478 }
 0x2d5   : > { %v568_v59 = vsel %vm567_vm7, %v561_v55, %v509_v56  ;;  %v557_v27 = vsel %vm553_vm5, %v550_v26, %v479_v58 }
 0x2d6   : > { %580 = vrot.lane.b32.xlu0 %v568_v59, %s817_s10 }
 0x2d8   : > { %v513_v63 = vpop.permute.xlu0 %512  ;;  %v493_v0 = vpop.permute.xlu1 %492 }
 0x2d9   : > { %v570_v1 = vsel %vm567_vm7, %v563_v62, %v513_v63  ;;  %v562_v18 = vsel %vm560_vm6, %v555_v11, %v493_v0 }
 0x2da   : > { %584 = vrot.lane.b32.xlu0 %v570_v1, %s817_s10 }
 0x2dc   : > { %v409_v3 = vpop.permute.xlu0 %408  ;;  %v497_v5 = vpop.permute.xlu1 %496 }
 0x2dd   : > { %v564_v29 = vsel %vm560_vm6, %v557_v27, %v497_v5  ;;  %v530_v38 = vsel %vm327_vm1, %v988_v20, %v409_v3 }
 0x2e0   : > { %v427_v13 = vpop.permute.xlu0 %426  ;;  %v511_v19 = vpop.permute.xlu1 %510 }
 0x2e1   : > { %v569_v25 = vsel %vm567_vm7, %v562_v18, %v511_v19  ;;  %v537_v39 = vsel %vm532_vm2, %v530_v38, %v427_v13 }
 0x2e2   : > { %582 = vrot.lane.b32.xlu1 %v569_v25, %s817_s10 }
 0x2e4   : > { %v445_v28 = vpop.permute.xlu0 %444  ;;  %v515_v31 = vpop.permute.xlu1 %514 }
 0x2e5   : > { %v571_v32 = vsel %vm567_vm7, %v564_v29, %v515_v31  ;;  %v544_v41 = vsel %vm539_vm3, %v537_v39, %v445_v28 }
 0x2e6   : > { %586 = vrot.lane.b32.xlu1 %v571_v32, %s817_s10 }
 0x2e8   : > { %v463_v34 = vpop.permute.xlu0 %462  ;;  %v411_v35 = vpop.permute.xlu1 %410 }
 0x2e9   : > { %v551_v43 = vsel %vm546_vm4, %v544_v41, %v463_v34  ;;  %v531_v50 = vsel %vm327_vm1, %v1001_v24, %v411_v35 }
 0x2ec   : > { %v481_v36 = vpop.permute.xlu0 %480  ;;  %v429_v37 = vpop.permute.xlu1 %428 }
 0x2ed   : > { %v558_v44 = vsel %vm553_vm5, %v551_v43, %v481_v36  ;;  %v538_v51 = vsel %vm532_vm2, %v531_v50, %v429_v37 }
 0x2f0   : > { %v499_v40 = vpop.permute.xlu0 %498  ;;  %v447_v42 = vpop.permute.xlu1 %446 }
 0x2f1   : > { %v565_v45 = vsel %vm560_vm6, %v558_v44, %v499_v40  ;;  %v545_v53 = vsel %vm539_vm3, %v538_v51, %v447_v42 }
 0x2f4   : > { %v517_v46 = vpop.permute.xlu0 %516  ;;  %v465_v47 = vpop.permute.xlu1 %464 }
 0x2f5   : > { %v572_v48 = vsel %vm567_vm7, %v565_v45, %v517_v46  ;;  %v552_v54 = vsel %vm546_vm4, %v545_v53, %v465_v47 }
 0x2f6   : > { %588 = vrot.lane.b32.xlu0 %v572_v48, %s817_s10 }
 0x2f8   : > { %v483_v49 = vpop.permute.xlu1 %482 }
 0x2f9   : > { %v559_v55 = vsel %vm553_vm5, %v552_v54, %v483_v49 }
 0x2fc   : > { %v501_v52 = vpop.permute.xlu1 %500 }
 0x2fd   : > { %v566_v56 = vsel %vm560_vm6, %v559_v55, %v501_v52 }
 0x300   : > { %v519_v57 = vpop.permute.xlu1 %518 }
 0x301   : > { %v573_v58 = vsel %vm567_vm7, %v566_v56, %v519_v57 }
 0x302   : > { %590 = vrot.lane.b32.xlu1 %v573_v58, %s817_s10 }
 0x348   : > { %v581_v59 = vpop.permute.xlu0 %580 }
 0x349   : > { %v598_v60 = vmul.f32 %v581_v59, %v893_v15 }
 0x34b   : > { %v604_v61 = vsel %vm327_vm1, %v932_v8, %v598_v60 }
 0x34c   : > { %v611_v62 = vsel %vm610_vm8, %v604_v61, 0.0  ;;  %v585_v63 = vpop.permute.xlu0 %584 }
 0x34d   : > { %617 = vst [vmem:[%s172_s22] sm:$0xff] %v611_v62  ;;  %v600_v0 = vmul.f32 %v585_v63, %v895_v16 }
 0x34f   : > { %v606_v1 = vsel %vm327_vm1, %v936_v10, %v600_v0 }
 0x350   : > { %v613_v2 = vsel %vm610_vm8, %v606_v1, 0.0 }
 0x351   : > { %619 = vst [vmem:[%s172_s22 + $0x10] sm:$0xff] %v613_v2 }
 0x354   : > { %v583_v15 = vpop.permute.xlu1 %582 }
 0x355   : > { %v599_v3 = vmul.f32 %v583_v15, %v897_v21 }
 0x357   : > { %v605_v4 = vsel %vm327_vm1, %v942_v12, %v599_v3 }
 0x358   : > { %v612_v8 = vsel %vm610_vm8, %v605_v4, 0.0  ;;  %v587_v5 = vpop.permute.xlu1 %586 }
 0x359   : > { %618 = vst [vmem:[%s172_s22 + $0x8] sm:$0xff] %v612_v8  ;;  %v601_v6 = vmul.f32 %v587_v5, %v899_v23 }
 0x35b   : > { %v607_v16 = vsel %vm327_vm1, %v948_v14, %v601_v6 }
 0x35c   : > { %v614_v10 = vsel %vm610_vm8, %v607_v16, 0.0 }
 0x35d   : > { %620 = vst [vmem:[%s172_s22 + $0x18] sm:$0xff] %v614_v10 }
 0x368   : > { %v589_v7 = vpop.permute.xlu0 %588 }
 0x369   : > { %v602_v9 = vmul.f32 %v589_v7, %v909_v30 }
 0x36b   : > { %v608_v21 = vsel %vm327_vm1, %v988_v20, %v602_v9 }
 0x36c   : > { %v615_v12 = vsel %vm610_vm8, %v608_v21, 0.0 }
 0x36d   : > { %621 = vst [vmem:[%s172_s22 + $0x20] sm:$0xff] %v615_v12 }
 0x374   : > { %v591_v11 = vpop.permute.xlu1 %590 }
 0x375   : > { %v603_v13 = vmul.f32 %v591_v11, %v911_v33 }
 0x377   : > { %v609_v23 = vsel %vm327_vm1, %v1001_v24, %v603_v13 }
 0x378   : > { %v616_v14 = vsel %vm610_vm8, %v609_v23, 0.0 }
 0x379   : > { %622 = vst [vmem:[%s172_s22 + $0x28] sm:$0xff] %v616_v14 }
 0x37a PF: > { %s13_s12 = sadd.s32 1, %s813_s12  }
 0x37b   : > { %p10_p4 = scmp.ge.s32.totalorder %s13_s12, 4  }
 0x37d   :  { %12 = sbr.rel (!%p10_p4) target bundleno = 1 (0x1), region = 62 }

</bundles_post_ra>
